<compile_context>
chip_gen: v6e
topology: v6e:2x2x1
jax: 0.10.0
libtpu: 0.0.40
codegen_flags: <defaults>
</compile_context>

<pallas_src>
import math
import functools

import jax
import jax.numpy as jnp
from jax.experimental import pallas as pl
from jax.experimental.pallas import tpu as pltpu


HALO = 3  # canonical halo width = max padding of any layer (7x7 depthwise -> 3)


def _ru(x, m):
    return -(-x // m) * m


# ----------------------------- fused stage kernel ----------------------------

def _stage_kernel(x_ref, mask_ref,
                  w1_ref, b1_ref, a1_ref,
                  wd1_ref, bd1_ref, ad1_ref,
                  wd2_ref, bd2_ref, ad2_ref,
                  wt_ref, bt_ref, at_ref,
                  o_ref,
                  bufA, bufB, colbuf,
                  *, H, W, Cin, CinP, Cmid, CmidP, tail):
    """One dec6dw up-stage for a single batch element.

    bufA  : VMEM (CinP,  L) f32   canonical zero-halo'd flattened activation
    bufB  : VMEM (CmidP, L) f32   (ping-pong partner)
    colbuf: VMEM (9*CinP, H*S) bf16  im2col staging for the dense-conv matmuls
    """
    P = HALO
    S = W + 2 * P            # padded row stride (lane stride of canonical bufs)
    HWs = H * S              # flat interior span; lanes n%S >= W of a row = halo
    org = P * S + P          # flat offset of the interior origin

    # --- zero the canonical buffers: the zero halo IS the conv padding ------
    bufA[...] = jnp.zeros_like(bufA)
    bufB[...] = jnp.zeros_like(bufB)

    vmask = mask_ref[...]    # (1, HWs): 1.0 on valid columns, 0.0 on halo cols

    # --- scatter the (Cin, H, W) input into bufA's interior ------------------
    for h in range(H):
        o = (h + P) * S + P
        bufA[0:Cin, o:o + W] = x_ref[0, :, h, :]

    def prelu(v, a_ref):
        return jnp.where(v > 0.0, v, v * a_ref[...])

    def write_interior(dst_ref, val):
        # ONE lane-dense store of the whole interior span; the mask zeroes the
        # inter-row halo columns so the buffer keeps a correct zero halo.
        n = val.shape[0]
        dst_ref[0:n, org:org + HWs] = val * vmask

    def dense_conv(src_ref, cpad, wmat_ref, K, pad):
        """im2col into colbuf + ONE wide bf16 MXU matmul (f32 accumulate)."""
        t = 0
        for kh in range(K):
            for kw in range(K):
                base = (P - pad + kh) * S + (P - pad + kw)
                colbuf[t * cpad:(t + 1) * cpad, :] = (
                    src_ref[0:cpad, base:base + HWs].astype(jnp.bfloat16))
                t += 1
        rows = K * K * cpad
        return jnp.dot(wmat_ref[...], colbuf[0:rows, :],
                       preferred_element_type=jnp.float32)

    def dw_conv(src_ref, wd_ref):
        """7x7 depthwise conv: 49 VPU MACs, 4 partial accumulators for ILP."""
        wv = wd_ref[...]                                   # (CmidP, 49) f32
        accs = [jnp.zeros((CmidP, HWs), jnp.float32) for _ in range(4)]
        t = 0
        for kh in range(7):
            for kw in range(7):
                base = kh * S + kw                         # pad == P == 3
                accs[t & 3] = accs[t & 3] + (
                    wv[:, t:t + 1] * src_ref[0:CmidP, base:base + HWs])
                t += 1
        return (accs[0] + accs[1]) + (accs[2] + accs[3])

    # --- Conv2(Cin -> Cmid, 3x3, p=1) + PReLU :  bufA -> bufB ---------------
    acc = prelu(dense_conv(bufA, CinP, w1_ref, 3, 1) + b1_ref[...], a1_ref)
    write_interior(bufB, acc)

    # --- DWConv2(7x7, p=3, groups=C) + PReLU, twice : bufB -> bufA -> bufB ---
    acc = prelu(dw_conv(bufB, wd1_ref) + bd1_ref[...], ad1_ref)
    write_interior(bufA, acc)
    acc = prelu(dw_conv(bufA, wd2_ref) + bd2_ref[...], ad2_ref)
    write_interior(bufB, acc)

    # --- stage tail -----------------------------------------------------------
    if tail == "deconv":
        # ConvTranspose2d(4,4,s=2,p=1) + PReLU via sub-pixel decomposition:
        # output phase (a,b) (row parity a, col parity b) is a 2x2 conv of the
        # un-upsampled activation with w[(3-a)-2dh, (3-b)-2dw].
        bt = bt_ref[...]
        for a in (0, 1):
            for b in (0, 1):
                t = 0
                for dh in (0, 1):
                    for dw in (0, 1):
                        base = (P - 1 + a + dh) * S + (P - 1 + b + dw)
                        colbuf[t * CmidP:(t + 1) * CmidP, :] = (
                            bufB[0:CmidP, base:base + HWs].astype(jnp.bfloat16))
                        t += 1
                accp = jnp.dot(wt_ref[2 * a + b], colbuf[0:4 * CmidP, :],
                               preferred_element_type=jnp.float32)
                accp = prelu(accp + bt, at_ref)
                # one lane-dense HBM store per phase (halo cols sliced off in
                # the wrapper)
                o_ref[0, 2 * a + b, :, :] = accp[0:Cmid, :]
    else:
        # final Conv2d(Cmid -> out, 3x3, p=1) with fused sigmoid
        acc = jax.nn.sigmoid(dense_conv(bufB, CmidP, wt_ref, 3, 1) + bt_ref[...])
        o_ref[0, :, :] = acc


# ------------------------------ stage wrapper --------------------------------

def run_stage(x, sp, *, tail):
    """x: (B, Cin, H, W) f32.  tail in {"deconv", "sigmoid"}."""
    B, Cin, H, W = x.shape
    Cmid = sp["cmid"]
    CinP, CmidP = _ru(Cin, 16), _ru(Cmid, 16)
    S = W + 2 * HALO
    L = (H + 2 * HALO + 1) * S          # flat padded length (+1 row of slack)
    HWs = H * S

    # lane-validity mask: 1.0 on the W valid columns of each row, 0.0 on the
    # inter-row halo columns (lets the kernel use one wide masked store/layer).
    col = jnp.arange(HWs, dtype=jnp.int32) % S
    vmask = (col < W).astype(jnp.float32).reshape(1, HWs)

    kern = functools.partial(_stage_kernel, H=H, W=W, Cin=Cin, CinP=CinP,
                             Cmid=Cmid, CmidP=CmidP, tail=tail)

    if tail == "deconv":
        out_shape = jax.ShapeDtypeStruct((B, 4, Cmid, HWs), jnp.float32)
        out_spec = pl.BlockSpec((1, 4, Cmid, HWs), lambda i: (i, 0, 0, 0))
    else:
        Cout = sp["wt"].shape[0]
        out_shape = jax.ShapeDtypeStruct((B, Cout, HWs), jnp.float32)
        out_spec = pl.BlockSpec((1, Cout, HWs), lambda i: (i, 0, 0))

    def bcast(a):
        nd = a.ndim
        return pl.BlockSpec(a.shape, lambda i, nd=nd: (0,) * nd)

    wargs = (sp["w1"], sp["b1"], sp["a1"],
             sp["wd1"], sp["bd1"], sp["ad1"],
             sp["wd2"], sp["bd2"], sp["ad2"],
             sp["wt"], sp["bt"], sp["at"])

    out = pl.pallas_call(
        kern,
        out_shape=out_shape,
        grid=(B,),
        in_specs=[pl.BlockSpec((1, Cin, H, W), lambda i: (i, 0, 0, 0)),
                  pl.BlockSpec((1, HWs), lambda i: (0, 0))]
                 + [bcast(a) for a in wargs],
        out_specs=out_spec,
        scratch_shapes=[pltpu.VMEM((CinP, L), jnp.float32),
                        pltpu.VMEM((CmidP, L), jnp.float32),
                        pltpu.VMEM((9 * CinP, HWs), jnp.bfloat16)],
        compiler_params=pltpu.CompilerParams(
            dimension_semantics=("parallel",)),     # 2 TCs on v7x shard batch
    )(x, vmask, *wargs)

    if tail == "deconv":
        # (B, phase=a*2+b, C, H*S) -> drop halo cols, interleave -> (B,C,2H,2W)
        out = out.reshape(B, 2, 2, Cmid, H, S)[..., :W]
        out = jnp.transpose(out, (0, 3, 4, 1, 5, 2)).reshape(B, Cmid, 2 * H, 2 * W)
    else:
        Cout = out.shape[1]
        out = out.reshape(B, Cout, H, S)[..., :W]
    return out


# ----------------------------- parameter packing ------------------------------
# Raw weights are kept in PyTorch layouts so the checkpoint mapping is explicit:
#   Conv2d            : (Cout, Cin, K, K)
#   depthwise Conv2d  : (C, 1, K, K)         (groups == C)
#   ConvTranspose2d   : (Cin, Cout, 4, 4)

def _pack_dense(w, cinP, coutP=None):
    cout, cin, k, _ = w.shape
    coutP = cout if coutP is None else coutP
    wt = jnp.transpose(w, (0, 2, 3, 1))                    # (Cout, K, K, Cin)
    wt = jnp.pad(wt, ((0, coutP - cout), (0, 0), (0, 0), (0, cinP - cin)))
    return wt.reshape(coutP, k * k * cinP).astype(jnp.bfloat16)


def _pack_dw(w, cP):
    c, _, k, _ = w.shape
    return jnp.pad(w.reshape(c, k * k), ((0, cP - c), (0, 0))).astype(jnp.float32)


def _pack_vec(v, cP):
    c = v.shape[0]
    return jnp.pad(v, (0, cP - c)).reshape(cP, 1).astype(jnp.float32)


def _pack_deconv(w, cP):
    # ConvTranspose2d(4,4,s=2,p=1) weight (Cin, Cout, 4, 4) -> sub-pixel phase
    # weights (4, CoutP, 4*CinP): phase (a,b), tap (dh,dw) uses
    # w[:, :, (3-a)-2dh, (3-b)-2dw] transposed to (Cout, Cin).
    cin, cout, _, _ = w.shape
    phases = []
    for a in (0, 1):
        for b in (0, 1):
            blocks = []
            for dh in (0, 1):
                for dw in (0, 1):
                    kh = 3 - a - 2 * dh
                    kw = 3 - b - 2 * dw
                    blk = w[:, :, kh, kw].T                # (Cout, Cin)
                    blk = jnp.pad(blk, ((0, cP - cout), (0, cP - cin)))
                    blocks.append(blk)
            phases.append(jnp.concatenate(blocks, axis=1))  # (cP, 4*cP)
    return jnp.stack(phases, axis=0).astype(jnp.bfloat16)


def init_dec6dw_params(key, c, out=3):
    """Random parameters in PyTorch layouts, mirroring dec6dw._init_weights."""
    def conv_w(k, cout, cin, ks, groups=1):
        fan_out = ks * ks * cout // groups
        return (jax.random.normal(k, (cout, cin // groups, ks, ks), jnp.float32)
                * math.sqrt(2.0 / fan_out))

    keys = iter(jax.random.split(key, 32))
    raw = {}
    for name, cin, cmid in (("up0", 17 + 4 * c, 4 * c),
                            ("up1", 17 + 2 * c + 4 * c, 2 * c),
                            ("up2", 17 + 2 * c + c, c)):
        st = {"w1": conv_w(next(keys), cmid, cin, 3),
              "b1": jnp.zeros((cmid,), jnp.float32),
              "a1": jnp.full((cmid,), 0.25, jnp.float32),
              "wd1": conv_w(next(keys), cmid, cmid, 7, groups=cmid),
              "bd1": jnp.zeros((cmid,), jnp.float32),
              "ad1": jnp.full((cmid,), 0.25, jnp.float32),
              "wd2": conv_w(next(keys), cmid, cmid, 7, groups=cmid),
              "bd2": jnp.zeros((cmid,), jnp.float32),
              "ad2": jnp.full((cmid,), 0.25, jnp.float32)}
        if name != "up2":
            st["wt"] = (jax.random.normal(next(keys), (cmid, cmid, 4, 4),
                                          jnp.float32)
                        * math.sqrt(1.0 / (cmid * 16)))     # ConvTranspose2d
            st["bt"] = jnp.zeros((cmid,), jnp.float32)
            st["at"] = jnp.full((cmid,), 0.25, jnp.float32)
        else:
            st["wt"] = conv_w(next(keys), out, cmid, 3)     # final Conv2d
            st["bt"] = jnp.zeros((out,), jnp.float32)
        raw[name] = st
    return raw


def pack_params(raw, c, out=3):
    packed = {}
    for name, cmid, has_deconv in (("up0", 4 * c, True),
                                   ("up1", 2 * c, True),
                                   ("up2", c, False)):
        st = raw[name]
        cinP = _ru(st["w1"].shape[1], 16)
        cmidP = _ru(cmid, 16)
        sp = {"cmid": cmid,
              "w1": _pack_dense(st["w1"], cinP, cmidP),
              "b1": _pack_vec(st["b1"], cmidP),
              "a1": _pack_vec(st["a1"], cmidP),
              "wd1": _pack_dw(st["wd1"], cmidP),
              "bd1": _pack_vec(st["bd1"], cmidP),
              "ad1": _pack_vec(st["ad1"], cmidP),
              "wd2": _pack_dw(st["wd2"], cmidP),
              "bd2": _pack_vec(st["bd2"], cmidP),
              "ad2": _pack_vec(st["ad2"], cmidP)}
        if has_deconv:
            sp["wt"] = _pack_deconv(st["wt"], cmidP)         # (4, cmidP, 4*cmidP)
            sp["bt"] = _pack_vec(st["bt"], cmidP)
            sp["at"] = _pack_vec(st["at"], cmidP)
        else:
            sp["wt"] = _pack_dense(st["wt"], cmidP)          # (out, 9*cmidP)
            sp["bt"] = st["bt"].reshape(out, 1).astype(jnp.float32)
            sp["at"] = jnp.zeros((out, 1), jnp.float32)      # unused (sigmoid)
        packed[name] = sp
    return packed


# --------------------------------- forward -----------------------------------

def dec6dw_forward(packed, imgs, wimgs, masks, flows, Cs):
    x = jnp.concatenate([imgs[-1], wimgs[-1], Cs[-1], flows[-1], masks[-1]], axis=1)
    x = run_stage(x, packed["up0"], tail="deconv")
    x = jnp.concatenate([x, imgs[-2], wimgs[-2], Cs[-2], flows[-2], masks[-2]], axis=1)
    x = run_stage(x, packed["up1"], tail="deconv")
    x = jnp.concatenate([x, imgs[-3], wimgs[-3], Cs[-3], flows[-3], masks[-3]], axis=1)
    x = run_stage(x, packed["up2"], tail="sigmoid")
    return x


# ----------------------------------- main -------------------------------------

if __name__ == "__main__":
    B, c, out = 2, 4, 3
    sizes = [(16, 16), (8, 8), (4, 4)]     # pyramid levels [-3, -2, -1] fine->coarse
    cs_ch = [c, 2 * c, 4 * c]

    key = jax.random.PRNGKey(0)
    kp, kd = jax.random.split(key)
    raw = init_dec6dw_params(kp, c, out)
    packed = pack_params(raw, c, out)

    dks = iter(jax.random.split(kd, 32))
    imgs, wimgs, masks, flows, Cs = [], [], [], [], []
    for (h, w), cc in zip(sizes, cs_ch):
        imgs.append(jax.random.normal(next(dks), (B, 6, h, w), jnp.float32))
        wimgs.append(jax.random.normal(next(dks), (B, 6, h, w), jnp.float32))
        masks.append(jax.random.normal(next(dks), (B, 1, h, w), jnp.float32))
        flows.append(jax.random.normal(next(dks), (B, 4, h, w), jnp.float32))
        Cs.append(jax.random.normal(next(dks), (B, cc, h, w), jnp.float32))

    y = dec6dw_forward(packed, imgs, wimgs, masks, flows, Cs)
    y = jax.block_until_ready(y)
    assert y.shape == (B, out, 16, 16), y.shape
    assert bool(jnp.all(jnp.isfinite(y)))
    assert bool(jnp.all((y >= 0.0) & (y <= 1.0)))
    print("KERNEL_OK")
</pallas_src>

<mosaic_0001>
module attributes {stable_mosaic.version = 11 : i64} {
  func.func @_stage_kernel(%arg0: i32, %arg1: memref<1x33x4x4xf32, #tpu.memory_space<vmem>>, %arg2: memref<1x40xf32, #tpu.memory_space<vmem>>, %arg3: memref<16x432xbf16, #tpu.memory_space<vmem>>, %arg4: memref<16x1xf32, #tpu.memory_space<vmem>>, %arg5: memref<16x1xf32, #tpu.memory_space<vmem>>, %arg6: memref<16x49xf32, #tpu.memory_space<vmem>>, %arg7: memref<16x1xf32, #tpu.memory_space<vmem>>, %arg8: memref<16x1xf32, #tpu.memory_space<vmem>>, %arg9: memref<16x49xf32, #tpu.memory_space<vmem>>, %arg10: memref<16x1xf32, #tpu.memory_space<vmem>>, %arg11: memref<16x1xf32, #tpu.memory_space<vmem>>, %arg12: memref<4x16x64xbf16, #tpu.memory_space<vmem>>, %arg13: memref<16x1xf32, #tpu.memory_space<vmem>>, %arg14: memref<16x1xf32, #tpu.memory_space<vmem>>, %arg15: memref<1x4x16x40xf32, #tpu.memory_space<vmem>>, %arg16: memref<48x110xf32, #tpu.memory_space<vmem>>, %arg17: memref<16x110xf32, #tpu.memory_space<vmem>>, %arg18: memref<432x40xbf16, #tpu.memory_space<vmem>>) attributes {dimension_semantics = [#tpu.dimension_semantics<parallel>], iteration_bounds = array<i64: 2>, scalar_prefetch = 0 : i64, scratch_operands = 3 : i64, tpu.core_type = #tpu.core_type<tc>, window_params = [{transform_indices = @transform_0, window_bounds = array<i64: 1, 33, 4, 4>}, {pipeline_mode = #tpu.pipeline_mode<synchronous>, transform_indices = @transform_1, window_bounds = array<i64: 1, 40>}, {pipeline_mode = #tpu.pipeline_mode<synchronous>, transform_indices = @transform_2, window_bounds = array<i64: 16, 432>}, {pipeline_mode = #tpu.pipeline_mode<synchronous>, transform_indices = @transform_3, window_bounds = array<i64: 16, 1>}, {pipeline_mode = #tpu.pipeline_mode<synchronous>, transform_indices = @transform_4, window_bounds = array<i64: 16, 1>}, {pipeline_mode = #tpu.pipeline_mode<synchronous>, transform_indices = @transform_5, window_bounds = array<i64: 16, 49>}, {pipeline_mode = #tpu.pipeline_mode<synchronous>, transform_indices = @transform_6, window_bounds = array<i64: 16, 1>}, {pipeline_mode = #tpu.pipeline_mode<synchronous>, transform_indices = @transform_7, window_bounds = array<i64: 16, 1>}, {pipeline_mode = #tpu.pipeline_mode<synchronous>, transform_indices = @transform_8, window_bounds = array<i64: 16, 49>}, {pipeline_mode = #tpu.pipeline_mode<synchronous>, transform_indices = @transform_9, window_bounds = array<i64: 16, 1>}, {pipeline_mode = #tpu.pipeline_mode<synchronous>, transform_indices = @transform_10, window_bounds = array<i64: 16, 1>}, {pipeline_mode = #tpu.pipeline_mode<synchronous>, transform_indices = @transform_11, window_bounds = array<i64: 4, 16, 64>}, {pipeline_mode = #tpu.pipeline_mode<synchronous>, transform_indices = @transform_12, window_bounds = array<i64: 16, 1>}, {pipeline_mode = #tpu.pipeline_mode<synchronous>, transform_indices = @transform_13, window_bounds = array<i64: 16, 1>}, {transform_indices = @transform_14, window_bounds = array<i64: 1, 4, 16, 40>}]} {
    %cst = arith.constant 0.000000e+00 : f32
    %0 = vector.broadcast %cst : f32 to vector<48x110xf32>
    %c0 = arith.constant 0 : index
    %c0_0 = arith.constant 0 : index
    %1 = vector.load %arg16[%c0, %c0_0] : memref<48x110xf32, #tpu.memory_space<vmem>>, vector<48x110xf32>
    tpu.vector_store %arg16[%c0, %c0_0], %0 {strides = array<i32>} : memref<48x110xf32, #tpu.memory_space<vmem>>, vector<48x110xf32>,
    %cst_1 = arith.constant 0.000000e+00 : f32
    %2 = vector.broadcast %cst_1 : f32 to vector<16x110xf32>
    %c0_2 = arith.constant 0 : index
    %c0_3 = arith.constant 0 : index
    %3 = vector.load %arg17[%c0_2, %c0_3] : memref<16x110xf32, #tpu.memory_space<vmem>>, vector<16x110xf32>
    tpu.vector_store %arg17[%c0_2, %c0_3], %2 {strides = array<i32>} : memref<16x110xf32, #tpu.memory_space<vmem>>, vector<16x110xf32>,
    %c0_4 = arith.constant 0 : index
    %c0_5 = arith.constant 0 : index
    %4 = vector.load %arg2[%c0_4, %c0_5] : memref<1x40xf32, #tpu.memory_space<vmem>>, vector<1x40xf32>
    %c0_6 = arith.constant 0 : index
    %c0_7 = arith.constant 0 : index
    %c0_8 = arith.constant 0 : index
    %c0_9 = arith.constant 0 : index
    %5 = vector.load %arg1[%c0_6, %c0_7, %c0_8, %c0_9] : memref<1x33x4x4xf32, #tpu.memory_space<vmem>>, vector<1x33x1x4xf32>
    %6 = vector.shape_cast %5 : vector<1x33x1x4xf32> to vector<33x4xf32>
    %c0_10 = arith.constant 0 : index
    %c33 = arith.constant 33 : index
    %7 = vector.load %arg16[%c0_10, %c33] : memref<48x110xf32, #tpu.memory_space<vmem>>, vector<33x4xf32>
    tpu.vector_store %arg16[%c0_10, %c33], %6 {strides = array<i32>} : memref<48x110xf32, #tpu.memory_space<vmem>>, vector<33x4xf32>,
    %c0_11 = arith.constant 0 : index
    %c0_12 = arith.constant 0 : index
    %c1 = arith.constant 1 : index
    %c0_13 = arith.constant 0 : index
    %8 = vector.load %arg1[%c0_11, %c0_12, %c1, %c0_13] : memref<1x33x4x4xf32, #tpu.memory_space<vmem>>, vector<1x33x1x4xf32>
    %9 = vector.shape_cast %8 : vector<1x33x1x4xf32> to vector<33x4xf32>
    %c0_14 = arith.constant 0 : index
    %c43 = arith.constant 43 : index
    %10 = vector.load %arg16[%c0_14, %c43] : memref<48x110xf32, #tpu.memory_space<vmem>>, vector<33x4xf32>
    tpu.vector_store %arg16[%c0_14, %c43], %9 {strides = array<i32>} : memref<48x110xf32, #tpu.memory_space<vmem>>, vector<33x4xf32>,
    %c0_15 = arith.constant 0 : index
    %c0_16 = arith.constant 0 : index
    %c2 = arith.constant 2 : index
    %c0_17 = arith.constant 0 : index
    %11 = vector.load %arg1[%c0_15, %c0_16, %c2, %c0_17] : memref<1x33x4x4xf32, #tpu.memory_space<vmem>>, vector<1x33x1x4xf32>
    %12 = vector.shape_cast %11 : vector<1x33x1x4xf32> to vector<33x4xf32>
    %c0_18 = arith.constant 0 : index
    %c53 = arith.constant 53 : index
    %13 = vector.load %arg16[%c0_18, %c53] : memref<48x110xf32, #tpu.memory_space<vmem>>, vector<33x4xf32>
    tpu.vector_store %arg16[%c0_18, %c53], %12 {strides = array<i32>} : memref<48x110xf32, #tpu.memory_space<vmem>>, vector<33x4xf32>,
    %c0_19 = arith.constant 0 : index
    %c0_20 = arith.constant 0 : index
    %c3 = arith.constant 3 : index
    %c0_21 = arith.constant 0 : index
    %14 = vector.load %arg1[%c0_19, %c0_20, %c3, %c0_21] : memref<1x33x4x4xf32, #tpu.memory_space<vmem>>, vector<1x33x1x4xf32>
    %15 = vector.shape_cast %14 : vector<1x33x1x4xf32> to vector<33x4xf32>
    %c0_22 = arith.constant 0 : index
    %c63 = arith.constant 63 : index
    %16 = vector.load %arg16[%c0_22, %c63] : memref<48x110xf32, #tpu.memory_space<vmem>>, vector<33x4xf32>
    tpu.vector_store %arg16[%c0_22, %c63], %15 {strides = array<i32>} : memref<48x110xf32, #tpu.memory_space<vmem>>, vector<33x4xf32>,
    %c0_23 = arith.constant 0 : index
    %c22 = arith.constant 22 : index
    %17 = vector.load %arg16[%c0_23, %c22] : memref<48x110xf32, #tpu.memory_space<vmem>>, vector<48x40xf32>
    %18 = arith.truncf %17 : vector<48x40xf32> to vector<48x40xbf16>
    %c0_24 = arith.constant 0 : index
    %c0_25 = arith.constant 0 : index
    %19 = vector.load %arg18[%c0_24, %c0_25] : memref<432x40xbf16, #tpu.memory_space<vmem>>, vector<48x40xbf16>
    tpu.vector_store %arg18[%c0_24, %c0_25], %18 {strides = array<i32>} : memref<432x40xbf16, #tpu.memory_space<vmem>>, vector<48x40xbf16>,
    %c0_26 = arith.constant 0 : index
    %c23 = arith.constant 23 : index
    %20 = vector.load %arg16[%c0_26, %c23] : memref<48x110xf32, #tpu.memory_space<vmem>>, vector<48x40xf32>
    %21 = arith.truncf %20 : vector<48x40xf32> to vector<48x40xbf16>
    %c48 = arith.constant 48 : index
    %c0_27 = arith.constant 0 : index
    %22 = vector.load %arg18[%c48, %c0_27] : memref<432x40xbf16, #tpu.memory_space<vmem>>, vector<48x40xbf16>
    tpu.vector_store %arg18[%c48, %c0_27], %21 {strides = array<i32>} : memref<432x40xbf16, #tpu.memory_space<vmem>>, vector<48x40xbf16>,
    %c0_28 = arith.constant 0 : index
    %c24 = arith.constant 24 : index
    %23 = vector.load %arg16[%c0_28, %c24] : memref<48x110xf32, #tpu.memory_space<vmem>>, vector<48x40xf32>
    %24 = arith.truncf %23 : vector<48x40xf32> to vector<48x40xbf16>
    %c96 = arith.constant 96 : index
    %c0_29 = arith.constant 0 : index
    %25 = vector.load %arg18[%c96, %c0_29] : memref<432x40xbf16, #tpu.memory_space<vmem>>, vector<48x40xbf16>
    tpu.vector_store %arg18[%c96, %c0_29], %24 {strides = array<i32>} : memref<432x40xbf16, #tpu.memory_space<vmem>>, vector<48x40xbf16>,
    %c0_30 = arith.constant 0 : index
    %c32 = arith.constant 32 : index
    %26 = vector.load %arg16[%c0_30, %c32] : memref<48x110xf32, #tpu.memory_space<vmem>>, vector<48x40xf32>
    %27 = arith.truncf %26 : vector<48x40xf32> to vector<48x40xbf16>
    %c144 = arith.constant 144 : index
    %c0_31 = arith.constant 0 : index
    %28 = vector.load %arg18[%c144, %c0_31] : memref<432x40xbf16, #tpu.memory_space<vmem>>, vector<48x40xbf16>
    tpu.vector_store %arg18[%c144, %c0_31], %27 {strides = array<i32>} : memref<432x40xbf16, #tpu.memory_space<vmem>>, vector<48x40xbf16>,
    %c0_32 = arith.constant 0 : index
    %c33_33 = arith.constant 33 : index
    %29 = vector.load %arg16[%c0_32, %c33_33] : memref<48x110xf32, #tpu.memory_space<vmem>>, vector<48x40xf32>
    %30 = arith.truncf %29 : vector<48x40xf32> to vector<48x40xbf16>
    %c192 = arith.constant 192 : index
    %c0_34 = arith.constant 0 : index
    %31 = vector.load %arg18[%c192, %c0_34] : memref<432x40xbf16, #tpu.memory_space<vmem>>, vector<48x40xbf16>
    tpu.vector_store %arg18[%c192, %c0_34], %30 {strides = array<i32>} : memref<432x40xbf16, #tpu.memory_space<vmem>>, vector<48x40xbf16>,
    %c0_35 = arith.constant 0 : index
    %c34 = arith.constant 34 : index
    %32 = vector.load %arg16[%c0_35, %c34] : memref<48x110xf32, #tpu.memory_space<vmem>>, vector<48x40xf32>
    %33 = arith.truncf %32 : vector<48x40xf32> to vector<48x40xbf16>
    %c240 = arith.constant 240 : index
    %c0_36 = arith.constant 0 : index
    %34 = vector.load %arg18[%c240, %c0_36] : memref<432x40xbf16, #tpu.memory_space<vmem>>, vector<48x40xbf16>
    tpu.vector_store %arg18[%c240, %c0_36], %33 {strides = array<i32>} : memref<432x40xbf16, #tpu.memory_space<vmem>>, vector<48x40xbf16>,
    %c0_37 = arith.constant 0 : index
    %c42 = arith.constant 42 : index
    %35 = vector.load %arg16[%c0_37, %c42] : memref<48x110xf32, #tpu.memory_space<vmem>>, vector<48x40xf32>
    %36 = arith.truncf %35 : vector<48x40xf32> to vector<48x40xbf16>
    %c288 = arith.constant 288 : index
    %c0_38 = arith.constant 0 : index
    %37 = vector.load %arg18[%c288, %c0_38] : memref<432x40xbf16, #tpu.memory_space<vmem>>, vector<48x40xbf16>
    tpu.vector_store %arg18[%c288, %c0_38], %36 {strides = array<i32>} : memref<432x40xbf16, #tpu.memory_space<vmem>>, vector<48x40xbf16>,
    %c0_39 = arith.constant 0 : index
    %c43_40 = arith.constant 43 : index
    %38 = vector.load %arg16[%c0_39, %c43_40] : memref<48x110xf32, #tpu.memory_space<vmem>>, vector<48x40xf32>
    %39 = arith.truncf %38 : vector<48x40xf32> to vector<48x40xbf16>
    %c336 = arith.constant 336 : index
    %c0_41 = arith.constant 0 : index
    %40 = vector.load %arg18[%c336, %c0_41] : memref<432x40xbf16, #tpu.memory_space<vmem>>, vector<48x40xbf16>
    tpu.vector_store %arg18[%c336, %c0_41], %39 {strides = array<i32>} : memref<432x40xbf16, #tpu.memory_space<vmem>>, vector<48x40xbf16>,
    %c0_42 = arith.constant 0 : index
    %c44 = arith.constant 44 : index
    %41 = vector.load %arg16[%c0_42, %c44] : memref<48x110xf32, #tpu.memory_space<vmem>>, vector<48x40xf32>
    %42 = arith.truncf %41 : vector<48x40xf32> to vector<48x40xbf16>
    %c384 = arith.constant 384 : index
    %c0_43 = arith.constant 0 : index
    %43 = vector.load %arg18[%c384, %c0_43] : memref<432x40xbf16, #tpu.memory_space<vmem>>, vector<48x40xbf16>
    tpu.vector_store %arg18[%c384, %c0_43], %42 {strides = array<i32>} : memref<432x40xbf16, #tpu.memory_space<vmem>>, vector<48x40xbf16>,
    %c0_44 = arith.constant 0 : index
    %c0_45 = arith.constant 0 : index
    %44 = vector.load %arg3[%c0_44, %c0_45] : memref<16x432xbf16, #tpu.memory_space<vmem>>, vector<16x432xbf16>
    %c0_46 = arith.constant 0 : index
    %c0_47 = arith.constant 0 : index
    %45 = vector.load %arg18[%c0_46, %c0_47] : memref<432x40xbf16, #tpu.memory_space<vmem>>, vector<432x40xbf16>
    %cst_48 = arith.constant dense<0.000000e+00> : vector<16x40xf32>
    %46 = tpu.matmul %44, %45, %cst_48 {dimension_numbers = #tpu.dot_dimension_numbers<[1], [0], [0], [1], [0, 0, 1, 1], [], []>} : vector<16x432xbf16>, vector<432x40xbf16>, vector<16x40xf32> -> vector<16x40xf32>
    %c0_49 = arith.constant 0 : index
    %c0_50 = arith.constant 0 : index
    %47 = vector.load %arg4[%c0_49, %c0_50] : memref<16x1xf32, #tpu.memory_space<vmem>>, vector<16x1xf32>
    %48 = vector.broadcast %47 : vector<16x1xf32> to vector<16x40xf32>
    %49 = arith.addf %46, %48 : vector<16x40xf32>
    %cst_51 = arith.constant 0.000000e+00 : f32
    %50 = vector.broadcast %cst_51 : f32 to vector<16x40xf32>
    %51 = arith.cmpf ogt, %49, %50 : vector<16x40xf32>
    %c0_52 = arith.constant 0 : index
    %c0_53 = arith.constant 0 : index
    %52 = vector.load %arg5[%c0_52, %c0_53] : memref<16x1xf32, #tpu.memory_space<vmem>>, vector<16x1xf32>
    %53 = vector.broadcast %52 : vector<16x1xf32> to vector<16x40xf32>
    %54 = arith.mulf %49, %53 : vector<16x40xf32>
    %55 = arith.select %51, %49, %54 : vector<16x40xi1>, vector<16x40xf32>
    %56 = vector.broadcast %4 : vector<1x40xf32> to vector<16x40xf32>
    %57 = arith.mulf %55, %56 : vector<16x40xf32>
    %c0_54 = arith.constant 0 : index
    %c33_55 = arith.constant 33 : index
    %58 = vector.load %arg17[%c0_54, %c33_55] : memref<16x110xf32, #tpu.memory_space<vmem>>, vector<16x40xf32>
    tpu.vector_store %arg17[%c0_54, %c33_55], %57 {strides = array<i32>} : memref<16x110xf32, #tpu.memory_space<vmem>>, vector<16x40xf32>,
    %c0_56 = arith.constant 0 : index
    %c0_57 = arith.constant 0 : index
    %59 = vector.load %arg6[%c0_56, %c0_57] : memref<16x49xf32, #tpu.memory_space<vmem>>, vector<16x49xf32>
    %cst_58 = arith.constant 0.000000e+00 : f32
    %60 = vector.broadcast %cst_58 : f32 to vector<16x40xf32>
    %cst_59 = arith.constant 0.000000e+00 : f32
    %61 = vector.broadcast %cst_59 : f32 to vector<16x40xf32>
    %cst_60 = arith.constant 0.000000e+00 : f32
    %62 = vector.broadcast %cst_60 : f32 to vector<16x40xf32>
    %cst_61 = arith.constant 0.000000e+00 : f32
    %63 = vector.broadcast %cst_61 : f32 to vector<16x40xf32>
    %64 = vector.extract_strided_slice %59 {offsets = [0, 0], sizes = [16, 1], strides = [1, 1]} : vector<16x49xf32> to vector<16x1xf32>
    %c0_62 = arith.constant 0 : index
    %c0_63 = arith.constant 0 : index
    %65 = vector.load %arg17[%c0_62, %c0_63] : memref<16x110xf32, #tpu.memory_space<vmem>>, vector<16x40xf32>
    %66 = vector.broadcast %64 : vector<16x1xf32> to vector<16x40xf32>
    %67 = arith.mulf %66, %65 : vector<16x40xf32>
    %68 = arith.addf %60, %67 : vector<16x40xf32>
    %69 = vector.extract_strided_slice %59 {offsets = [0, 1], sizes = [16, 1], strides = [1, 1]} : vector<16x49xf32> to vector<16x1xf32>
    %c0_64 = arith.constant 0 : index
    %c1_65 = arith.constant 1 : index
    %70 = vector.load %arg17[%c0_64, %c1_65] : memref<16x110xf32, #tpu.memory_space<vmem>>, vector<16x40xf32>
    %71 = vector.broadcast %69 : vector<16x1xf32> to vector<16x40xf32>
    %72 = arith.mulf %71, %70 : vector<16x40xf32>
    %73 = arith.addf %61, %72 : vector<16x40xf32>
    %74 = vector.extract_strided_slice %59 {offsets = [0, 2], sizes = [16, 1], strides = [1, 1]} : vector<16x49xf32> to vector<16x1xf32>
    %c0_66 = arith.constant 0 : index
    %c2_67 = arith.constant 2 : index
    %75 = vector.load %arg17[%c0_66, %c2_67] : memref<16x110xf32, #tpu.memory_space<vmem>>, vector<16x40xf32>
    %76 = vector.broadcast %74 : vector<16x1xf32> to vector<16x40xf32>
    %77 = arith.mulf %76, %75 : vector<16x40xf32>
    %78 = arith.addf %62, %77 : vector<16x40xf32>
    %79 = vector.extract_strided_slice %59 {offsets = [0, 3], sizes = [16, 1], strides = [1, 1]} : vector<16x49xf32> to vector<16x1xf32>
    %c0_68 = arith.constant 0 : index
    %c3_69 = arith.constant 3 : index
    %80 = vector.load %arg17[%c0_68, %c3_69] : memref<16x110xf32, #tpu.memory_space<vmem>>, vector<16x40xf32>
    %81 = vector.broadcast %79 : vector<16x1xf32> to vector<16x40xf32>
    %82 = arith.mulf %81, %80 : vector<16x40xf32>
    %83 = arith.addf %63, %82 : vector<16x40xf32>
    %84 = vector.extract_strided_slice %59 {offsets = [0, 4], sizes = [16, 1], strides = [1, 1]} : vector<16x49xf32> to vector<16x1xf32>
    %c0_70 = arith.constant 0 : index
    %c4 = arith.constant 4 : index
    %85 = vector.load %arg17[%c0_70, %c4] : memref<16x110xf32, #tpu.memory_space<vmem>>, vector<16x40xf32>
    %86 = vector.broadcast %84 : vector<16x1xf32> to vector<16x40xf32>
    %87 = arith.mulf %86, %85 : vector<16x40xf32>
    %88 = arith.addf %68, %87 : vector<16x40xf32>
    %89 = vector.extract_strided_slice %59 {offsets = [0, 5], sizes = [16, 1], strides = [1, 1]} : vector<16x49xf32> to vector<16x1xf32>
    %c0_71 = arith.constant 0 : index
    %c5 = arith.constant 5 : index
    %90 = vector.load %arg17[%c0_71, %c5] : memref<16x110xf32, #tpu.memory_space<vmem>>, vector<16x40xf32>
    %91 = vector.broadcast %89 : vector<16x1xf32> to vector<16x40xf32>
    %92 = arith.mulf %91, %90 : vector<16x40xf32>
    %93 = arith.addf %73, %92 : vector<16x40xf32>
    %94 = vector.extract_strided_slice %59 {offsets = [0, 6], sizes = [16, 1], strides = [1, 1]} : vector<16x49xf32> to vector<16x1xf32>
    %c0_72 = arith.constant 0 : index
    %c6 = arith.constant 6 : index
    %95 = vector.load %arg17[%c0_72, %c6] : memref<16x110xf32, #tpu.memory_space<vmem>>, vector<16x40xf32>
    %96 = vector.broadcast %94 : vector<16x1xf32> to vector<16x40xf32>
    %97 = arith.mulf %96, %95 : vector<16x40xf32>
    %98 = arith.addf %78, %97 : vector<16x40xf32>
    %99 = vector.extract_strided_slice %59 {offsets = [0, 7], sizes = [16, 1], strides = [1, 1]} : vector<16x49xf32> to vector<16x1xf32>
    %c0_73 = arith.constant 0 : index
    %c10 = arith.constant 10 : index
    %100 = vector.load %arg17[%c0_73, %c10] : memref<16x110xf32, #tpu.memory_space<vmem>>, vector<16x40xf32>
    %101 = vector.broadcast %99 : vector<16x1xf32> to vector<16x40xf32>
    %102 = arith.mulf %101, %100 : vector<16x40xf32>
    %103 = arith.addf %83, %102 : vector<16x40xf32>
    %104 = vector.extract_strided_slice %59 {offsets = [0, 8], sizes = [16, 1], strides = [1, 1]} : vector<16x49xf32> to vector<16x1xf32>
    %c0_74 = arith.constant 0 : index
    %c11 = arith.constant 11 : index
    %105 = vector.load %arg17[%c0_74, %c11] : memref<16x110xf32, #tpu.memory_space<vmem>>, vector<16x40xf32>
    %106 = vector.broadcast %104 : vector<16x1xf32> to vector<16x40xf32>
    %107 = arith.mulf %106, %105 : vector<16x40xf32>
    %108 = arith.addf %88, %107 : vector<16x40xf32>
    %109 = vector.extract_strided_slice %59 {offsets = [0, 9], sizes = [16, 1], strides = [1, 1]} : vector<16x49xf32> to vector<16x1xf32>
    %c0_75 = arith.constant 0 : index
    %c12 = arith.constant 12 : index
    %110 = vector.load %arg17[%c0_75, %c12] : memref<16x110xf32, #tpu.memory_space<vmem>>, vector<16x40xf32>
    %111 = vector.broadcast %109 : vector<16x1xf32> to vector<16x40xf32>
    %112 = arith.mulf %111, %110 : vector<16x40xf32>
    %113 = arith.addf %93, %112 : vector<16x40xf32>
    %114 = vector.extract_strided_slice %59 {offsets = [0, 10], sizes = [16, 1], strides = [1, 1]} : vector<16x49xf32> to vector<16x1xf32>
    %c0_76 = arith.constant 0 : index
    %c13 = arith.constant 13 : index
    %115 = vector.load %arg17[%c0_76, %c13] : memref<16x110xf32, #tpu.memory_space<vmem>>, vector<16x40xf32>
    %116 = vector.broadcast %114 : vector<16x1xf32> to vector<16x40xf32>
    %117 = arith.mulf %116, %115 : vector<16x40xf32>
    %118 = arith.addf %98, %117 : vector<16x40xf32>
    %119 = vector.extract_strided_slice %59 {offsets = [0, 11], sizes = [16, 1], strides = [1, 1]} : vector<16x49xf32> to vector<16x1xf32>
    %c0_77 = arith.constant 0 : index
    %c14 = arith.constant 14 : index
    %120 = vector.load %arg17[%c0_77, %c14] : memref<16x110xf32, #tpu.memory_space<vmem>>, vector<16x40xf32>
    %121 = vector.broadcast %119 : vector<16x1xf32> to vector<16x40xf32>
    %122 = arith.mulf %121, %120 : vector<16x40xf32>
    %123 = arith.addf %103, %122 : vector<16x40xf32>
    %124 = vector.extract_strided_slice %59 {offsets = [0, 12], sizes = [16, 1], strides = [1, 1]} : vector<16x49xf32> to vector<16x1xf32>
    %c0_78 = arith.constant 0 : index
    %c15 = arith.constant 15 : index
    %125 = vector.load %arg17[%c0_78, %c15] : memref<16x110xf32, #tpu.memory_space<vmem>>, vector<16x40xf32>
    %126 = vector.broadcast %124 : vector<16x1xf32> to vector<16x40xf32>
    %127 = arith.mulf %126, %125 : vector<16x40xf32>
    %128 = arith.addf %108, %127 : vector<16x40xf32>
    %129 = vector.extract_strided_slice %59 {offsets = [0, 13], sizes = [16, 1], strides = [1, 1]} : vector<16x49xf32> to vector<16x1xf32>
    %c0_79 = arith.constant 0 : index
    %c16 = arith.constant 16 : index
    %130 = vector.load %arg17[%c0_79, %c16] : memref<16x110xf32, #tpu.memory_space<vmem>>, vector<16x40xf32>
    %131 = vector.broadcast %129 : vector<16x1xf32> to vector<16x40xf32>
    %132 = arith.mulf %131, %130 : vector<16x40xf32>
    %133 = arith.addf %113, %132 : vector<16x40xf32>
    %134 = vector.extract_strided_slice %59 {offsets = [0, 14], sizes = [16, 1], strides = [1, 1]} : vector<16x49xf32> to vector<16x1xf32>
    %c0_80 = arith.constant 0 : index
    %c20 = arith.constant 20 : index
    %135 = vector.load %arg17[%c0_80, %c20] : memref<16x110xf32, #tpu.memory_space<vmem>>, vector<16x40xf32>
    %136 = vector.broadcast %134 : vector<16x1xf32> to vector<16x40xf32>
    %137 = arith.mulf %136, %135 : vector<16x40xf32>
    %138 = arith.addf %118, %137 : vector<16x40xf32>
    %139 = vector.extract_strided_slice %59 {offsets = [0, 15], sizes = [16, 1], strides = [1, 1]} : vector<16x49xf32> to vector<16x1xf32>
    %c0_81 = arith.constant 0 : index
    %c21 = arith.constant 21 : index
    %140 = vector.load %arg17[%c0_81, %c21] : memref<16x110xf32, #tpu.memory_space<vmem>>, vector<16x40xf32>
    %141 = vector.broadcast %139 : vector<16x1xf32> to vector<16x40xf32>
    %142 = arith.mulf %141, %140 : vector<16x40xf32>
    %143 = arith.addf %123, %142 : vector<16x40xf32>
    %144 = vector.extract_strided_slice %59 {offsets = [0, 16], sizes = [16, 1], strides = [1, 1]} : vector<16x49xf32> to vector<16x1xf32>
    %c0_82 = arith.constant 0 : index
    %c22_83 = arith.constant 22 : index
    %145 = vector.load %arg17[%c0_82, %c22_83] : memref<16x110xf32, #tpu.memory_space<vmem>>, vector<16x40xf32>
    %146 = vector.broadcast %144 : vector<16x1xf32> to vector<16x40xf32>
    %147 = arith.mulf %146, %145 : vector<16x40xf32>
    %148 = arith.addf %128, %147 : vector<16x40xf32>
    %149 = vector.extract_strided_slice %59 {offsets = [0, 17], sizes = [16, 1], strides = [1, 1]} : vector<16x49xf32> to vector<16x1xf32>
    %c0_84 = arith.constant 0 : index
    %c23_85 = arith.constant 23 : index
    %150 = vector.load %arg17[%c0_84, %c23_85] : memref<16x110xf32, #tpu.memory_space<vmem>>, vector<16x40xf32>
    %151 = vector.broadcast %149 : vector<16x1xf32> to vector<16x40xf32>
    %152 = arith.mulf %151, %150 : vector<16x40xf32>
    %153 = arith.addf %133, %152 : vector<16x40xf32>
    %154 = vector.extract_strided_slice %59 {offsets = [0, 18], sizes = [16, 1], strides = [1, 1]} : vector<16x49xf32> to vector<16x1xf32>
    %c0_86 = arith.constant 0 : index
    %c24_87 = arith.constant 24 : index
    %155 = vector.load %arg17[%c0_86, %c24_87] : memref<16x110xf32, #tpu.memory_space<vmem>>, vector<16x40xf32>
    %156 = vector.broadcast %154 : vector<16x1xf32> to vector<16x40xf32>
    %157 = arith.mulf %156, %155 : vector<16x40xf32>
    %158 = arith.addf %138, %157 : vector<16x40xf32>
    %159 = vector.extract_strided_slice %59 {offsets = [0, 19], sizes = [16, 1], strides = [1, 1]} : vector<16x49xf32> to vector<16x1xf32>
    %c0_88 = arith.constant 0 : index
    %c25 = arith.constant 25 : index
    %160 = vector.load %arg17[%c0_88, %c25] : memref<16x110xf32, #tpu.memory_space<vmem>>, vector<16x40xf32>
    %161 = vector.broadcast %159 : vector<16x1xf32> to vector<16x40xf32>
    %162 = arith.mulf %161, %160 : vector<16x40xf32>
    %163 = arith.addf %143, %162 : vector<16x40xf32>
    %164 = vector.extract_strided_slice %59 {offsets = [0, 20], sizes = [16, 1], strides = [1, 1]} : vector<16x49xf32> to vector<16x1xf32>
    %c0_89 = arith.constant 0 : index
    %c26 = arith.constant 26 : index
    %165 = vector.load %arg17[%c0_89, %c26] : memref<16x110xf32, #tpu.memory_space<vmem>>, vector<16x40xf32>
    %166 = vector.broadcast %164 : vector<16x1xf32> to vector<16x40xf32>
    %167 = arith.mulf %166, %165 : vector<16x40xf32>
    %168 = arith.addf %148, %167 : vector<16x40xf32>
    %169 = vector.extract_strided_slice %59 {offsets = [0, 21], sizes = [16, 1], strides = [1, 1]} : vector<16x49xf32> to vector<16x1xf32>
    %c0_90 = arith.constant 0 : index
    %c30 = arith.constant 30 : index
    %170 = vector.load %arg17[%c0_90, %c30] : memref<16x110xf32, #tpu.memory_space<vmem>>, vector<16x40xf32>
    %171 = vector.broadcast %169 : vector<16x1xf32> to vector<16x40xf32>
    %172 = arith.mulf %171, %170 : vector<16x40xf32>
    %173 = arith.addf %153, %172 : vector<16x40xf32>
    %174 = vector.extract_strided_slice %59 {offsets = [0, 22], sizes = [16, 1], strides = [1, 1]} : vector<16x49xf32> to vector<16x1xf32>
    %c0_91 = arith.constant 0 : index
    %c31 = arith.constant 31 : index
    %175 = vector.load %arg17[%c0_91, %c31] : memref<16x110xf32, #tpu.memory_space<vmem>>, vector<16x40xf32>
    %176 = vector.broadcast %174 : vector<16x1xf32> to vector<16x40xf32>
    %177 = arith.mulf %176, %175 : vector<16x40xf32>
    %178 = arith.addf %158, %177 : vector<16x40xf32>
    %179 = vector.extract_strided_slice %59 {offsets = [0, 23], sizes = [16, 1], strides = [1, 1]} : vector<16x49xf32> to vector<16x1xf32>
    %c0_92 = arith.constant 0 : index
    %c32_93 = arith.constant 32 : index
    %180 = vector.load %arg17[%c0_92, %c32_93] : memref<16x110xf32, #tpu.memory_space<vmem>>, vector<16x40xf32>
    %181 = vector.broadcast %179 : vector<16x1xf32> to vector<16x40xf32>
    %182 = arith.mulf %181, %180 : vector<16x40xf32>
    %183 = arith.addf %163, %182 : vector<16x40xf32>
    %184 = vector.extract_strided_slice %59 {offsets = [0, 24], sizes = [16, 1], strides = [1, 1]} : vector<16x49xf32> to vector<16x1xf32>
    %c0_94 = arith.constant 0 : index
    %c33_95 = arith.constant 33 : index
    %185 = vector.load %arg17[%c0_94, %c33_95] : memref<16x110xf32, #tpu.memory_space<vmem>>, vector<16x40xf32>
    %186 = vector.broadcast %184 : vector<16x1xf32> to vector<16x40xf32>
    %187 = arith.mulf %186, %185 : vector<16x40xf32>
    %188 = arith.addf %168, %187 : vector<16x40xf32>
    %189 = vector.extract_strided_slice %59 {offsets = [0, 25], sizes = [16, 1], strides = [1, 1]} : vector<16x49xf32> to vector<16x1xf32>
    %c0_96 = arith.constant 0 : index
    %c34_97 = arith.constant 34 : index
    %190 = vector.load %arg17[%c0_96, %c34_97] : memref<16x110xf32, #tpu.memory_space<vmem>>, vector<16x40xf32>
    %191 = vector.broadcast %189 : vector<16x1xf32> to vector<16x40xf32>
    %192 = arith.mulf %191, %190 : vector<16x40xf32>
    %193 = arith.addf %173, %192 : vector<16x40xf32>
    %194 = vector.extract_strided_slice %59 {offsets = [0, 26], sizes = [16, 1], strides = [1, 1]} : vector<16x49xf32> to vector<16x1xf32>
    %c0_98 = arith.constant 0 : index
    %c35 = arith.constant 35 : index
    %195 = vector.load %arg17[%c0_98, %c35] : memref<16x110xf32, #tpu.memory_space<vmem>>, vector<16x40xf32>
    %196 = vector.broadcast %194 : vector<16x1xf32> to vector<16x40xf32>
    %197 = arith.mulf %196, %195 : vector<16x40xf32>
    %198 = arith.addf %178, %197 : vector<16x40xf32>
    %199 = vector.extract_strided_slice %59 {offsets = [0, 27], sizes = [16, 1], strides = [1, 1]} : vector<16x49xf32> to vector<16x1xf32>
    %c0_99 = arith.constant 0 : index
    %c36 = arith.constant 36 : index
    %200 = vector.load %arg17[%c0_99, %c36] : memref<16x110xf32, #tpu.memory_space<vmem>>, vector<16x40xf32>
    %201 = vector.broadcast %199 : vector<16x1xf32> to vector<16x40xf32>
    %202 = arith.mulf %201, %200 : vector<16x40xf32>
    %203 = arith.addf %183, %202 : vector<16x40xf32>
    %204 = vector.extract_strided_slice %59 {offsets = [0, 28], sizes = [16, 1], strides = [1, 1]} : vector<16x49xf32> to vector<16x1xf32>
    %c0_100 = arith.constant 0 : index
    %c40 = arith.constant 40 : index
    %205 = vector.load %arg17[%c0_100, %c40] : memref<16x110xf32, #tpu.memory_space<vmem>>, vector<16x40xf32>
    %206 = vector.broadcast %204 : vector<16x1xf32> to vector<16x40xf32>
    %207 = arith.mulf %206, %205 : vector<16x40xf32>
    %208 = arith.addf %188, %207 : vector<16x40xf32>
    %209 = vector.extract_strided_slice %59 {offsets = [0, 29], sizes = [16, 1], strides = [1, 1]} : vector<16x49xf32> to vector<16x1xf32>
    %c0_101 = arith.constant 0 : index
    %c41 = arith.constant 41 : index
    %210 = vector.load %arg17[%c0_101, %c41] : memref<16x110xf32, #tpu.memory_space<vmem>>, vector<16x40xf32>
    %211 = vector.broadcast %209 : vector<16x1xf32> to vector<16x40xf32>
    %212 = arith.mulf %211, %210 : vector<16x40xf32>
    %213 = arith.addf %193, %212 : vector<16x40xf32>
    %214 = vector.extract_strided_slice %59 {offsets = [0, 30], sizes = [16, 1], strides = [1, 1]} : vector<16x49xf32> to vector<16x1xf32>
    %c0_102 = arith.constant 0 : index
    %c42_103 = arith.constant 42 : index
    %215 = vector.load %arg17[%c0_102, %c42_103] : memref<16x110xf32, #tpu.memory_space<vmem>>, vector<16x40xf32>
    %216 = vector.broadcast %214 : vector<16x1xf32> to vector<16x40xf32>
    %217 = arith.mulf %216, %215 : vector<16x40xf32>
    %218 = arith.addf %198, %217 : vector<16x40xf32>
    %219 = vector.extract_strided_slice %59 {offsets = [0, 31], sizes = [16, 1], strides = [1, 1]} : vector<16x49xf32> to vector<16x1xf32>
    %c0_104 = arith.constant 0 : index
    %c43_105 = arith.constant 43 : index
    %220 = vector.load %arg17[%c0_104, %c43_105] : memref<16x110xf32, #tpu.memory_space<vmem>>, vector<16x40xf32>
    %221 = vector.broadcast %219 : vector<16x1xf32> to vector<16x40xf32>
    %222 = arith.mulf %221, %220 : vector<16x40xf32>
    %223 = arith.addf %203, %222 : vector<16x40xf32>
    %224 = vector.extract_strided_slice %59 {offsets = [0, 32], sizes = [16, 1], strides = [1, 1]} : vector<16x49xf32> to vector<16x1xf32>
    %c0_106 = arith.constant 0 : index
    %c44_107 = arith.constant 44 : index
    %225 = vector.load %arg17[%c0_106, %c44_107] : memref<16x110xf32, #tpu.memory_space<vmem>>, vector<16x40xf32>
    %226 = vector.broadcast %224 : vector<16x1xf32> to vector<16x40xf32>
    %227 = arith.mulf %226, %225 : vector<16x40xf32>
    %228 = arith.addf %208, %227 : vector<16x40xf32>
    %229 = vector.extract_strided_slice %59 {offsets = [0, 33], sizes = [16, 1], strides = [1, 1]} : vector<16x49xf32> to vector<16x1xf32>
    %c0_108 = arith.constant 0 : index
    %c45 = arith.constant 45 : index
    %230 = vector.load %arg17[%c0_108, %c45] : memref<16x110xf32, #tpu.memory_space<vmem>>, vector<16x40xf32>
    %231 = vector.broadcast %229 : vector<16x1xf32> to vector<16x40xf32>
    %232 = arith.mulf %231, %230 : vector<16x40xf32>
    %233 = arith.addf %213, %232 : vector<16x40xf32>
    %234 = vector.extract_strided_slice %59 {offsets = [0, 34], sizes = [16, 1], strides = [1, 1]} : vector<16x49xf32> to vector<16x1xf32>
    %c0_109 = arith.constant 0 : index
    %c46 = arith.constant 46 : index
    %235 = vector.load %arg17[%c0_109, %c46] : memref<16x110xf32, #tpu.memory_space<vmem>>, vector<16x40xf32>
    %236 = vector.broadcast %234 : vector<16x1xf32> to vector<16x40xf32>
    %237 = arith.mulf %236, %235 : vector<16x40xf32>
    %238 = arith.addf %218, %237 : vector<16x40xf32>
    %239 = vector.extract_strided_slice %59 {offsets = [0, 35], sizes = [16, 1], strides = [1, 1]} : vector<16x49xf32> to vector<16x1xf32>
    %c0_110 = arith.constant 0 : index
    %c50 = arith.constant 50 : index
    %240 = vector.load %arg17[%c0_110, %c50] : memref<16x110xf32, #tpu.memory_space<vmem>>, vector<16x40xf32>
    %241 = vector.broadcast %239 : vector<16x1xf32> to vector<16x40xf32>
    %242 = arith.mulf %241, %240 : vector<16x40xf32>
    %243 = arith.addf %223, %242 : vector<16x40xf32>
    %244 = vector.extract_strided_slice %59 {offsets = [0, 36], sizes = [16, 1], strides = [1, 1]} : vector<16x49xf32> to vector<16x1xf32>
    %c0_111 = arith.constant 0 : index
    %c51 = arith.constant 51 : index
    %245 = vector.load %arg17[%c0_111, %c51] : memref<16x110xf32, #tpu.memory_space<vmem>>, vector<16x40xf32>
    %246 = vector.broadcast %244 : vector<16x1xf32> to vector<16x40xf32>
    %247 = arith.mulf %246, %245 : vector<16x40xf32>
    %248 = arith.addf %228, %247 : vector<16x40xf32>
    %249 = vector.extract_strided_slice %59 {offsets = [0, 37], sizes = [16, 1], strides = [1, 1]} : vector<16x49xf32> to vector<16x1xf32>
    %c0_112 = arith.constant 0 : index
    %c52 = arith.constant 52 : index
    %250 = vector.load %arg17[%c0_112, %c52] : memref<16x110xf32, #tpu.memory_space<vmem>>, vector<16x40xf32>
    %251 = vector.broadcast %249 : vector<16x1xf32> to vector<16x40xf32>
    %252 = arith.mulf %251, %250 : vector<16x40xf32>
    %253 = arith.addf %233, %252 : vector<16x40xf32>
    %254 = vector.extract_strided_slice %59 {offsets = [0, 38], sizes = [16, 1], strides = [1, 1]} : vector<16x49xf32> to vector<16x1xf32>
    %c0_113 = arith.constant 0 : index
    %c53_114 = arith.constant 53 : index
    %255 = vector.load %arg17[%c0_113, %c53_114] : memref<16x110xf32, #tpu.memory_space<vmem>>, vector<16x40xf32>
    %256 = vector.broadcast %254 : vector<16x1xf32> to vector<16x40xf32>
    %257 = arith.mulf %256, %255 : vector<16x40xf32>
    %258 = arith.addf %238, %257 : vector<16x40xf32>
    %259 = vector.extract_strided_slice %59 {offsets = [0, 39], sizes = [16, 1], strides = [1, 1]} : vector<16x49xf32> to vector<16x1xf32>
    %c0_115 = arith.constant 0 : index
    %c54 = arith.constant 54 : index
    %260 = vector.load %arg17[%c0_115, %c54] : memref<16x110xf32, #tpu.memory_space<vmem>>, vector<16x40xf32>
    %261 = vector.broadcast %259 : vector<16x1xf32> to vector<16x40xf32>
    %262 = arith.mulf %261, %260 : vector<16x40xf32>
    %263 = arith.addf %243, %262 : vector<16x40xf32>
    %264 = vector.extract_strided_slice %59 {offsets = [0, 40], sizes = [16, 1], strides = [1, 1]} : vector<16x49xf32> to vector<16x1xf32>
    %c0_116 = arith.constant 0 : index
    %c55 = arith.constant 55 : index
    %265 = vector.load %arg17[%c0_116, %c55] : memref<16x110xf32, #tpu.memory_space<vmem>>, vector<16x40xf32>
    %266 = vector.broadcast %264 : vector<16x1xf32> to vector<16x40xf32>
    %267 = arith.mulf %266, %265 : vector<16x40xf32>
    %268 = arith.addf %248, %267 : vector<16x40xf32>
    %269 = vector.extract_strided_slice %59 {offsets = [0, 41], sizes = [16, 1], strides = [1, 1]} : vector<16x49xf32> to vector<16x1xf32>
    %c0_117 = arith.constant 0 : index
    %c56 = arith.constant 56 : index
    %270 = vector.load %arg17[%c0_117, %c56] : memref<16x110xf32, #tpu.memory_space<vmem>>, vector<16x40xf32>
    %271 = vector.broadcast %269 : vector<16x1xf32> to vector<16x40xf32>
    %272 = arith.mulf %271, %270 : vector<16x40xf32>
    %273 = arith.addf %253, %272 : vector<16x40xf32>
    %274 = vector.extract_strided_slice %59 {offsets = [0, 42], sizes = [16, 1], strides = [1, 1]} : vector<16x49xf32> to vector<16x1xf32>
    %c0_118 = arith.constant 0 : index
    %c60 = arith.constant 60 : index
    %275 = vector.load %arg17[%c0_118, %c60] : memref<16x110xf32, #tpu.memory_space<vmem>>, vector<16x40xf32>
    %276 = vector.broadcast %274 : vector<16x1xf32> to vector<16x40xf32>
    %277 = arith.mulf %276, %275 : vector<16x40xf32>
    %278 = arith.addf %258, %277 : vector<16x40xf32>
    %279 = vector.extract_strided_slice %59 {offsets = [0, 43], sizes = [16, 1], strides = [1, 1]} : vector<16x49xf32> to vector<16x1xf32>
    %c0_119 = arith.constant 0 : index
    %c61 = arith.constant 61 : index
    %280 = vector.load %arg17[%c0_119, %c61] : memref<16x110xf32, #tpu.memory_space<vmem>>, vector<16x40xf32>
    %281 = vector.broadcast %279 : vector<16x1xf32> to vector<16x40xf32>
    %282 = arith.mulf %281, %280 : vector<16x40xf32>
    %283 = arith.addf %263, %282 : vector<16x40xf32>
    %284 = vector.extract_strided_slice %59 {offsets = [0, 44], sizes = [16, 1], strides = [1, 1]} : vector<16x49xf32> to vector<16x1xf32>
    %c0_120 = arith.constant 0 : index
    %c62 = arith.constant 62 : index
    %285 = vector.load %arg17[%c0_120, %c62] : memref<16x110xf32, #tpu.memory_space<vmem>>, vector<16x40xf32>
    %286 = vector.broadcast %284 : vector<16x1xf32> to vector<16x40xf32>
    %287 = arith.mulf %286, %285 : vector<16x40xf32>
    %288 = arith.addf %268, %287 : vector<16x40xf32>
    %289 = vector.extract_strided_slice %59 {offsets = [0, 45], sizes = [16, 1], strides = [1, 1]} : vector<16x49xf32> to vector<16x1xf32>
    %c0_121 = arith.constant 0 : index
    %c63_122 = arith.constant 63 : index
    %290 = vector.load %arg17[%c0_121, %c63_122] : memref<16x110xf32, #tpu.memory_space<vmem>>, vector<16x40xf32>
    %291 = vector.broadcast %289 : vector<16x1xf32> to vector<16x40xf32>
    %292 = arith.mulf %291, %290 : vector<16x40xf32>
    %293 = arith.addf %273, %292 : vector<16x40xf32>
    %294 = vector.extract_strided_slice %59 {offsets = [0, 46], sizes = [16, 1], strides = [1, 1]} : vector<16x49xf32> to vector<16x1xf32>
    %c0_123 = arith.constant 0 : index
    %c64 = arith.constant 64 : index
    %295 = vector.load %arg17[%c0_123, %c64] : memref<16x110xf32, #tpu.memory_space<vmem>>, vector<16x40xf32>
    %296 = vector.broadcast %294 : vector<16x1xf32> to vector<16x40xf32>
    %297 = arith.mulf %296, %295 : vector<16x40xf32>
    %298 = arith.addf %278, %297 : vector<16x40xf32>
    %299 = vector.extract_strided_slice %59 {offsets = [0, 47], sizes = [16, 1], strides = [1, 1]} : vector<16x49xf32> to vector<16x1xf32>
    %c0_124 = arith.constant 0 : index
    %c65 = arith.constant 65 : index
    %300 = vector.load %arg17[%c0_124, %c65] : memref<16x110xf32, #tpu.memory_space<vmem>>, vector<16x40xf32>
    %301 = vector.broadcast %299 : vector<16x1xf32> to vector<16x40xf32>
    %302 = arith.mulf %301, %300 : vector<16x40xf32>
    %303 = arith.addf %283, %302 : vector<16x40xf32>
    %304 = vector.extract_strided_slice %59 {offsets = [0, 48], sizes = [16, 1], strides = [1, 1]} : vector<16x49xf32> to vector<16x1xf32>
    %c0_125 = arith.constant 0 : index
    %c66 = arith.constant 66 : index
    %305 = vector.load %arg17[%c0_125, %c66] : memref<16x110xf32, #tpu.memory_space<vmem>>, vector<16x40xf32>
    %306 = vector.broadcast %304 : vector<16x1xf32> to vector<16x40xf32>
    %307 = arith.mulf %306, %305 : vector<16x40xf32>
    %308 = arith.addf %288, %307 : vector<16x40xf32>
    %309 = arith.addf %308, %293 : vector<16x40xf32>
    %310 = arith.addf %298, %303 : vector<16x40xf32>
    %311 = arith.addf %309, %310 : vector<16x40xf32>
    %c0_126 = arith.constant 0 : index
    %c0_127 = arith.constant 0 : index
    %312 = vector.load %arg7[%c0_126, %c0_127] : memref<16x1xf32, #tpu.memory_space<vmem>>, vector<16x1xf32>
    %313 = vector.broadcast %312 : vector<16x1xf32> to vector<16x40xf32>
    %314 = arith.addf %311, %313 : vector<16x40xf32>
    %cst_128 = arith.constant 0.000000e+00 : f32
    %315 = vector.broadcast %cst_128 : f32 to vector<16x40xf32>
    %316 = arith.cmpf ogt, %314, %315 : vector<16x40xf32>
    %c0_129 = arith.constant 0 : index
    %c0_130 = arith.constant 0 : index
    %317 = vector.load %arg8[%c0_129, %c0_130] : memref<16x1xf32, #tpu.memory_space<vmem>>, vector<16x1xf32>
    %318 = vector.broadcast %317 : vector<16x1xf32> to vector<16x40xf32>
    %319 = arith.mulf %314, %318 : vector<16x40xf32>
    %320 = arith.select %316, %314, %319 : vector<16x40xi1>, vector<16x40xf32>
    %321 = vector.broadcast %4 : vector<1x40xf32> to vector<16x40xf32>
    %322 = arith.mulf %320, %321 : vector<16x40xf32>
    %c0_131 = arith.constant 0 : index
    %c33_132 = arith.constant 33 : index
    %323 = vector.load %arg16[%c0_131, %c33_132] : memref<48x110xf32, #tpu.memory_space<vmem>>, vector<16x40xf32>
    tpu.vector_store %arg16[%c0_131, %c33_132], %322 {strides = array<i32>} : memref<48x110xf32, #tpu.memory_space<vmem>>, vector<16x40xf32>,
    %c0_133 = arith.constant 0 : index
    %c0_134 = arith.constant 0 : index
    %324 = vector.load %arg9[%c0_133, %c0_134] : memref<16x49xf32, #tpu.memory_space<vmem>>, vector<16x49xf32>
    %cst_135 = arith.constant 0.000000e+00 : f32
    %325 = vector.broadcast %cst_135 : f32 to vector<16x40xf32>
    %cst_136 = arith.constant 0.000000e+00 : f32
    %326 = vector.broadcast %cst_136 : f32 to vector<16x40xf32>
    %cst_137 = arith.constant 0.000000e+00 : f32
    %327 = vector.broadcast %cst_137 : f32 to vector<16x40xf32>
    %cst_138 = arith.constant 0.000000e+00 : f32
    %328 = vector.broadcast %cst_138 : f32 to vector<16x40xf32>
    %329 = vector.extract_strided_slice %324 {offsets = [0, 0], sizes = [16, 1], strides = [1, 1]} : vector<16x49xf32> to vector<16x1xf32>
    %c0_139 = arith.constant 0 : index
    %c0_140 = arith.constant 0 : index
    %330 = vector.load %arg16[%c0_139, %c0_140] : memref<48x110xf32, #tpu.memory_space<vmem>>, vector<16x40xf32>
    %331 = vector.broadcast %329 : vector<16x1xf32> to vector<16x40xf32>
    %332 = arith.mulf %331, %330 : vector<16x40xf32>
    %333 = arith.addf %325, %332 : vector<16x40xf32>
    %334 = vector.extract_strided_slice %324 {offsets = [0, 1], sizes = [16, 1], strides = [1, 1]} : vector<16x49xf32> to vector<16x1xf32>
    %c0_141 = arith.constant 0 : index
    %c1_142 = arith.constant 1 : index
    %335 = vector.load %arg16[%c0_141, %c1_142] : memref<48x110xf32, #tpu.memory_space<vmem>>, vector<16x40xf32>
    %336 = vector.broadcast %334 : vector<16x1xf32> to vector<16x40xf32>
    %337 = arith.mulf %336, %335 : vector<16x40xf32>
    %338 = arith.addf %326, %337 : vector<16x40xf32>
    %339 = vector.extract_strided_slice %324 {offsets = [0, 2], sizes = [16, 1], strides = [1, 1]} : vector<16x49xf32> to vector<16x1xf32>
    %c0_143 = arith.constant 0 : index
    %c2_144 = arith.constant 2 : index
    %340 = vector.load %arg16[%c0_143, %c2_144] : memref<48x110xf32, #tpu.memory_space<vmem>>, vector<16x40xf32>
    %341 = vector.broadcast %339 : vector<16x1xf32> to vector<16x40xf32>
    %342 = arith.mulf %341, %340 : vector<16x40xf32>
    %343 = arith.addf %327, %342 : vector<16x40xf32>
    %344 = vector.extract_strided_slice %324 {offsets = [0, 3], sizes = [16, 1], strides = [1, 1]} : vector<16x49xf32> to vector<16x1xf32>
    %c0_145 = arith.constant 0 : index
    %c3_146 = arith.constant 3 : index
    %345 = vector.load %arg16[%c0_145, %c3_146] : memref<48x110xf32, #tpu.memory_space<vmem>>, vector<16x40xf32>
    %346 = vector.broadcast %344 : vector<16x1xf32> to vector<16x40xf32>
    %347 = arith.mulf %346, %345 : vector<16x40xf32>
    %348 = arith.addf %328, %347 : vector<16x40xf32>
    %349 = vector.extract_strided_slice %324 {offsets = [0, 4], sizes = [16, 1], strides = [1, 1]} : vector<16x49xf32> to vector<16x1xf32>
    %c0_147 = arith.constant 0 : index
    %c4_148 = arith.constant 4 : index
    %350 = vector.load %arg16[%c0_147, %c4_148] : memref<48x110xf32, #tpu.memory_space<vmem>>, vector<16x40xf32>
    %351 = vector.broadcast %349 : vector<16x1xf32> to vector<16x40xf32>
    %352 = arith.mulf %351, %350 : vector<16x40xf32>
    %353 = arith.addf %333, %352 : vector<16x40xf32>
    %354 = vector.extract_strided_slice %324 {offsets = [0, 5], sizes = [16, 1], strides = [1, 1]} : vector<16x49xf32> to vector<16x1xf32>
    %c0_149 = arith.constant 0 : index
    %c5_150 = arith.constant 5 : index
    %355 = vector.load %arg16[%c0_149, %c5_150] : memref<48x110xf32, #tpu.memory_space<vmem>>, vector<16x40xf32>
    %356 = vector.broadcast %354 : vector<16x1xf32> to vector<16x40xf32>
    %357 = arith.mulf %356, %355 : vector<16x40xf32>
    %358 = arith.addf %338, %357 : vector<16x40xf32>
    %359 = vector.extract_strided_slice %324 {offsets = [0, 6], sizes = [16, 1], strides = [1, 1]} : vector<16x49xf32> to vector<16x1xf32>
    %c0_151 = arith.constant 0 : index
    %c6_152 = arith.constant 6 : index
    %360 = vector.load %arg16[%c0_151, %c6_152] : memref<48x110xf32, #tpu.memory_space<vmem>>, vector<16x40xf32>
    %361 = vector.broadcast %359 : vector<16x1xf32> to vector<16x40xf32>
    %362 = arith.mulf %361, %360 : vector<16x40xf32>
    %363 = arith.addf %343, %362 : vector<16x40xf32>
    %364 = vector.extract_strided_slice %324 {offsets = [0, 7], sizes = [16, 1], strides = [1, 1]} : vector<16x49xf32> to vector<16x1xf32>
    %c0_153 = arith.constant 0 : index
    %c10_154 = arith.constant 10 : index
    %365 = vector.load %arg16[%c0_153, %c10_154] : memref<48x110xf32, #tpu.memory_space<vmem>>, vector<16x40xf32>
    %366 = vector.broadcast %364 : vector<16x1xf32> to vector<16x40xf32>
    %367 = arith.mulf %366, %365 : vector<16x40xf32>
    %368 = arith.addf %348, %367 : vector<16x40xf32>
    %369 = vector.extract_strided_slice %324 {offsets = [0, 8], sizes = [16, 1], strides = [1, 1]} : vector<16x49xf32> to vector<16x1xf32>
    %c0_155 = arith.constant 0 : index
    %c11_156 = arith.constant 11 : index
    %370 = vector.load %arg16[%c0_155, %c11_156] : memref<48x110xf32, #tpu.memory_space<vmem>>, vector<16x40xf32>
    %371 = vector.broadcast %369 : vector<16x1xf32> to vector<16x40xf32>
    %372 = arith.mulf %371, %370 : vector<16x40xf32>
    %373 = arith.addf %353, %372 : vector<16x40xf32>
    %374 = vector.extract_strided_slice %324 {offsets = [0, 9], sizes = [16, 1], strides = [1, 1]} : vector<16x49xf32> to vector<16x1xf32>
    %c0_157 = arith.constant 0 : index
    %c12_158 = arith.constant 12 : index
    %375 = vector.load %arg16[%c0_157, %c12_158] : memref<48x110xf32, #tpu.memory_space<vmem>>, vector<16x40xf32>
    %376 = vector.broadcast %374 : vector<16x1xf32> to vector<16x40xf32>
    %377 = arith.mulf %376, %375 : vector<16x40xf32>
    %378 = arith.addf %358, %377 : vector<16x40xf32>
    %379 = vector.extract_strided_slice %324 {offsets = [0, 10], sizes = [16, 1], strides = [1, 1]} : vector<16x49xf32> to vector<16x1xf32>
    %c0_159 = arith.constant 0 : index
    %c13_160 = arith.constant 13 : index
    %380 = vector.load %arg16[%c0_159, %c13_160] : memref<48x110xf32, #tpu.memory_space<vmem>>, vector<16x40xf32>
    %381 = vector.broadcast %379 : vector<16x1xf32> to vector<16x40xf32>
    %382 = arith.mulf %381, %380 : vector<16x40xf32>
    %383 = arith.addf %363, %382 : vector<16x40xf32>
    %384 = vector.extract_strided_slice %324 {offsets = [0, 11], sizes = [16, 1], strides = [1, 1]} : vector<16x49xf32> to vector<16x1xf32>
    %c0_161 = arith.constant 0 : index
    %c14_162 = arith.constant 14 : index
    %385 = vector.load %arg16[%c0_161, %c14_162] : memref<48x110xf32, #tpu.memory_space<vmem>>, vector<16x40xf32>
    %386 = vector.broadcast %384 : vector<16x1xf32> to vector<16x40xf32>
    %387 = arith.mulf %386, %385 : vector<16x40xf32>
    %388 = arith.addf %368, %387 : vector<16x40xf32>
    %389 = vector.extract_strided_slice %324 {offsets = [0, 12], sizes = [16, 1], strides = [1, 1]} : vector<16x49xf32> to vector<16x1xf32>
    %c0_163 = arith.constant 0 : index
    %c15_164 = arith.constant 15 : index
    %390 = vector.load %arg16[%c0_163, %c15_164] : memref<48x110xf32, #tpu.memory_space<vmem>>, vector<16x40xf32>
    %391 = vector.broadcast %389 : vector<16x1xf32> to vector<16x40xf32>
    %392 = arith.mulf %391, %390 : vector<16x40xf32>
    %393 = arith.addf %373, %392 : vector<16x40xf32>
    %394 = vector.extract_strided_slice %324 {offsets = [0, 13], sizes = [16, 1], strides = [1, 1]} : vector<16x49xf32> to vector<16x1xf32>
    %c0_165 = arith.constant 0 : index
    %c16_166 = arith.constant 16 : index
    %395 = vector.load %arg16[%c0_165, %c16_166] : memref<48x110xf32, #tpu.memory_space<vmem>>, vector<16x40xf32>
    %396 = vector.broadcast %394 : vector<16x1xf32> to vector<16x40xf32>
    %397 = arith.mulf %396, %395 : vector<16x40xf32>
    %398 = arith.addf %378, %397 : vector<16x40xf32>
    %399 = vector.extract_strided_slice %324 {offsets = [0, 14], sizes = [16, 1], strides = [1, 1]} : vector<16x49xf32> to vector<16x1xf32>
    %c0_167 = arith.constant 0 : index
    %c20_168 = arith.constant 20 : index
    %400 = vector.load %arg16[%c0_167, %c20_168] : memref<48x110xf32, #tpu.memory_space<vmem>>, vector<16x40xf32>
    %401 = vector.broadcast %399 : vector<16x1xf32> to vector<16x40xf32>
    %402 = arith.mulf %401, %400 : vector<16x40xf32>
    %403 = arith.addf %383, %402 : vector<16x40xf32>
    %404 = vector.extract_strided_slice %324 {offsets = [0, 15], sizes = [16, 1], strides = [1, 1]} : vector<16x49xf32> to vector<16x1xf32>
    %c0_169 = arith.constant 0 : index
    %c21_170 = arith.constant 21 : index
    %405 = vector.load %arg16[%c0_169, %c21_170] : memref<48x110xf32, #tpu.memory_space<vmem>>, vector<16x40xf32>
    %406 = vector.broadcast %404 : vector<16x1xf32> to vector<16x40xf32>
    %407 = arith.mulf %406, %405 : vector<16x40xf32>
    %408 = arith.addf %388, %407 : vector<16x40xf32>
    %409 = vector.extract_strided_slice %324 {offsets = [0, 16], sizes = [16, 1], strides = [1, 1]} : vector<16x49xf32> to vector<16x1xf32>
    %c0_171 = arith.constant 0 : index
    %c22_172 = arith.constant 22 : index
    %410 = vector.load %arg16[%c0_171, %c22_172] : memref<48x110xf32, #tpu.memory_space<vmem>>, vector<16x40xf32>
    %411 = vector.broadcast %409 : vector<16x1xf32> to vector<16x40xf32>
    %412 = arith.mulf %411, %410 : vector<16x40xf32>
    %413 = arith.addf %393, %412 : vector<16x40xf32>
    %414 = vector.extract_strided_slice %324 {offsets = [0, 17], sizes = [16, 1], strides = [1, 1]} : vector<16x49xf32> to vector<16x1xf32>
    %c0_173 = arith.constant 0 : index
    %c23_174 = arith.constant 23 : index
    %415 = vector.load %arg16[%c0_173, %c23_174] : memref<48x110xf32, #tpu.memory_space<vmem>>, vector<16x40xf32>
    %416 = vector.broadcast %414 : vector<16x1xf32> to vector<16x40xf32>
    %417 = arith.mulf %416, %415 : vector<16x40xf32>
    %418 = arith.addf %398, %417 : vector<16x40xf32>
    %419 = vector.extract_strided_slice %324 {offsets = [0, 18], sizes = [16, 1], strides = [1, 1]} : vector<16x49xf32> to vector<16x1xf32>
    %c0_175 = arith.constant 0 : index
    %c24_176 = arith.constant 24 : index
    %420 = vector.load %arg16[%c0_175, %c24_176] : memref<48x110xf32, #tpu.memory_space<vmem>>, vector<16x40xf32>
    %421 = vector.broadcast %419 : vector<16x1xf32> to vector<16x40xf32>
    %422 = arith.mulf %421, %420 : vector<16x40xf32>
    %423 = arith.addf %403, %422 : vector<16x40xf32>
    %424 = vector.extract_strided_slice %324 {offsets = [0, 19], sizes = [16, 1], strides = [1, 1]} : vector<16x49xf32> to vector<16x1xf32>
    %c0_177 = arith.constant 0 : index
    %c25_178 = arith.constant 25 : index
    %425 = vector.load %arg16[%c0_177, %c25_178] : memref<48x110xf32, #tpu.memory_space<vmem>>, vector<16x40xf32>
    %426 = vector.broadcast %424 : vector<16x1xf32> to vector<16x40xf32>
    %427 = arith.mulf %426, %425 : vector<16x40xf32>
    %428 = arith.addf %408, %427 : vector<16x40xf32>
    %429 = vector.extract_strided_slice %324 {offsets = [0, 20], sizes = [16, 1], strides = [1, 1]} : vector<16x49xf32> to vector<16x1xf32>
    %c0_179 = arith.constant 0 : index
    %c26_180 = arith.constant 26 : index
    %430 = vector.load %arg16[%c0_179, %c26_180] : memref<48x110xf32, #tpu.memory_space<vmem>>, vector<16x40xf32>
    %431 = vector.broadcast %429 : vector<16x1xf32> to vector<16x40xf32>
    %432 = arith.mulf %431, %430 : vector<16x40xf32>
    %433 = arith.addf %413, %432 : vector<16x40xf32>
    %434 = vector.extract_strided_slice %324 {offsets = [0, 21], sizes = [16, 1], strides = [1, 1]} : vector<16x49xf32> to vector<16x1xf32>
    %c0_181 = arith.constant 0 : index
    %c30_182 = arith.constant 30 : index
    %435 = vector.load %arg16[%c0_181, %c30_182] : memref<48x110xf32, #tpu.memory_space<vmem>>, vector<16x40xf32>
    %436 = vector.broadcast %434 : vector<16x1xf32> to vector<16x40xf32>
    %437 = arith.mulf %436, %435 : vector<16x40xf32>
    %438 = arith.addf %418, %437 : vector<16x40xf32>
    %439 = vector.extract_strided_slice %324 {offsets = [0, 22], sizes = [16, 1], strides = [1, 1]} : vector<16x49xf32> to vector<16x1xf32>
    %c0_183 = arith.constant 0 : index
    %c31_184 = arith.constant 31 : index
    %440 = vector.load %arg16[%c0_183, %c31_184] : memref<48x110xf32, #tpu.memory_space<vmem>>, vector<16x40xf32>
    %441 = vector.broadcast %439 : vector<16x1xf32> to vector<16x40xf32>
    %442 = arith.mulf %441, %440 : vector<16x40xf32>
    %443 = arith.addf %423, %442 : vector<16x40xf32>
    %444 = vector.extract_strided_slice %324 {offsets = [0, 23], sizes = [16, 1], strides = [1, 1]} : vector<16x49xf32> to vector<16x1xf32>
    %c0_185 = arith.constant 0 : index
    %c32_186 = arith.constant 32 : index
    %445 = vector.load %arg16[%c0_185, %c32_186] : memref<48x110xf32, #tpu.memory_space<vmem>>, vector<16x40xf32>
    %446 = vector.broadcast %444 : vector<16x1xf32> to vector<16x40xf32>
    %447 = arith.mulf %446, %445 : vector<16x40xf32>
    %448 = arith.addf %428, %447 : vector<16x40xf32>
    %449 = vector.extract_strided_slice %324 {offsets = [0, 24], sizes = [16, 1], strides = [1, 1]} : vector<16x49xf32> to vector<16x1xf32>
    %c0_187 = arith.constant 0 : index
    %c33_188 = arith.constant 33 : index
    %450 = vector.load %arg16[%c0_187, %c33_188] : memref<48x110xf32, #tpu.memory_space<vmem>>, vector<16x40xf32>
    %451 = vector.broadcast %449 : vector<16x1xf32> to vector<16x40xf32>
    %452 = arith.mulf %451, %450 : vector<16x40xf32>
    %453 = arith.addf %433, %452 : vector<16x40xf32>
    %454 = vector.extract_strided_slice %324 {offsets = [0, 25], sizes = [16, 1], strides = [1, 1]} : vector<16x49xf32> to vector<16x1xf32>
    %c0_189 = arith.constant 0 : index
    %c34_190 = arith.constant 34 : index
    %455 = vector.load %arg16[%c0_189, %c34_190] : memref<48x110xf32, #tpu.memory_space<vmem>>, vector<16x40xf32>
    %456 = vector.broadcast %454 : vector<16x1xf32> to vector<16x40xf32>
    %457 = arith.mulf %456, %455 : vector<16x40xf32>
    %458 = arith.addf %438, %457 : vector<16x40xf32>
    %459 = vector.extract_strided_slice %324 {offsets = [0, 26], sizes = [16, 1], strides = [1, 1]} : vector<16x49xf32> to vector<16x1xf32>
    %c0_191 = arith.constant 0 : index
    %c35_192 = arith.constant 35 : index
    %460 = vector.load %arg16[%c0_191, %c35_192] : memref<48x110xf32, #tpu.memory_space<vmem>>, vector<16x40xf32>
    %461 = vector.broadcast %459 : vector<16x1xf32> to vector<16x40xf32>
    %462 = arith.mulf %461, %460 : vector<16x40xf32>
    %463 = arith.addf %443, %462 : vector<16x40xf32>
    %464 = vector.extract_strided_slice %324 {offsets = [0, 27], sizes = [16, 1], strides = [1, 1]} : vector<16x49xf32> to vector<16x1xf32>
    %c0_193 = arith.constant 0 : index
    %c36_194 = arith.constant 36 : index
    %465 = vector.load %arg16[%c0_193, %c36_194] : memref<48x110xf32, #tpu.memory_space<vmem>>, vector<16x40xf32>
    %466 = vector.broadcast %464 : vector<16x1xf32> to vector<16x40xf32>
    %467 = arith.mulf %466, %465 : vector<16x40xf32>
    %468 = arith.addf %448, %467 : vector<16x40xf32>
    %469 = vector.extract_strided_slice %324 {offsets = [0, 28], sizes = [16, 1], strides = [1, 1]} : vector<16x49xf32> to vector<16x1xf32>
    %c0_195 = arith.constant 0 : index
    %c40_196 = arith.constant 40 : index
    %470 = vector.load %arg16[%c0_195, %c40_196] : memref<48x110xf32, #tpu.memory_space<vmem>>, vector<16x40xf32>
    %471 = vector.broadcast %469 : vector<16x1xf32> to vector<16x40xf32>
    %472 = arith.mulf %471, %470 : vector<16x40xf32>
    %473 = arith.addf %453, %472 : vector<16x40xf32>
    %474 = vector.extract_strided_slice %324 {offsets = [0, 29], sizes = [16, 1], strides = [1, 1]} : vector<16x49xf32> to vector<16x1xf32>
    %c0_197 = arith.constant 0 : index
    %c41_198 = arith.constant 41 : index
    %475 = vector.load %arg16[%c0_197, %c41_198] : memref<48x110xf32, #tpu.memory_space<vmem>>, vector<16x40xf32>
    %476 = vector.broadcast %474 : vector<16x1xf32> to vector<16x40xf32>
    %477 = arith.mulf %476, %475 : vector<16x40xf32>
    %478 = arith.addf %458, %477 : vector<16x40xf32>
    %479 = vector.extract_strided_slice %324 {offsets = [0, 30], sizes = [16, 1], strides = [1, 1]} : vector<16x49xf32> to vector<16x1xf32>
    %c0_199 = arith.constant 0 : index
    %c42_200 = arith.constant 42 : index
    %480 = vector.load %arg16[%c0_199, %c42_200] : memref<48x110xf32, #tpu.memory_space<vmem>>, vector<16x40xf32>
    %481 = vector.broadcast %479 : vector<16x1xf32> to vector<16x40xf32>
    %482 = arith.mulf %481, %480 : vector<16x40xf32>
    %483 = arith.addf %463, %482 : vector<16x40xf32>
    %484 = vector.extract_strided_slice %324 {offsets = [0, 31], sizes = [16, 1], strides = [1, 1]} : vector<16x49xf32> to vector<16x1xf32>
    %c0_201 = arith.constant 0 : index
    %c43_202 = arith.constant 43 : index
    %485 = vector.load %arg16[%c0_201, %c43_202] : memref<48x110xf32, #tpu.memory_space<vmem>>, vector<16x40xf32>
    %486 = vector.broadcast %484 : vector<16x1xf32> to vector<16x40xf32>
    %487 = arith.mulf %486, %485 : vector<16x40xf32>
    %488 = arith.addf %468, %487 : vector<16x40xf32>
    %489 = vector.extract_strided_slice %324 {offsets = [0, 32], sizes = [16, 1], strides = [1, 1]} : vector<16x49xf32> to vector<16x1xf32>
    %c0_203 = arith.constant 0 : index
    %c44_204 = arith.constant 44 : index
    %490 = vector.load %arg16[%c0_203, %c44_204] : memref<48x110xf32, #tpu.memory_space<vmem>>, vector<16x40xf32>
    %491 = vector.broadcast %489 : vector<16x1xf32> to vector<16x40xf32>
    %492 = arith.mulf %491, %490 : vector<16x40xf32>
    %493 = arith.addf %473, %492 : vector<16x40xf32>
    %494 = vector.extract_strided_slice %324 {offsets = [0, 33], sizes = [16, 1], strides = [1, 1]} : vector<16x49xf32> to vector<16x1xf32>
    %c0_205 = arith.constant 0 : index
    %c45_206 = arith.constant 45 : index
    %495 = vector.load %arg16[%c0_205, %c45_206] : memref<48x110xf32, #tpu.memory_space<vmem>>, vector<16x40xf32>
    %496 = vector.broadcast %494 : vector<16x1xf32> to vector<16x40xf32>
    %497 = arith.mulf %496, %495 : vector<16x40xf32>
    %498 = arith.addf %478, %497 : vector<16x40xf32>
    %499 = vector.extract_strided_slice %324 {offsets = [0, 34], sizes = [16, 1], strides = [1, 1]} : vector<16x49xf32> to vector<16x1xf32>
    %c0_207 = arith.constant 0 : index
    %c46_208 = arith.constant 46 : index
    %500 = vector.load %arg16[%c0_207, %c46_208] : memref<48x110xf32, #tpu.memory_space<vmem>>, vector<16x40xf32>
    %501 = vector.broadcast %499 : vector<16x1xf32> to vector<16x40xf32>
    %502 = arith.mulf %501, %500 : vector<16x40xf32>
    %503 = arith.addf %483, %502 : vector<16x40xf32>
    %504 = vector.extract_strided_slice %324 {offsets = [0, 35], sizes = [16, 1], strides = [1, 1]} : vector<16x49xf32> to vector<16x1xf32>
    %c0_209 = arith.constant 0 : index
    %c50_210 = arith.constant 50 : index
    %505 = vector.load %arg16[%c0_209, %c50_210] : memref<48x110xf32, #tpu.memory_space<vmem>>, vector<16x40xf32>
    %506 = vector.broadcast %504 : vector<16x1xf32> to vector<16x40xf32>
    %507 = arith.mulf %506, %505 : vector<16x40xf32>
    %508 = arith.addf %488, %507 : vector<16x40xf32>
    %509 = vector.extract_strided_slice %324 {offsets = [0, 36], sizes = [16, 1], strides = [1, 1]} : vector<16x49xf32> to vector<16x1xf32>
    %c0_211 = arith.constant 0 : index
    %c51_212 = arith.constant 51 : index
    %510 = vector.load %arg16[%c0_211, %c51_212] : memref<48x110xf32, #tpu.memory_space<vmem>>, vector<16x40xf32>
    %511 = vector.broadcast %509 : vector<16x1xf32> to vector<16x40xf32>
    %512 = arith.mulf %511, %510 : vector<16x40xf32>
    %513 = arith.addf %493, %512 : vector<16x40xf32>
    %514 = vector.extract_strided_slice %324 {offsets = [0, 37], sizes = [16, 1], strides = [1, 1]} : vector<16x49xf32> to vector<16x1xf32>
    %c0_213 = arith.constant 0 : index
    %c52_214 = arith.constant 52 : index
    %515 = vector.load %arg16[%c0_213, %c52_214] : memref<48x110xf32, #tpu.memory_space<vmem>>, vector<16x40xf32>
    %516 = vector.broadcast %514 : vector<16x1xf32> to vector<16x40xf32>
    %517 = arith.mulf %516, %515 : vector<16x40xf32>
    %518 = arith.addf %498, %517 : vector<16x40xf32>
    %519 = vector.extract_strided_slice %324 {offsets = [0, 38], sizes = [16, 1], strides = [1, 1]} : vector<16x49xf32> to vector<16x1xf32>
    %c0_215 = arith.constant 0 : index
    %c53_216 = arith.constant 53 : index
    %520 = vector.load %arg16[%c0_215, %c53_216] : memref<48x110xf32, #tpu.memory_space<vmem>>, vector<16x40xf32>
    %521 = vector.broadcast %519 : vector<16x1xf32> to vector<16x40xf32>
    %522 = arith.mulf %521, %520 : vector<16x40xf32>
    %523 = arith.addf %503, %522 : vector<16x40xf32>
    %524 = vector.extract_strided_slice %324 {offsets = [0, 39], sizes = [16, 1], strides = [1, 1]} : vector<16x49xf32> to vector<16x1xf32>
    %c0_217 = arith.constant 0 : index
    %c54_218 = arith.constant 54 : index
    %525 = vector.load %arg16[%c0_217, %c54_218] : memref<48x110xf32, #tpu.memory_space<vmem>>, vector<16x40xf32>
    %526 = vector.broadcast %524 : vector<16x1xf32> to vector<16x40xf32>
    %527 = arith.mulf %526, %525 : vector<16x40xf32>
    %528 = arith.addf %508, %527 : vector<16x40xf32>
    %529 = vector.extract_strided_slice %324 {offsets = [0, 40], sizes = [16, 1], strides = [1, 1]} : vector<16x49xf32> to vector<16x1xf32>
    %c0_219 = arith.constant 0 : index
    %c55_220 = arith.constant 55 : index
    %530 = vector.load %arg16[%c0_219, %c55_220] : memref<48x110xf32, #tpu.memory_space<vmem>>, vector<16x40xf32>
    %531 = vector.broadcast %529 : vector<16x1xf32> to vector<16x40xf32>
    %532 = arith.mulf %531, %530 : vector<16x40xf32>
    %533 = arith.addf %513, %532 : vector<16x40xf32>
    %534 = vector.extract_strided_slice %324 {offsets = [0, 41], sizes = [16, 1], strides = [1, 1]} : vector<16x49xf32> to vector<16x1xf32>
    %c0_221 = arith.constant 0 : index
    %c56_222 = arith.constant 56 : index
    %535 = vector.load %arg16[%c0_221, %c56_222] : memref<48x110xf32, #tpu.memory_space<vmem>>, vector<16x40xf32>
    %536 = vector.broadcast %534 : vector<16x1xf32> to vector<16x40xf32>
    %537 = arith.mulf %536, %535 : vector<16x40xf32>
    %538 = arith.addf %518, %537 : vector<16x40xf32>
    %539 = vector.extract_strided_slice %324 {offsets = [0, 42], sizes = [16, 1], strides = [1, 1]} : vector<16x49xf32> to vector<16x1xf32>
    %c0_223 = arith.constant 0 : index
    %c60_224 = arith.constant 60 : index
    %540 = vector.load %arg16[%c0_223, %c60_224] : memref<48x110xf32, #tpu.memory_space<vmem>>, vector<16x40xf32>
    %541 = vector.broadcast %539 : vector<16x1xf32> to vector<16x40xf32>
    %542 = arith.mulf %541, %540 : vector<16x40xf32>
    %543 = arith.addf %523, %542 : vector<16x40xf32>
    %544 = vector.extract_strided_slice %324 {offsets = [0, 43], sizes = [16, 1], strides = [1, 1]} : vector<16x49xf32> to vector<16x1xf32>
    %c0_225 = arith.constant 0 : index
    %c61_226 = arith.constant 61 : index
    %545 = vector.load %arg16[%c0_225, %c61_226] : memref<48x110xf32, #tpu.memory_space<vmem>>, vector<16x40xf32>
    %546 = vector.broadcast %544 : vector<16x1xf32> to vector<16x40xf32>
    %547 = arith.mulf %546, %545 : vector<16x40xf32>
    %548 = arith.addf %528, %547 : vector<16x40xf32>
    %549 = vector.extract_strided_slice %324 {offsets = [0, 44], sizes = [16, 1], strides = [1, 1]} : vector<16x49xf32> to vector<16x1xf32>
    %c0_227 = arith.constant 0 : index
    %c62_228 = arith.constant 62 : index
    %550 = vector.load %arg16[%c0_227, %c62_228] : memref<48x110xf32, #tpu.memory_space<vmem>>, vector<16x40xf32>
    %551 = vector.broadcast %549 : vector<16x1xf32> to vector<16x40xf32>
    %552 = arith.mulf %551, %550 : vector<16x40xf32>
    %553 = arith.addf %533, %552 : vector<16x40xf32>
    %554 = vector.extract_strided_slice %324 {offsets = [0, 45], sizes = [16, 1], strides = [1, 1]} : vector<16x49xf32> to vector<16x1xf32>
    %c0_229 = arith.constant 0 : index
    %c63_230 = arith.constant 63 : index
    %555 = vector.load %arg16[%c0_229, %c63_230] : memref<48x110xf32, #tpu.memory_space<vmem>>, vector<16x40xf32>
    %556 = vector.broadcast %554 : vector<16x1xf32> to vector<16x40xf32>
    %557 = arith.mulf %556, %555 : vector<16x40xf32>
    %558 = arith.addf %538, %557 : vector<16x40xf32>
    %559 = vector.extract_strided_slice %324 {offsets = [0, 46], sizes = [16, 1], strides = [1, 1]} : vector<16x49xf32> to vector<16x1xf32>
    %c0_231 = arith.constant 0 : index
    %c64_232 = arith.constant 64 : index
    %560 = vector.load %arg16[%c0_231, %c64_232] : memref<48x110xf32, #tpu.memory_space<vmem>>, vector<16x40xf32>
    %561 = vector.broadcast %559 : vector<16x1xf32> to vector<16x40xf32>
    %562 = arith.mulf %561, %560 : vector<16x40xf32>
    %563 = arith.addf %543, %562 : vector<16x40xf32>
    %564 = vector.extract_strided_slice %324 {offsets = [0, 47], sizes = [16, 1], strides = [1, 1]} : vector<16x49xf32> to vector<16x1xf32>
    %c0_233 = arith.constant 0 : index
    %c65_234 = arith.constant 65 : index
    %565 = vector.load %arg16[%c0_233, %c65_234] : memref<48x110xf32, #tpu.memory_space<vmem>>, vector<16x40xf32>
    %566 = vector.broadcast %564 : vector<16x1xf32> to vector<16x40xf32>
    %567 = arith.mulf %566, %565 : vector<16x40xf32>
    %568 = arith.addf %548, %567 : vector<16x40xf32>
    %569 = vector.extract_strided_slice %324 {offsets = [0, 48], sizes = [16, 1], strides = [1, 1]} : vector<16x49xf32> to vector<16x1xf32>
    %c0_235 = arith.constant 0 : index
    %c66_236 = arith.constant 66 : index
    %570 = vector.load %arg16[%c0_235, %c66_236] : memref<48x110xf32, #tpu.memory_space<vmem>>, vector<16x40xf32>
    %571 = vector.broadcast %569 : vector<16x1xf32> to vector<16x40xf32>
    %572 = arith.mulf %571, %570 : vector<16x40xf32>
    %573 = arith.addf %553, %572 : vector<16x40xf32>
    %574 = arith.addf %573, %558 : vector<16x40xf32>
    %575 = arith.addf %563, %568 : vector<16x40xf32>
    %576 = arith.addf %574, %575 : vector<16x40xf32>
    %c0_237 = arith.constant 0 : index
    %c0_238 = arith.constant 0 : index
    %577 = vector.load %arg10[%c0_237, %c0_238] : memref<16x1xf32, #tpu.memory_space<vmem>>, vector<16x1xf32>
    %578 = vector.broadcast %577 : vector<16x1xf32> to vector<16x40xf32>
    %579 = arith.addf %576, %578 : vector<16x40xf32>
    %cst_239 = arith.constant 0.000000e+00 : f32
    %580 = vector.broadcast %cst_239 : f32 to vector<16x40xf32>
    %581 = arith.cmpf ogt, %579, %580 : vector<16x40xf32>
    %c0_240 = arith.constant 0 : index
    %c0_241 = arith.constant 0 : index
    %582 = vector.load %arg11[%c0_240, %c0_241] : memref<16x1xf32, #tpu.memory_space<vmem>>, vector<16x1xf32>
    %583 = vector.broadcast %582 : vector<16x1xf32> to vector<16x40xf32>
    %584 = arith.mulf %579, %583 : vector<16x40xf32>
    %585 = arith.select %581, %579, %584 : vector<16x40xi1>, vector<16x40xf32>
    %586 = vector.broadcast %4 : vector<1x40xf32> to vector<16x40xf32>
    %587 = arith.mulf %585, %586 : vector<16x40xf32>
    %c0_242 = arith.constant 0 : index
    %c33_243 = arith.constant 33 : index
    %588 = vector.load %arg17[%c0_242, %c33_243] : memref<16x110xf32, #tpu.memory_space<vmem>>, vector<16x40xf32>
    tpu.vector_store %arg17[%c0_242, %c33_243], %587 {strides = array<i32>} : memref<16x110xf32, #tpu.memory_space<vmem>>, vector<16x40xf32>,
    %c0_244 = arith.constant 0 : index
    %c0_245 = arith.constant 0 : index
    %589 = vector.load %arg13[%c0_244, %c0_245] : memref<16x1xf32, #tpu.memory_space<vmem>>, vector<16x1xf32>
    %c0_246 = arith.constant 0 : index
    %c22_247 = arith.constant 22 : index
    %590 = vector.load %arg17[%c0_246, %c22_247] : memref<16x110xf32, #tpu.memory_space<vmem>>, vector<16x40xf32>
    %591 = arith.truncf %590 : vector<16x40xf32> to vector<16x40xbf16>
    %c0_248 = arith.constant 0 : index
    %c0_249 = arith.constant 0 : index
    %592 = vector.load %arg18[%c0_248, %c0_249] : memref<432x40xbf16, #tpu.memory_space<vmem>>, vector<16x40xbf16>
    tpu.vector_store %arg18[%c0_248, %c0_249], %591 {strides = array<i32>} : memref<432x40xbf16, #tpu.memory_space<vmem>>, vector<16x40xbf16>,
    %c0_250 = arith.constant 0 : index
    %c23_251 = arith.constant 23 : index
    %593 = vector.load %arg17[%c0_250, %c23_251] : memref<16x110xf32, #tpu.memory_space<vmem>>, vector<16x40xf32>
    %594 = arith.truncf %593 : vector<16x40xf32> to vector<16x40xbf16>
    %c16_252 = arith.constant 16 : index
    %c0_253 = arith.constant 0 : index
    %595 = vector.load %arg18[%c16_252, %c0_253] : memref<432x40xbf16, #tpu.memory_space<vmem>>, vector<16x40xbf16>
    tpu.vector_store %arg18[%c16_252, %c0_253], %594 {strides = array<i32>} : memref<432x40xbf16, #tpu.memory_space<vmem>>, vector<16x40xbf16>,
    %c0_254 = arith.constant 0 : index
    %c32_255 = arith.constant 32 : index
    %596 = vector.load %arg17[%c0_254, %c32_255] : memref<16x110xf32, #tpu.memory_space<vmem>>, vector<16x40xf32>
    %597 = arith.truncf %596 : vector<16x40xf32> to vector<16x40xbf16>
    %c32_256 = arith.constant 32 : index
    %c0_257 = arith.constant 0 : index
    %598 = vector.load %arg18[%c32_256, %c0_257] : memref<432x40xbf16, #tpu.memory_space<vmem>>, vector<16x40xbf16>
    tpu.vector_store %arg18[%c32_256, %c0_257], %597 {strides = array<i32>} : memref<432x40xbf16, #tpu.memory_space<vmem>>, vector<16x40xbf16>,
    %c0_258 = arith.constant 0 : index
    %c33_259 = arith.constant 33 : index
    %599 = vector.load %arg17[%c0_258, %c33_259] : memref<16x110xf32, #tpu.memory_space<vmem>>, vector<16x40xf32>
    %600 = arith.truncf %599 : vector<16x40xf32> to vector<16x40xbf16>
    %c48_260 = arith.constant 48 : index
    %c0_261 = arith.constant 0 : index
    %601 = vector.load %arg18[%c48_260, %c0_261] : memref<432x40xbf16, #tpu.memory_space<vmem>>, vector<16x40xbf16>
    tpu.vector_store %arg18[%c48_260, %c0_261], %600 {strides = array<i32>} : memref<432x40xbf16, #tpu.memory_space<vmem>>, vector<16x40xbf16>,
    %c0_262 = arith.constant 0 : index
    %c0_263 = arith.constant 0 : index
    %c0_264 = arith.constant 0 : index
    %602 = vector.load %arg12[%c0_262, %c0_263, %c0_264] : memref<4x16x64xbf16, #tpu.memory_space<vmem>>, vector<1x16x64xbf16>
    %603 = vector.shape_cast %602 : vector<1x16x64xbf16> to vector<16x64xbf16>
    %c0_265 = arith.constant 0 : index
    %c0_266 = arith.constant 0 : index
    %604 = vector.load %arg18[%c0_265, %c0_266] : memref<432x40xbf16, #tpu.memory_space<vmem>>, vector<64x40xbf16>
    %cst_267 = arith.constant dense<0.000000e+00> : vector<16x40xf32>
    %605 = tpu.matmul %603, %604, %cst_267 {dimension_numbers = #tpu.dot_dimension_numbers<[1], [0], [0], [1], [0, 0, 1, 1], [], []>} : vector<16x64xbf16>, vector<64x40xbf16>, vector<16x40xf32> -> vector<16x40xf32>
    %606 = vector.broadcast %589 : vector<16x1xf32> to vector<16x40xf32>
    %607 = arith.addf %605, %606 : vector<16x40xf32>
    %cst_268 = arith.constant 0.000000e+00 : f32
    %608 = vector.broadcast %cst_268 : f32 to vector<16x40xf32>
    %609 = arith.cmpf ogt, %607, %608 : vector<16x40xf32>
    %c0_269 = arith.constant 0 : index
    %c0_270 = arith.constant 0 : index
    %610 = vector.load %arg14[%c0_269, %c0_270] : memref<16x1xf32, #tpu.memory_space<vmem>>, vector<16x1xf32>
    %611 = vector.broadcast %610 : vector<16x1xf32> to vector<16x40xf32>
    %612 = arith.mulf %607, %611 : vector<16x40xf32>
    %613 = arith.select %609, %607, %612 : vector<16x40xi1>, vector<16x40xf32>
    %c0_271 = arith.constant 0 : index
    %c0_272 = arith.constant 0 : index
    %c0_273 = arith.constant 0 : index
    %c0_274 = arith.constant 0 : index
    %614 = vector.load %arg15[%c0_271, %c0_272, %c0_273, %c0_274] : memref<1x4x16x40xf32, #tpu.memory_space<vmem>>, vector<1x1x16x40xf32>
    %615 = vector.shape_cast %614 : vector<1x1x16x40xf32> to vector<16x40xf32>
    %616 = vector.shape_cast %613 : vector<16x40xf32> to vector<1x1x16x40xf32>
    tpu.vector_store %arg15[%c0_271, %c0_272, %c0_273, %c0_274], %616 {strides = array<i32>} : memref<1x4x16x40xf32, #tpu.memory_space<vmem>>, vector<1x1x16x40xf32>,
    %c0_275 = arith.constant 0 : index
    %c23_276 = arith.constant 23 : index
    %617 = vector.load %arg17[%c0_275, %c23_276] : memref<16x110xf32, #tpu.memory_space<vmem>>, vector<16x40xf32>
    %618 = arith.truncf %617 : vector<16x40xf32> to vector<16x40xbf16>
    %c0_277 = arith.constant 0 : index
    %c0_278 = arith.constant 0 : index
    %619 = vector.load %arg18[%c0_277, %c0_278] : memref<432x40xbf16, #tpu.memory_space<vmem>>, vector<16x40xbf16>
    tpu.vector_store %arg18[%c0_277, %c0_278], %618 {strides = array<i32>} : memref<432x40xbf16, #tpu.memory_space<vmem>>, vector<16x40xbf16>,
    %c0_279 = arith.constant 0 : index
    %c24_280 = arith.constant 24 : index
    %620 = vector.load %arg17[%c0_279, %c24_280] : memref<16x110xf32, #tpu.memory_space<vmem>>, vector<16x40xf32>
    %621 = arith.truncf %620 : vector<16x40xf32> to vector<16x40xbf16>
    %c16_281 = arith.constant 16 : index
    %c0_282 = arith.constant 0 : index
    %622 = vector.load %arg18[%c16_281, %c0_282] : memref<432x40xbf16, #tpu.memory_space<vmem>>, vector<16x40xbf16>
    tpu.vector_store %arg18[%c16_281, %c0_282], %621 {strides = array<i32>} : memref<432x40xbf16, #tpu.memory_space<vmem>>, vector<16x40xbf16>,
    %c0_283 = arith.constant 0 : index
    %c33_284 = arith.constant 33 : index
    %623 = vector.load %arg17[%c0_283, %c33_284] : memref<16x110xf32, #tpu.memory_space<vmem>>, vector<16x40xf32>
    %624 = arith.truncf %623 : vector<16x40xf32> to vector<16x40xbf16>
    %c32_285 = arith.constant 32 : index
    %c0_286 = arith.constant 0 : index
    %625 = vector.load %arg18[%c32_285, %c0_286] : memref<432x40xbf16, #tpu.memory_space<vmem>>, vector<16x40xbf16>
    tpu.vector_store %arg18[%c32_285, %c0_286], %624 {strides = array<i32>} : memref<432x40xbf16, #tpu.memory_space<vmem>>, vector<16x40xbf16>,
    %c0_287 = arith.constant 0 : index
    %c34_288 = arith.constant 34 : index
    %626 = vector.load %arg17[%c0_287, %c34_288] : memref<16x110xf32, #tpu.memory_space<vmem>>, vector<16x40xf32>
    %627 = arith.truncf %626 : vector<16x40xf32> to vector<16x40xbf16>
    %c48_289 = arith.constant 48 : index
    %c0_290 = arith.constant 0 : index
    %628 = vector.load %arg18[%c48_289, %c0_290] : memref<432x40xbf16, #tpu.memory_space<vmem>>, vector<16x40xbf16>
    tpu.vector_store %arg18[%c48_289, %c0_290], %627 {strides = array<i32>} : memref<432x40xbf16, #tpu.memory_space<vmem>>, vector<16x40xbf16>,
    %c1_291 = arith.constant 1 : index
    %c0_292 = arith.constant 0 : index
    %c0_293 = arith.constant 0 : index
    %629 = vector.load %arg12[%c1_291, %c0_292, %c0_293] : memref<4x16x64xbf16, #tpu.memory_space<vmem>>, vector<1x16x64xbf16>
    %630 = vector.shape_cast %629 : vector<1x16x64xbf16> to vector<16x64xbf16>
    %c0_294 = arith.constant 0 : index
    %c0_295 = arith.constant 0 : index
    %631 = vector.load %arg18[%c0_294, %c0_295] : memref<432x40xbf16, #tpu.memory_space<vmem>>, vector<64x40xbf16>
    %cst_296 = arith.constant dense<0.000000e+00> : vector<16x40xf32>
    %632 = tpu.matmul %630, %631, %cst_296 {dimension_numbers = #tpu.dot_dimension_numbers<[1], [0], [0], [1], [0, 0, 1, 1], [], []>} : vector<16x64xbf16>, vector<64x40xbf16>, vector<16x40xf32> -> vector<16x40xf32>
    %633 = vector.broadcast %589 : vector<16x1xf32> to vector<16x40xf32>
    %634 = arith.addf %632, %633 : vector<16x40xf32>
    %cst_297 = arith.constant 0.000000e+00 : f32
    %635 = vector.broadcast %cst_297 : f32 to vector<16x40xf32>
    %636 = arith.cmpf ogt, %634, %635 : vector<16x40xf32>
    %c0_298 = arith.constant 0 : index
    %c0_299 = arith.constant 0 : index
    %637 = vector.load %arg14[%c0_298, %c0_299] : memref<16x1xf32, #tpu.memory_space<vmem>>, vector<16x1xf32>
    %638 = vector.broadcast %637 : vector<16x1xf32> to vector<16x40xf32>
    %639 = arith.mulf %634, %638 : vector<16x40xf32>
    %640 = arith.select %636, %634, %639 : vector<16x40xi1>, vector<16x40xf32>
    %c0_300 = arith.constant 0 : index
    %c1_301 = arith.constant 1 : index
    %c0_302 = arith.constant 0 : index
    %c0_303 = arith.constant 0 : index
    %641 = vector.load %arg15[%c0_300, %c1_301, %c0_302, %c0_303] : memref<1x4x16x40xf32, #tpu.memory_space<vmem>>, vector<1x1x16x40xf32>
    %642 = vector.shape_cast %641 : vector<1x1x16x40xf32> to vector<16x40xf32>
    %643 = vector.shape_cast %640 : vector<16x40xf32> to vector<1x1x16x40xf32>
    tpu.vector_store %arg15[%c0_300, %c1_301, %c0_302, %c0_303], %643 {strides = array<i32>} : memref<1x4x16x40xf32, #tpu.memory_space<vmem>>, vector<1x1x16x40xf32>,
    %c0_304 = arith.constant 0 : index
    %c32_305 = arith.constant 32 : index
    %644 = vector.load %arg17[%c0_304, %c32_305] : memref<16x110xf32, #tpu.memory_space<vmem>>, vector<16x40xf32>
    %645 = arith.truncf %644 : vector<16x40xf32> to vector<16x40xbf16>
    %c0_306 = arith.constant 0 : index
    %c0_307 = arith.constant 0 : index
    %646 = vector.load %arg18[%c0_306, %c0_307] : memref<432x40xbf16, #tpu.memory_space<vmem>>, vector<16x40xbf16>
    tpu.vector_store %arg18[%c0_306, %c0_307], %645 {strides = array<i32>} : memref<432x40xbf16, #tpu.memory_space<vmem>>, vector<16x40xbf16>,
    %c0_308 = arith.constant 0 : index
    %c33_309 = arith.constant 33 : index
    %647 = vector.load %arg17[%c0_308, %c33_309] : memref<16x110xf32, #tpu.memory_space<vmem>>, vector<16x40xf32>
    %648 = arith.truncf %647 : vector<16x40xf32> to vector<16x40xbf16>
    %c16_310 = arith.constant 16 : index
    %c0_311 = arith.constant 0 : index
    %649 = vector.load %arg18[%c16_310, %c0_311] : memref<432x40xbf16, #tpu.memory_space<vmem>>, vector<16x40xbf16>
    tpu.vector_store %arg18[%c16_310, %c0_311], %648 {strides = array<i32>} : memref<432x40xbf16, #tpu.memory_space<vmem>>, vector<16x40xbf16>,
    %c0_312 = arith.constant 0 : index
    %c42_313 = arith.constant 42 : index
    %650 = vector.load %arg17[%c0_312, %c42_313] : memref<16x110xf32, #tpu.memory_space<vmem>>, vector<16x40xf32>
    %651 = arith.truncf %650 : vector<16x40xf32> to vector<16x40xbf16>
    %c32_314 = arith.constant 32 : index
    %c0_315 = arith.constant 0 : index
    %652 = vector.load %arg18[%c32_314, %c0_315] : memref<432x40xbf16, #tpu.memory_space<vmem>>, vector<16x40xbf16>
    tpu.vector_store %arg18[%c32_314, %c0_315], %651 {strides = array<i32>} : memref<432x40xbf16, #tpu.memory_space<vmem>>, vector<16x40xbf16>,
    %c0_316 = arith.constant 0 : index
    %c43_317 = arith.constant 43 : index
    %653 = vector.load %arg17[%c0_316, %c43_317] : memref<16x110xf32, #tpu.memory_space<vmem>>, vector<16x40xf32>
    %654 = arith.truncf %653 : vector<16x40xf32> to vector<16x40xbf16>
    %c48_318 = arith.constant 48 : index
    %c0_319 = arith.constant 0 : index
    %655 = vector.load %arg18[%c48_318, %c0_319] : memref<432x40xbf16, #tpu.memory_space<vmem>>, vector<16x40xbf16>
    tpu.vector_store %arg18[%c48_318, %c0_319], %654 {strides = array<i32>} : memref<432x40xbf16, #tpu.memory_space<vmem>>, vector<16x40xbf16>,
    %c2_320 = arith.constant 2 : index
    %c0_321 = arith.constant 0 : index
    %c0_322 = arith.constant 0 : index
    %656 = vector.load %arg12[%c2_320, %c0_321, %c0_322] : memref<4x16x64xbf16, #tpu.memory_space<vmem>>, vector<1x16x64xbf16>
    %657 = vector.shape_cast %656 : vector<1x16x64xbf16> to vector<16x64xbf16>
    %c0_323 = arith.constant 0 : index
    %c0_324 = arith.constant 0 : index
    %658 = vector.load %arg18[%c0_323, %c0_324] : memref<432x40xbf16, #tpu.memory_space<vmem>>, vector<64x40xbf16>
    %cst_325 = arith.constant dense<0.000000e+00> : vector<16x40xf32>
    %659 = tpu.matmul %657, %658, %cst_325 {dimension_numbers = #tpu.dot_dimension_numbers<[1], [0], [0], [1], [0, 0, 1, 1], [], []>} : vector<16x64xbf16>, vector<64x40xbf16>, vector<16x40xf32> -> vector<16x40xf32>
    %660 = vector.broadcast %589 : vector<16x1xf32> to vector<16x40xf32>
    %661 = arith.addf %659, %660 : vector<16x40xf32>
    %cst_326 = arith.constant 0.000000e+00 : f32
    %662 = vector.broadcast %cst_326 : f32 to vector<16x40xf32>
    %663 = arith.cmpf ogt, %661, %662 : vector<16x40xf32>
    %c0_327 = arith.constant 0 : index
    %c0_328 = arith.constant 0 : index
    %664 = vector.load %arg14[%c0_327, %c0_328] : memref<16x1xf32, #tpu.memory_space<vmem>>, vector<16x1xf32>
    %665 = vector.broadcast %664 : vector<16x1xf32> to vector<16x40xf32>
    %666 = arith.mulf %661, %665 : vector<16x40xf32>
    %667 = arith.select %663, %661, %666 : vector<16x40xi1>, vector<16x40xf32>
    %c0_329 = arith.constant 0 : index
    %c2_330 = arith.constant 2 : index
    %c0_331 = arith.constant 0 : index
    %c0_332 = arith.constant 0 : index
    %668 = vector.load %arg15[%c0_329, %c2_330, %c0_331, %c0_332] : memref<1x4x16x40xf32, #tpu.memory_space<vmem>>, vector<1x1x16x40xf32>
    %669 = vector.shape_cast %668 : vector<1x1x16x40xf32> to vector<16x40xf32>
    %670 = vector.shape_cast %667 : vector<16x40xf32> to vector<1x1x16x40xf32>
    tpu.vector_store %arg15[%c0_329, %c2_330, %c0_331, %c0_332], %670 {strides = array<i32>} : memref<1x4x16x40xf32, #tpu.memory_space<vmem>>, vector<1x1x16x40xf32>,
    %c0_333 = arith.constant 0 : index
    %c33_334 = arith.constant 33 : index
    %671 = vector.load %arg17[%c0_333, %c33_334] : memref<16x110xf32, #tpu.memory_space<vmem>>, vector<16x40xf32>
    %672 = arith.truncf %671 : vector<16x40xf32> to vector<16x40xbf16>
    %c0_335 = arith.constant 0 : index
    %c0_336 = arith.constant 0 : index
    %673 = vector.load %arg18[%c0_335, %c0_336] : memref<432x40xbf16, #tpu.memory_space<vmem>>, vector<16x40xbf16>
    tpu.vector_store %arg18[%c0_335, %c0_336], %672 {strides = array<i32>} : memref<432x40xbf16, #tpu.memory_space<vmem>>, vector<16x40xbf16>,
    %c0_337 = arith.constant 0 : index
    %c34_338 = arith.constant 34 : index
    %674 = vector.load %arg17[%c0_337, %c34_338] : memref<16x110xf32, #tpu.memory_space<vmem>>, vector<16x40xf32>
    %675 = arith.truncf %674 : vector<16x40xf32> to vector<16x40xbf16>
    %c16_339 = arith.constant 16 : index
    %c0_340 = arith.constant 0 : index
    %676 = vector.load %arg18[%c16_339, %c0_340] : memref<432x40xbf16, #tpu.memory_space<vmem>>, vector<16x40xbf16>
    tpu.vector_store %arg18[%c16_339, %c0_340], %675 {strides = array<i32>} : memref<432x40xbf16, #tpu.memory_space<vmem>>, vector<16x40xbf16>,
    %c0_341 = arith.constant 0 : index
    %c43_342 = arith.constant 43 : index
    %677 = vector.load %arg17[%c0_341, %c43_342] : memref<16x110xf32, #tpu.memory_space<vmem>>, vector<16x40xf32>
    %678 = arith.truncf %677 : vector<16x40xf32> to vector<16x40xbf16>
    %c32_343 = arith.constant 32 : index
    %c0_344 = arith.constant 0 : index
    %679 = vector.load %arg18[%c32_343, %c0_344] : memref<432x40xbf16, #tpu.memory_space<vmem>>, vector<16x40xbf16>
    tpu.vector_store %arg18[%c32_343, %c0_344], %678 {strides = array<i32>} : memref<432x40xbf16, #tpu.memory_space<vmem>>, vector<16x40xbf16>,
    %c0_345 = arith.constant 0 : index
    %c44_346 = arith.constant 44 : index
    %680 = vector.load %arg17[%c0_345, %c44_346] : memref<16x110xf32, #tpu.memory_space<vmem>>, vector<16x40xf32>
    %681 = arith.truncf %680 : vector<16x40xf32> to vector<16x40xbf16>
    %c48_347 = arith.constant 48 : index
    %c0_348 = arith.constant 0 : index
    %682 = vector.load %arg18[%c48_347, %c0_348] : memref<432x40xbf16, #tpu.memory_space<vmem>>, vector<16x40xbf16>
    tpu.vector_store %arg18[%c48_347, %c0_348], %681 {strides = array<i32>} : memref<432x40xbf16, #tpu.memory_space<vmem>>, vector<16x40xbf16>,
    %c3_349 = arith.constant 3 : index
    %c0_350 = arith.constant 0 : index
    %c0_351 = arith.constant 0 : index
    %683 = vector.load %arg12[%c3_349, %c0_350, %c0_351] : memref<4x16x64xbf16, #tpu.memory_space<vmem>>, vector<1x16x64xbf16>
    %684 = vector.shape_cast %683 : vector<1x16x64xbf16> to vector<16x64xbf16>
    %c0_352 = arith.constant 0 : index
    %c0_353 = arith.constant 0 : index
    %685 = vector.load %arg18[%c0_352, %c0_353] : memref<432x40xbf16, #tpu.memory_space<vmem>>, vector<64x40xbf16>
    %cst_354 = arith.constant dense<0.000000e+00> : vector<16x40xf32>
    %686 = tpu.matmul %684, %685, %cst_354 {dimension_numbers = #tpu.dot_dimension_numbers<[1], [0], [0], [1], [0, 0, 1, 1], [], []>} : vector<16x64xbf16>, vector<64x40xbf16>, vector<16x40xf32> -> vector<16x40xf32>
    %687 = vector.broadcast %589 : vector<16x1xf32> to vector<16x40xf32>
    %688 = arith.addf %686, %687 : vector<16x40xf32>
    %cst_355 = arith.constant 0.000000e+00 : f32
    %689 = vector.broadcast %cst_355 : f32 to vector<16x40xf32>
    %690 = arith.cmpf ogt, %688, %689 : vector<16x40xf32>
    %c0_356 = arith.constant 0 : index
    %c0_357 = arith.constant 0 : index
    %691 = vector.load %arg14[%c0_356, %c0_357] : memref<16x1xf32, #tpu.memory_space<vmem>>, vector<16x1xf32>
    %692 = vector.broadcast %691 : vector<16x1xf32> to vector<16x40xf32>
    %693 = arith.mulf %688, %692 : vector<16x40xf32>
    %694 = arith.select %690, %688, %693 : vector<16x40xi1>, vector<16x40xf32>
    %c0_358 = arith.constant 0 : index
    %c3_359 = arith.constant 3 : index
    %c0_360 = arith.constant 0 : index
    %c0_361 = arith.constant 0 : index
    %695 = vector.load %arg15[%c0_358, %c3_359, %c0_360, %c0_361] : memref<1x4x16x40xf32, #tpu.memory_space<vmem>>, vector<1x1x16x40xf32>
    %696 = vector.shape_cast %695 : vector<1x1x16x40xf32> to vector<16x40xf32>
    %697 = vector.shape_cast %694 : vector<16x40xf32> to vector<1x1x16x40xf32>
    tpu.vector_store %arg15[%c0_358, %c3_359, %c0_360, %c0_361], %697 {strides = array<i32>} : memref<1x4x16x40xf32, #tpu.memory_space<vmem>>, vector<1x1x16x40xf32>,
    return
  }
  func.func @transform_0(%arg0: i32) -> (i32, i32, i32, i32) {
    %c0_i32 = arith.constant 0 : i32
    %c0_i32_0 = arith.constant 0 : i32
    %c0_i32_1 = arith.constant 0 : i32
    %c0_i32_2 = arith.constant 0 : i32
    return %arg0, %c0_i32, %c0_i32_0, %c0_i32_1 : i32, i32, i32, i32
  }
  func.func @transform_1(%arg0: i32) -> (i32, i32) {
    %c0_i32 = arith.constant 0 : i32
    %c0_i32_0 = arith.constant 0 : i32
    %c0_i32_1 = arith.constant 0 : i32
    return %c0_i32, %c0_i32_0 : i32, i32
  }
  func.func @transform_2(%arg0: i32) -> (i32, i32) {
    %c0_i32 = arith.constant 0 : i32
    %c0_i32_0 = arith.constant 0 : i32
    %c0_i32_1 = arith.constant 0 : i32
    return %c0_i32, %c0_i32_0 : i32, i32
  }
  func.func @transform_3(%arg0: i32) -> (i32, i32) {
    %c0_i32 = arith.constant 0 : i32
    %c0_i32_0 = arith.constant 0 : i32
    %c0_i32_1 = arith.constant 0 : i32
    return %c0_i32, %c0_i32_0 : i32, i32
  }
  func.func @transform_4(%arg0: i32) -> (i32, i32) {
    %c0_i32 = arith.constant 0 : i32
    %c0_i32_0 = arith.constant 0 : i32
    %c0_i32_1 = arith.constant 0 : i32
    return %c0_i32, %c0_i32_0 : i32, i32
  }
  func.func @transform_5(%arg0: i32) -> (i32, i32) {
    %c0_i32 = arith.constant 0 : i32
    %c0_i32_0 = arith.constant 0 : i32
    %c0_i32_1 = arith.constant 0 : i32
    return %c0_i32, %c0_i32_0 : i32, i32
  }
  func.func @transform_6(%arg0: i32) -> (i32, i32) {
    %c0_i32 = arith.constant 0 : i32
    %c0_i32_0 = arith.constant 0 : i32
    %c0_i32_1 = arith.constant 0 : i32
    return %c0_i32, %c0_i32_0 : i32, i32
  }
  func.func @transform_7(%arg0: i32) -> (i32, i32) {
    %c0_i32 = arith.constant 0 : i32
    %c0_i32_0 = arith.constant 0 : i32
    %c0_i32_1 = arith.constant 0 : i32
    return %c0_i32, %c0_i32_0 : i32, i32
  }
  func.func @transform_8(%arg0: i32) -> (i32, i32) {
    %c0_i32 = arith.constant 0 : i32
    %c0_i32_0 = arith.constant 0 : i32
    %c0_i32_1 = arith.constant 0 : i32
    return %c0_i32, %c0_i32_0 : i32, i32
  }
  func.func @transform_9(%arg0: i32) -> (i32, i32) {
    %c0_i32 = arith.constant 0 : i32
    %c0_i32_0 = arith.constant 0 : i32
    %c0_i32_1 = arith.constant 0 : i32
    return %c0_i32, %c0_i32_0 : i32, i32
  }
  func.func @transform_10(%arg0: i32) -> (i32, i32) {
    %c0_i32 = arith.constant 0 : i32
    %c0_i32_0 = arith.constant 0 : i32
    %c0_i32_1 = arith.constant 0 : i32
    return %c0_i32, %c0_i32_0 : i32, i32
  }
  func.func @transform_11(%arg0: i32) -> (i32, i32, i32) {
    %c0_i32 = arith.constant 0 : i32
    %c0_i32_0 = arith.constant 0 : i32
    %c0_i32_1 = arith.constant 0 : i32
    %c0_i32_2 = arith.constant 0 : i32
    return %c0_i32, %c0_i32_0, %c0_i32_1 : i32, i32, i32
  }
  func.func @transform_12(%arg0: i32) -> (i32, i32) {
    %c0_i32 = arith.constant 0 : i32
    %c0_i32_0 = arith.constant 0 : i32
    %c0_i32_1 = arith.constant 0 : i32
    return %c0_i32, %c0_i32_0 : i32, i32
  }
  func.func @transform_13(%arg0: i32) -> (i32, i32) {
    %c0_i32 = arith.constant 0 : i32
    %c0_i32_0 = arith.constant 0 : i32
    %c0_i32_1 = arith.constant 0 : i32
    return %c0_i32, %c0_i32_0 : i32, i32
  }
  func.func @transform_14(%arg0: i32) -> (i32, i32, i32, i32) {
    %c0_i32 = arith.constant 0 : i32
    %c0_i32_0 = arith.constant 0 : i32
    %c0_i32_1 = arith.constant 0 : i32
    %c0_i32_2 = arith.constant 0 : i32
    return %arg0, %c0_i32, %c0_i32_0, %c0_i32_1 : i32, i32, i32, i32
  }
}

</mosaic_0001>

<bundles_post_ra>
// kernel: tpu_custom_call.1
= control target key start
LH: loop header
LB: loop body
LE: loop exit
PB: predicated region body
PF: predicated region fallthrough
CT: control target
= control target key end

     0   :  { %s8026_s0 = inlined_call_operand.vmem [shape: f32[2,33,4,4], index: 0, kind: input, shape index: {}]   ;;  %s8027_s1 = inlined_call_operand.vmem [shape: f32[1,40], index: 1, kind: input, shape index: {}]   ;;  %s8028_s2 = inlined_call_operand.vmem [shape: bf16[16,432], index: 2, kind: input, shape index: {}]   ;;  %s8029_s3 = inlined_call_operand.vmem [shape: f32[16,1], index: 3, kind: input, shape index: {}]   ;;  %s8030_s4 = inlined_call_operand.vmem [shape: f32[16,1], index: 4, kind: input, shape index: {}]   ;;  %s8031_s5 = inlined_call_operand.vmem [shape: f32[16,49], index: 5, kind: input, shape index: {}]   ;;  %s8032_s6 = inlined_call_operand.vmem [shape: f32[16,1], index: 6, kind: input, shape index: {}]   ;;  %s8033_s7 = inlined_call_operand.vmem [shape: f32[16,1], index: 7, kind: input, shape index: {}]   ;;  %s8034_s8 = inlined_call_operand.vmem [shape: f32[16,49], index: 8, kind: input, shape index: {}]   ;;  %s8035_s9 = inlined_call_operand.vmem [shape: f32[16,1], index: 9, kind: input, shape index: {}]   ;;  %s8036_s10 = inlined_call_operand.vmem [shape: f32[16,1], index: 10, kind: input, shape index: {}]   ;;  %s8037_s11 = inlined_call_operand.vmem [shape: bf16[4,16,64], index: 11, kind: input, shape index: {}]   ;;  %s8038_s12 = inlined_call_operand.vmem [shape: f32[16,1], index: 12, kind: input, shape index: {}]   ;;  %s8039_s13 = inlined_call_operand.vmem [shape: f32[16,1], index: 13, kind: input, shape index: {}]   ;;  %s8040_s14 = inlined_call_operand.hbm [shape: f32[2,4,16,40], index: 14, kind: output, shape index: {}]  }
   0x1   :  { %8195 = sst [smem:[#allocation74_spill]] %s8026_s0 }
   0x2   :  { %8196 = sst [smem:[#allocation75_spill]] %s8027_s1 }
   0x3   :  { %8197 = sst [smem:[#allocation76_spill]] %s8028_s2 }
   0x4   :  { %8198 = sst [smem:[#allocation77_spill]] %s8029_s3 }
   0x5   :  { %8199 = sst [smem:[#allocation78_spill]] %s8030_s4 }
   0x6   :  { %8200 = sst [smem:[#allocation79_spill]] %s8031_s5 }
   0x7   :  { %8201 = sst [smem:[#allocation80_spill]] %s8032_s6 }
   0x8   :  { %8202 = sst [smem:[#allocation81_spill]] %s8033_s7 }
   0x9   :  { %8203 = sst [smem:[#allocation82_spill]] %s8034_s8 }
   0xa   :  { %19 = vsyncpa [#allocation6], 0 }
   0xb   :  { %21 = vsyncpa [#allocation6 + $0x1], 0  ;;  %s5607_s29 = smov 0   ;;  %s5609_s30 = smov 0  }
   0xc   :  { %s5611_s15 = smov 0   ;;  %s5613_s16 = smov 0  }
   0xd LB: > { %8204 = sst [smem:[#allocation8_spill]] %s5435_s29  ;;  %s5628_s17 = sadd.s32 4294967295, %s5447_s16   ;;  %s5447_s16 = sphi %s5613_s16, %s8526_s16   ;;  %s5443_s15 = sphi %s5611_s15, %s8528_s15   ;;  %s5439_s30 = sphi %s5609_s30, %s8530_s30   ;;  %s5435_s29 = sphi %s5607_s29, %s8529_s29  }
   0xe   : > { %8205 = sst [smem:[#allocation9_spill]] %s5443_s15  ;;  %s4687_s18 = sadd.s32 4294967294, %s5447_s16  }
   0xf   : > { %8206 = sst [smem:[#allocation10_spill]] %s5447_s16  ;;  %s5632_s19 = sadd.s32 1, %s5447_s16  }
  0x10   : > { %8207 = sst [smem:[#allocation11_spill]] %s5632_s19  ;;  %s333_s20 = sadd.s32 1, %s5443_s15 }
  0x11   : > { %s330_s21 = ssub.s32 %s5447_s16, %s5632_s19  ;;  %p343_p0 = scmp.ne.s32.totalorder %s5443_s15, %s5439_s30 }
  0x12   : > { %p331_p1 = scmp.eq.s32.totalorder %s330_s21, 0  ;;  %p344_p2 = scmp.eq.s32.totalorder %s5628_s17, 1 }
  0x13   : > { %p349_p3 = scmp.ne.s32.totalorder %s5439_s30, %s5435_s29  ;;  %p350_p4 = scmp.eq.s32.totalorder %s4687_s18, 1 }
  0x14   : > { %s5643_s22 = scalar_select %p331_p1, %s5443_s15, %s333_s20  }
  0x15   : > { %p5645_p5 = por %p344_p2, %p343_p0  ;;  %p5649_p6 = por %p350_p4, %p349_p3 }
  0x16   : > { %8208 = sst [smem:[#allocation12_spill]] %s5643_s22  ;;  %p4690_p7 = scmp.ge.s32.totalorder %s5447_s16, 1 }
  0x17   : > { %s8210_s24 = scalar_select %p5649_p6, 1, 0 }
  0x18   : > { %p415_p8 = scmp.lt.s32.totalorder %s5447_s16, 3 }
  0x19   : > { %8211 = sst [smem:[#allocation13_spill]] %s8210_s24 }
  0x1a   : > { %p416_p9 = pnand %p4690_p7, %p415_p8 }
  0x1c   : > { %419 = sbr.rel (%p416_p9) target bundleno = 2596 (0xa24), region = 76 }
  0x21   : > { %p461_p10 = scmp.lt.s32.totalorder %s5628_s17, 1  ;;  %vm467_vm0 = vcmask 900096   ;;  %vm544_vm1 = vcmask 1041409   ;;  %vm547_vm2 = vcmask 1042434   ;;  %vm550_vm3 = vcmask 1043459   ;;  %s8212_s0 = sld [smem:[#allocation74_spill]] }
  0x22   : > { %v8065_v0 = vmov 0.0   ;;  %vm553_vm4 = vcmask 1044484   ;;  %s8041_s20 = smov 33   ;;  %s5451_s21 = smov 43   ;;  %vm556_vm5 = vcmask 1045509   ;;  %vm559_vm6 = vcmask 1046534  }
  0x23   : > { %s462_s25 = scalar_select %p461_p10, %s5628_s17, 1  ;;  %472 = vst.msk [vmem:[#allocation2 + $0x20] sm:$0xff] %vm467_vm0, %v8065_v0  ;;  %468 = vst.msk [vmem:[#allocation2] sm:$0xff] %vm467_vm0, %v8065_v0  ;;  %vm562_vm7 = vcmask 1047559   ;;  %vm626_vm8 = vcmask 295176   ;;  %vm770_vm9 = vcmask 377176  }
  0x24   : > { %469 = vst.msk [vmem:[#allocation2 + $0x8] sm:$0xff] %vm467_vm0, %v8065_v0  ;;  %470 = vst.msk [vmem:[#allocation2 + $0x10] sm:$0xff] %vm467_vm0, %v8065_v0  ;;  %s8043_s27 = smov 106   ;;  %s8055_s28 = smov 105   ;;  %vm621_vm10 = vcmask 302344   ;;  %vm765_vm11 = vcmask 384344  }
  0x25   : > { %471 = vst.msk [vmem:[#allocation2 + $0x18] sm:$0xff] %vm467_vm0, %v8065_v0  ;;  %473 = vst.msk [vmem:[#allocation2 + $0x28] sm:$0xff] %vm467_vm0, %v8065_v0  ;;  %s5030_s26 = smul.u32 132, %s462_s25  ;;  %s5452_s25 = smov 53   ;;  %vm909_vm12 = vcmask 466344   ;;  %vm1053_vm13 = vcmask 548344  }
  0x26   : > { %474 = vst.msk [vmem:[#allocation3] sm:$0xff] %vm467_vm0, %v8065_v0  ;;  %475 = vst.msk [vmem:[#allocation3 + $0x8] sm:$0xff] %vm467_vm0, %v8065_v0  ;;  %vm914_vm14 = vcmask 459176   ;;  %vm1058_vm15 = vcmask 541176   ;;  %vm1102_vm0 = vcmask 322560   ;;  %s8218_s3 = sld [smem:[#allocation77_spill]] }
  0x27   : > { %s5668_s18 = scalar_lea.vmem %s8212_s0, %s5030_s26  ;;  %s5453_s26 = smov 63  }
  0x28   : > { %v509_v1 = vld [vmem:[%s5668_s18 + $0x80] sm:$0x1]  ;;  %v660_v2 = vld [vmem:[%s5668_s18 + $0x81] sm:$0x1]  ;;  %v494_v4 = vld [vmem:[%s5668_s18 + $0x44] sm:$0x1] }
  0x29   : > { %v493_v3 = vld [vmem:[%s5668_s18 + $0x40] sm:$0x1]  ;;  %614 = vrot.lane.b32.xlu0 %v509_v1, %s8041_s20  ;;  %758 = vrot.lane.b32.xlu1 %v660_v2, %s5451_s21  ;;  %v495_v5 = vld [vmem:[%s5668_s18 + $0x48] sm:$0x1]  ;;  %v578_v11 = vrot.slane %v494_v4, 7  ;;  %s8057_s0 = smov 86  }
  0x2a   : > { %v496_v6 = vld [vmem:[%s5668_s18 + $0x4c] sm:$0x1]  ;;  %v497_v7 = vld [vmem:[%s5668_s18 + $0x50] sm:$0x1]  ;;  %v498_v8 = vld [vmem:[%s5668_s18 + $0x54] sm:$0x1] }
  0x2b   : > { %v499_v9 = vld [vmem:[%s5668_s18 + $0x58] sm:$0x1]  ;;  %v500_v10 = vld [vmem:[%s5668_s18 + $0x5c] sm:$0x1]  ;;  %v580_v12 = vrot.slane %v495_v5, 6  ;;  %v582_v13 = vrot.slane %v496_v6, 5  ;;  %v579_v17 = vsel %vm544_vm1, %v578_v11, %v493_v3 }
  0x2c   : > { %v584_v14 = vrot.slane %v497_v7, 4  ;;  %v586_v15 = vrot.slane %v498_v8, 3  ;;  %v477_v16 = vld [vmem:[%s5668_s18] sm:$0x1]  ;;  %v588_v18 = vrot.slane %v499_v9, 2  ;;  %v590_v19 = vrot.slane %v500_v10, 1 }
  0x2d   : > { %v478_v20 = vld [vmem:[%s5668_s18 + $0x4] sm:$0x1]  ;;  %v479_v21 = vld [vmem:[%s5668_s18 + $0x8] sm:$0x1]  ;;  %v581_v22 = vsel %vm547_vm2, %v580_v12, %v579_v17  ;;  %v480_v23 = vld [vmem:[%s5668_s18 + $0xc] sm:$0x1] }
  0x2e   : > { %v481_v24 = vld [vmem:[%s5668_s18 + $0x10] sm:$0x1]  ;;  %v482_v25 = vld [vmem:[%s5668_s18 + $0x14] sm:$0x1]  ;;  %v583_v26 = vsel %vm550_vm3, %v582_v13, %v581_v22  ;;  %v483_v27 = vld [vmem:[%s5668_s18 + $0x18] sm:$0x1] }
  0x2f   : > { %v484_v28 = vld [vmem:[%s5668_s18 + $0x1c] sm:$0x1]  ;;  %v543_v29 = vrot.slane %v478_v20, 7  ;;  %v546_v30 = vrot.slane %v479_v21, 6  ;;  %v585_v31 = vsel %vm553_vm4, %v584_v14, %v583_v26  ;;  %v549_v32 = vrot.slane %v480_v23, 5  ;;  %s8219_s4 = sld [smem:[#allocation78_spill]] }
  0x30   : > { %v552_v33 = vrot.slane %v481_v24, 4  ;;  %v555_v34 = vrot.slane %v482_v25, 3  ;;  %v501_v35 = vld [vmem:[%s5668_s18 + $0x60] sm:$0x1]  ;;  %v587_v36 = vsel %vm556_vm5, %v586_v15, %v585_v31  ;;  %v558_v38 = vrot.slane %v483_v27, 2  ;;  %s8221_s5 = sld [smem:[#allocation79_spill]] }
  0x31   : > { %v545_v37 = vsel %vm544_vm1, %v543_v29, %v477_v16  ;;  %v561_v39 = vrot.slane %v484_v28, 1  ;;  %v502_v40 = vld [vmem:[%s5668_s18 + $0x64] sm:$0x1]  ;;  %v503_v41 = vld [vmem:[%s5668_s18 + $0x68] sm:$0x1]  ;;  %v589_v42 = vsel %vm559_vm6, %v588_v18, %v587_v36  ;;  %s8223_s15 = smov 85  }
  0x32   : > { %v548_v43 = vsel %vm547_vm2, %v546_v30, %v545_v37  ;;  %v504_v44 = vld [vmem:[%s5668_s18 + $0x6c] sm:$0x1]  ;;  %v505_v45 = vld [vmem:[%s5668_s18 + $0x70] sm:$0x1]  ;;  %v506_v46 = vld [vmem:[%s5668_s18 + $0x74] sm:$0x1]  ;;  %v591_v47 = vsel %vm562_vm7, %v590_v19, %v589_v42 }
  0x33   : > { %v551_v48 = vsel %vm550_vm3, %v549_v32, %v548_v43  ;;  %v507_v49 = vld [vmem:[%s5668_s18 + $0x78] sm:$0x1]  ;;  %v508_v50 = vld [vmem:[%s5668_s18 + $0x7c] sm:$0x1]  ;;  %v592_v51 = vrot.slane %v502_v40, 7  ;;  %v594_v52 = vrot.slane %v503_v41, 6  ;;  %610 = vrot.lane.b32.xlu1 %v591_v47, %s8041_s20 }
  0x34   : > { %v554_v53 = vsel %vm553_vm4, %v552_v33, %v551_v48  ;;  %v596_v54 = vrot.slane %v504_v44, 5  ;;  %v598_v55 = vrot.slane %v505_v45, 4  ;;  %v600_v56 = vrot.slane %v506_v46, 3  ;;  %v485_v57 = vld [vmem:[%s5668_s18 + $0x20] sm:$0x1]  ;;  %s8224_s2 = sld [smem:[#allocation76_spill]] }
  0x35   : > { %v557_v58 = vsel %vm556_vm5, %v555_v34, %v554_v53  ;;  %v593_v59 = vsel %vm544_vm1, %v592_v51, %v501_v35  ;;  %v602_v60 = vrot.slane %v507_v49, 2  ;;  %v604_v61 = vrot.slane %v508_v50, 1  ;;  %v486_v62 = vld [vmem:[%s5668_s18 + $0x24] sm:$0x1]  ;;  %v487_v63 = vld [vmem:[%s5668_s18 + $0x28] sm:$0x1] }
  0x36   : > { %v560_v1 = vsel %vm559_vm6, %v558_v38, %v557_v58  ;;  %v595_v2 = vsel %vm547_vm2, %v594_v52, %v593_v59  ;;  %v488_v3 = vld [vmem:[%s5668_s18 + $0x2c] sm:$0x1]  ;;  %v489_v4 = vld [vmem:[%s5668_s18 + $0x30] sm:$0x1]  ;;  %v490_v5 = vld [vmem:[%s5668_s18 + $0x34] sm:$0x1] }
  0x37   : > { %v563_v6 = vsel %vm562_vm7, %v561_v39, %v560_v1  ;;  %v597_v7 = vsel %vm550_vm3, %v596_v54, %v595_v2  ;;  %v491_v8 = vld [vmem:[%s5668_s18 + $0x38] sm:$0x1]  ;;  %v492_v9 = vld [vmem:[%s5668_s18 + $0x3c] sm:$0x1]  ;;  %v564_v10 = vrot.slane %v486_v62, 7  ;;  %v566_v11 = vrot.slane %v487_v63, 6 }
  0x38   : > { %606 = vrot.lane.b32.xlu0 %v563_v6, %s8041_s20  ;;  %v599_v12 = vsel %vm553_vm4, %v598_v55, %v597_v7  ;;  %v568_v13 = vrot.slane %v488_v3, 5  ;;  %v570_v14 = vrot.slane %v489_v4, 4  ;;  %v572_v15 = vrot.slane %v490_v5, 3  ;;  %v628_v16 = vld [vmem:[%s5668_s18 + $0x1] sm:$0x1]  ;;  %s8242_s6 = sld [smem:[#allocation80_spill]] }
  0x39   : > { %v601_v17 = vsel %vm556_vm5, %v600_v56, %v599_v12  ;;  %v565_v18 = vsel %vm544_vm1, %v564_v10, %v485_v57  ;;  %v574_v19 = vrot.slane %v491_v8, 2  ;;  %v576_v20 = vrot.slane %v492_v9, 1  ;;  %v629_v21 = vld [vmem:[%s5668_s18 + $0x5] sm:$0x1]  ;;  %v630_v22 = vld [vmem:[%s5668_s18 + $0x9] sm:$0x1] }
  0x3a   : > { %v603_v23 = vsel %vm559_vm6, %v602_v60, %v601_v17  ;;  %v567_v24 = vsel %vm547_vm2, %v566_v11, %v565_v18  ;;  %v631_v25 = vld [vmem:[%s5668_s18 + $0xd] sm:$0x1]  ;;  %v632_v26 = vld [vmem:[%s5668_s18 + $0x11] sm:$0x1]  ;;  %v633_v27 = vld [vmem:[%s5668_s18 + $0x15] sm:$0x1] }
  0x3b   : > { %v605_v28 = vsel %vm562_vm7, %v604_v61, %v603_v23  ;;  %v569_v29 = vsel %vm550_vm3, %v568_v13, %v567_v24  ;;  %v634_v30 = vld [vmem:[%s5668_s18 + $0x19] sm:$0x1]  ;;  %v635_v31 = vld [vmem:[%s5668_s18 + $0x1d] sm:$0x1]  ;;  %v694_v32 = vrot.slane %v629_v21, 7  ;;  %v696_v33 = vrot.slane %v630_v22, 6 }
  0x3c   : > { %612 = vrot.lane.b32.xlu1 %v605_v28, %s8041_s20  ;;  %v571_v34 = vsel %vm553_vm4, %v570_v14, %v569_v29  ;;  %v698_v35 = vrot.slane %v631_v25, 5  ;;  %v700_v36 = vrot.slane %v632_v26, 4  ;;  %v702_v37 = vrot.slane %v633_v27, 3  ;;  %v636_v38 = vld [vmem:[%s5668_s18 + $0x21] sm:$0x1]  ;;  %s8257_s1 = sld [smem:[#allocation75_spill]] }
  0x3d   : > { %v573_v39 = vsel %vm556_vm5, %v572_v15, %v571_v34  ;;  %v695_v40 = vsel %vm544_vm1, %v694_v32, %v628_v16  ;;  %v704_v41 = vrot.slane %v634_v30, 2  ;;  %v706_v42 = vrot.slane %v635_v31, 1  ;;  %v637_v43 = vld [vmem:[%s5668_s18 + $0x25] sm:$0x1]  ;;  %v638_v44 = vld [vmem:[%s5668_s18 + $0x29] sm:$0x1] }
  0x3e   : > { %v575_v45 = vsel %vm559_vm6, %v574_v19, %v573_v39  ;;  %v697_v46 = vsel %vm547_vm2, %v696_v33, %v695_v40  ;;  %v639_v47 = vld [vmem:[%s5668_s18 + $0x2d] sm:$0x1]  ;;  %v640_v48 = vld [vmem:[%s5668_s18 + $0x31] sm:$0x1]  ;;  %v641_v49 = vld [vmem:[%s5668_s18 + $0x35] sm:$0x1] }
  0x3f   : > { %v577_v50 = vsel %vm562_vm7, %v576_v20, %v575_v45  ;;  %v699_v51 = vsel %vm550_vm3, %v698_v35, %v697_v46  ;;  %v642_v52 = vld [vmem:[%s5668_s18 + $0x39] sm:$0x1]  ;;  %v643_v53 = vld [vmem:[%s5668_s18 + $0x3d] sm:$0x1]  ;;  %v708_v54 = vrot.slane %v637_v43, 7  ;;  %v710_v55 = vrot.slane %v638_v44, 6 }
  0x40   : > { %608 = vrot.lane.b32.xlu0 %v577_v50, %s8041_s20  ;;  %v701_v56 = vsel %vm553_vm4, %v700_v36, %v699_v51  ;;  %v712_v57 = vrot.slane %v639_v47, 5  ;;  %v714_v58 = vrot.slane %v640_v48, 4  ;;  %v716_v59 = vrot.slane %v641_v49, 3  ;;  %v644_v60 = vld [vmem:[%s5668_s18 + $0x41] sm:$0x1]  ;;  %s8053_s20 = smov 94  }
  0x41   : > { %v703_v61 = vsel %vm556_vm5, %v702_v37, %v701_v56  ;;  %v709_v62 = vsel %vm544_vm1, %v708_v54, %v636_v38  ;;  %v718_v63 = vrot.slane %v642_v52, 2  ;;  %v720_v1 = vrot.slane %v643_v53, 1  ;;  %v645_v2 = vld [vmem:[%s5668_s18 + $0x45] sm:$0x1]  ;;  %v646_v3 = vld [vmem:[%s5668_s18 + $0x49] sm:$0x1] }
  0x42   : > { %v705_v4 = vsel %vm559_vm6, %v704_v41, %v703_v61  ;;  %v711_v5 = vsel %vm547_vm2, %v710_v55, %v709_v62  ;;  %v647_v6 = vld [vmem:[%s5668_s18 + $0x4d] sm:$0x1]  ;;  %v648_v7 = vld [vmem:[%s5668_s18 + $0x51] sm:$0x1]  ;;  %v649_v8 = vld [vmem:[%s5668_s18 + $0x55] sm:$0x1] }
  0x43   : > { %v707_v9 = vsel %vm562_vm7, %v706_v42, %v705_v4  ;;  %v713_v10 = vsel %vm550_vm3, %v712_v57, %v711_v5  ;;  %v650_v11 = vld [vmem:[%s5668_s18 + $0x59] sm:$0x1]  ;;  %v651_v12 = vld [vmem:[%s5668_s18 + $0x5d] sm:$0x1]  ;;  %v722_v13 = vrot.slane %v645_v2, 7  ;;  %v724_v14 = vrot.slane %v646_v3, 6 }
  0x44   : > { %750 = vrot.lane.b32.xlu1 %v707_v9, %s5451_s21  ;;  %v715_v15 = vsel %vm553_vm4, %v714_v58, %v713_v10  ;;  %v726_v16 = vrot.slane %v647_v6, 5  ;;  %v728_v17 = vrot.slane %v648_v7, 4  ;;  %v730_v18 = vrot.slane %v649_v8, 3  ;;  %v652_v19 = vld [vmem:[%s5668_s18 + $0x61] sm:$0x1]  ;;  %s8258_s24 = smov 33  }
  0x45   : > { %v717_v20 = vsel %vm556_vm5, %v716_v59, %v715_v15  ;;  %v723_v21 = vsel %vm544_vm1, %v722_v13, %v644_v60  ;;  %v732_v22 = vrot.slane %v650_v11, 2  ;;  %v734_v23 = vrot.slane %v651_v12, 1  ;;  %v653_v24 = vld [vmem:[%s5668_s18 + $0x65] sm:$0x1]  ;;  %v654_v25 = vld [vmem:[%s5668_s18 + $0x69] sm:$0x1] }
  0x46   : > { %v719_v26 = vsel %vm559_vm6, %v718_v63, %v717_v20  ;;  %v725_v27 = vsel %vm547_vm2, %v724_v14, %v723_v21  ;;  %v655_v28 = vld [vmem:[%s5668_s18 + $0x6d] sm:$0x1]  ;;  %v656_v29 = vld [vmem:[%s5668_s18 + $0x71] sm:$0x1]  ;;  %v657_v30 = vld [vmem:[%s5668_s18 + $0x75] sm:$0x1] }
  0x47   : > { %v721_v31 = vsel %vm562_vm7, %v720_v1, %v719_v26  ;;  %v727_v32 = vsel %vm550_vm3, %v726_v16, %v725_v27  ;;  %v658_v33 = vld [vmem:[%s5668_s18 + $0x79] sm:$0x1]  ;;  %v659_v34 = vld [vmem:[%s5668_s18 + $0x7d] sm:$0x1]  ;;  %v736_v35 = vrot.slane %v653_v24, 7  ;;  %v738_v36 = vrot.slane %v654_v25, 6 }
  0x48   : > { %752 = vrot.lane.b32.xlu0 %v721_v31, %s5451_s21  ;;  %v729_v37 = vsel %vm553_vm4, %v728_v17, %v727_v32  ;;  %v740_v38 = vrot.slane %v655_v28, 5  ;;  %v742_v39 = vrot.slane %v656_v29, 4  ;;  %v744_v40 = vrot.slane %v657_v30, 3  ;;  %v780_v41 = vld [vmem:[%s5668_s18 + $0x22] sm:$0x1]  ;;  %s8259_s7 = sld [smem:[#allocation81_spill]] }
  0x49   : > { %v731_v42 = vsel %vm556_vm5, %v730_v18, %v729_v37  ;;  %v737_v43 = vsel %vm544_vm1, %v736_v35, %v652_v19  ;;  %v746_v44 = vrot.slane %v658_v33, 2  ;;  %v748_v45 = vrot.slane %v659_v34, 1  ;;  %v781_v46 = vld [vmem:[%s5668_s18 + $0x26] sm:$0x1]  ;;  %v782_v47 = vld [vmem:[%s5668_s18 + $0x2a] sm:$0x1] }
  0x4a   : > { %v733_v48 = vsel %vm559_vm6, %v732_v22, %v731_v42  ;;  %v739_v49 = vsel %vm547_vm2, %v738_v36, %v737_v43  ;;  %v783_v50 = vld [vmem:[%s5668_s18 + $0x2e] sm:$0x1]  ;;  %v784_v51 = vld [vmem:[%s5668_s18 + $0x32] sm:$0x1]  ;;  %v785_v52 = vld [vmem:[%s5668_s18 + $0x36] sm:$0x1] }
  0x4b   : > { %v735_v53 = vsel %vm562_vm7, %v734_v23, %v733_v48  ;;  %v741_v54 = vsel %vm550_vm3, %v740_v38, %v739_v49  ;;  %v786_v55 = vld [vmem:[%s5668_s18 + $0x3a] sm:$0x1]  ;;  %v787_v56 = vld [vmem:[%s5668_s18 + $0x3e] sm:$0x1]  ;;  %v852_v57 = vrot.slane %v781_v46, 7  ;;  %v854_v58 = vrot.slane %v782_v47, 6 }
  0x4c   : > { %754 = vrot.lane.b32.xlu1 %v735_v53, %s5451_s21  ;;  %v743_v59 = vsel %vm553_vm4, %v742_v39, %v741_v54  ;;  %v856_v60 = vrot.slane %v783_v50, 5  ;;  %v858_v61 = vrot.slane %v784_v51, 4  ;;  %v860_v62 = vrot.slane %v785_v52, 3  ;;  %v772_v63 = vld [vmem:[%s5668_s18 + $0x2] sm:$0x1]  ;;  %s8260_s8 = sld [smem:[#allocation82_spill]] }
  0x4d   : > { %v745_v1 = vsel %vm556_vm5, %v744_v40, %v743_v59  ;;  %v853_v2 = vsel %vm544_vm1, %v852_v57, %v780_v41  ;;  %v862_v3 = vrot.slane %v786_v55, 2  ;;  %v864_v4 = vrot.slane %v787_v56, 1  ;;  %v773_v5 = vld [vmem:[%s5668_s18 + $0x6] sm:$0x1]  ;;  %v774_v6 = vld [vmem:[%s5668_s18 + $0xa] sm:$0x1] }
  0x4e   : > { %v747_v7 = vsel %vm559_vm6, %v746_v44, %v745_v1  ;;  %v855_v8 = vsel %vm547_vm2, %v854_v58, %v853_v2  ;;  %v775_v9 = vld [vmem:[%s5668_s18 + $0xe] sm:$0x1]  ;;  %v776_v10 = vld [vmem:[%s5668_s18 + $0x12] sm:$0x1]  ;;  %v777_v11 = vld [vmem:[%s5668_s18 + $0x16] sm:$0x1] }
  0x4f   : > { %v749_v12 = vsel %vm562_vm7, %v748_v45, %v747_v7  ;;  %v857_v13 = vsel %vm550_vm3, %v856_v60, %v855_v8  ;;  %v778_v14 = vld [vmem:[%s5668_s18 + $0x1a] sm:$0x1]  ;;  %v779_v15 = vld [vmem:[%s5668_s18 + $0x1e] sm:$0x1]  ;;  %v838_v16 = vrot.slane %v773_v5, 7  ;;  %v840_v17 = vrot.slane %v774_v6, 6 }
  0x50   : > { %756 = vrot.lane.b32.xlu0 %v749_v12, %s5451_s21  ;;  %v859_v18 = vsel %vm553_vm4, %v858_v61, %v857_v13  ;;  %v842_v19 = vrot.slane %v775_v9, 5  ;;  %v844_v20 = vrot.slane %v776_v10, 4  ;;  %v846_v21 = vrot.slane %v777_v11, 3  ;;  %v796_v22 = vld [vmem:[%s5668_s18 + $0x62] sm:$0x1]  ;;  %s8049_s21 = smov 96  }
  0x51   : > { %v861_v23 = vsel %vm556_vm5, %v860_v62, %v859_v18  ;;  %v839_v24 = vsel %vm544_vm1, %v838_v16, %v772_v63  ;;  %v848_v25 = vrot.slane %v778_v14, 2  ;;  %v850_v26 = vrot.slane %v779_v15, 1  ;;  %v797_v27 = vld [vmem:[%s5668_s18 + $0x66] sm:$0x1]  ;;  %v798_v28 = vld [vmem:[%s5668_s18 + $0x6a] sm:$0x1] }
  0x52   : > { %v863_v29 = vsel %vm559_vm6, %v862_v3, %v861_v23  ;;  %v841_v30 = vsel %vm547_vm2, %v840_v17, %v839_v24  ;;  %v799_v31 = vld [vmem:[%s5668_s18 + $0x6e] sm:$0x1]  ;;  %v800_v32 = vld [vmem:[%s5668_s18 + $0x72] sm:$0x1]  ;;  %v801_v33 = vld [vmem:[%s5668_s18 + $0x76] sm:$0x1] }
  0x53   : > { %v865_v34 = vsel %vm562_vm7, %v864_v4, %v863_v29  ;;  %v843_v35 = vsel %vm550_vm3, %v842_v19, %v841_v30  ;;  %v802_v36 = vld [vmem:[%s5668_s18 + $0x7a] sm:$0x1]  ;;  %v803_v37 = vld [vmem:[%s5668_s18 + $0x7e] sm:$0x1]  ;;  %v880_v38 = vrot.slane %v797_v27, 7  ;;  %v882_v39 = vrot.slane %v798_v28, 6 }
  0x54   : > { %896 = vrot.lane.b32.xlu1 %v865_v34, %s5452_s25  ;;  %v845_v40 = vsel %vm553_vm4, %v844_v20, %v843_v35  ;;  %v884_v41 = vrot.slane %v799_v31, 5  ;;  %v886_v42 = vrot.slane %v800_v32, 4  ;;  %v888_v43 = vrot.slane %v801_v33, 3  ;;  %v788_v44 = vld [vmem:[%s5668_s18 + $0x42] sm:$0x1]  ;;  %s8161_s29 = smov 121  }
  0x55   : > { %v847_v45 = vsel %vm556_vm5, %v846_v21, %v845_v40  ;;  %v881_v46 = vsel %vm544_vm1, %v880_v38, %v796_v22  ;;  %v890_v47 = vrot.slane %v802_v36, 2  ;;  %v892_v48 = vrot.slane %v803_v37, 1  ;;  %v789_v49 = vld [vmem:[%s5668_s18 + $0x46] sm:$0x1]  ;;  %v790_v50 = vld [vmem:[%s5668_s18 + $0x4a] sm:$0x1] }
  0x56   : > { %v849_v51 = vsel %vm559_vm6, %v848_v25, %v847_v45  ;;  %v883_v52 = vsel %vm547_vm2, %v882_v39, %v881_v46  ;;  %v791_v53 = vld [vmem:[%s5668_s18 + $0x4e] sm:$0x1]  ;;  %v792_v54 = vld [vmem:[%s5668_s18 + $0x52] sm:$0x1]  ;;  %v793_v55 = vld [vmem:[%s5668_s18 + $0x56] sm:$0x1] }
  0x57   : > { %v851_v56 = vsel %vm562_vm7, %v850_v26, %v849_v51  ;;  %v885_v57 = vsel %vm550_vm3, %v884_v41, %v883_v52  ;;  %v794_v58 = vld [vmem:[%s5668_s18 + $0x5a] sm:$0x1]  ;;  %v795_v59 = vld [vmem:[%s5668_s18 + $0x5e] sm:$0x1]  ;;  %v866_v60 = vrot.slane %v789_v49, 7  ;;  %v868_v61 = vrot.slane %v790_v50, 6 }
  0x58   : > { %894 = vrot.lane.b32.xlu0 %v851_v56, %s5452_s25  ;;  %v887_v62 = vsel %vm553_vm4, %v886_v42, %v885_v57  ;;  %v870_v63 = vrot.slane %v791_v53, 5  ;;  %v872_v1 = vrot.slane %v792_v54, 4  ;;  %v874_v2 = vrot.slane %v793_v55, 3  ;;  %v916_v3 = vld [vmem:[%s5668_s18 + $0x3] sm:$0x1]  ;;  %s8183_s16 = smov 66  }
  0x59   : > { %v889_v4 = vsel %vm556_vm5, %v888_v43, %v887_v62  ;;  %v867_v5 = vsel %vm544_vm1, %v866_v60, %v788_v44  ;;  %v876_v6 = vrot.slane %v794_v58, 2  ;;  %v878_v7 = vrot.slane %v795_v59, 1  ;;  %v917_v8 = vld [vmem:[%s5668_s18 + $0x7] sm:$0x1]  ;;  %v918_v9 = vld [vmem:[%s5668_s18 + $0xb] sm:$0x1] }
  0x5a   : > { %v891_v10 = vsel %vm559_vm6, %v890_v47, %v889_v4  ;;  %v869_v11 = vsel %vm547_vm2, %v868_v61, %v867_v5  ;;  %v919_v12 = vld [vmem:[%s5668_s18 + $0xf] sm:$0x1]  ;;  %v920_v13 = vld [vmem:[%s5668_s18 + $0x13] sm:$0x1]  ;;  %v921_v14 = vld [vmem:[%s5668_s18 + $0x17] sm:$0x1] }
  0x5b   : > { %v893_v15 = vsel %vm562_vm7, %v892_v48, %v891_v10  ;;  %v871_v16 = vsel %vm550_vm3, %v870_v63, %v869_v11  ;;  %v922_v17 = vld [vmem:[%s5668_s18 + $0x1b] sm:$0x1]  ;;  %v923_v18 = vld [vmem:[%s5668_s18 + $0x1f] sm:$0x1]  ;;  %v982_v19 = vrot.slane %v917_v8, 7  ;;  %v984_v20 = vrot.slane %v918_v9, 6 }
  0x5c   : > { %900 = vrot.lane.b32.xlu1 %v893_v15, %s5452_s25  ;;  %v873_v21 = vsel %vm553_vm4, %v872_v1, %v871_v16  ;;  %v986_v22 = vrot.slane %v919_v12, 5  ;;  %v988_v23 = vrot.slane %v920_v13, 4  ;;  %v990_v24 = vrot.slane %v921_v14, 3  ;;  %v932_v29 = vld [vmem:[%s5668_s18 + $0x43] sm:$0x1]  ;;  %s8171_s19 = smov 117  }
  0x5d   : > { %v875_v25 = vsel %vm556_vm5, %v874_v2, %v873_v21  ;;  %v983_v26 = vsel %vm544_vm1, %v982_v19, %v916_v3  ;;  %v992_v27 = vrot.slane %v922_v17, 2  ;;  %v994_v28 = vrot.slane %v923_v18, 1  ;;  %v933_v30 = vld [vmem:[%s5668_s18 + $0x47] sm:$0x1]  ;;  %v934_v33 = vld [vmem:[%s5668_s18 + $0x4b] sm:$0x1] }
  0x5e   : > { %v877_v31 = vsel %vm559_vm6, %v876_v6, %v875_v25  ;;  %v985_v32 = vsel %vm547_vm2, %v984_v20, %v983_v26  ;;  %v935_v34 = vld [vmem:[%s5668_s18 + $0x4f] sm:$0x1]  ;;  %v936_v35 = vld [vmem:[%s5668_s18 + $0x53] sm:$0x1]  ;;  %v804_v38 = vld [vmem:[%s5668_s18 + $0x82] sm:$0x1] }
  0x5f   : > { %v879_v36 = vsel %vm562_vm7, %v878_v7, %v877_v31  ;;  %v987_v37 = vsel %vm550_vm3, %v986_v22, %v985_v32  ;;  %v937_v39 = vld [vmem:[%s5668_s18 + $0x57] sm:$0x1]  ;;  %v938_v40 = vld [vmem:[%s5668_s18 + $0x5b] sm:$0x1]  ;;  %v939_v41 = vld [vmem:[%s5668_s18 + $0x5f] sm:$0x1] }
  0x60   : > { %898 = vrot.lane.b32.xlu0 %v879_v36, %s5452_s25  ;;  %v989_v42 = vsel %vm553_vm4, %v988_v23, %v987_v37  ;;  %v1010_v43 = vrot.slane %v933_v30, 7  ;;  %v1012_v44 = vrot.slane %v934_v33, 6  ;;  %v1014_v45 = vrot.slane %v935_v34, 5  ;;  %v924_v46 = vld [vmem:[%s5668_s18 + $0x23] sm:$0x1]  ;;  %v1065_v33 = vld [vmem:[#allocation2 + $0x28] sm:$0xff] }
  0x61   : > { %v991_v47 = vsel %vm556_vm5, %v990_v24, %v989_v42  ;;  %v1016_v48 = vrot.slane %v936_v35, 4  ;;  %v1018_v49 = vrot.slane %v937_v39, 3  ;;  %v1020_v50 = vrot.slane %v938_v40, 2  ;;  %v925_v51 = vld [vmem:[%s5668_s18 + $0x27] sm:$0x1]  ;;  %s8167_s22 = smov 113  }
  0x62   : > { %v993_v52 = vsel %vm559_vm6, %v992_v27, %v991_v47  ;;  %v1011_v53 = vsel %vm544_vm1, %v1010_v43, %v932_v29  ;;  %v1022_v54 = vrot.slane %v939_v41, 1  ;;  %v926_v55 = vld [vmem:[%s5668_s18 + $0x2b] sm:$0x1]  ;;  %v927_v56 = vld [vmem:[%s5668_s18 + $0x2f] sm:$0x1]  ;;  %v996_v57 = vrot.slane %v925_v51, 7 }
  0x63   : > { %v995_v58 = vsel %vm562_vm7, %v994_v28, %v993_v52  ;;  %v1013_v59 = vsel %vm547_vm2, %v1012_v44, %v1011_v53  ;;  %v928_v60 = vld [vmem:[%s5668_s18 + $0x33] sm:$0x1]  ;;  %v929_v61 = vld [vmem:[%s5668_s18 + $0x37] sm:$0x1]  ;;  %v930_v62 = vld [vmem:[%s5668_s18 + $0x3b] sm:$0x1]  ;;  %v4858_v40 = vpack.c.bf16 %v1065_v33, %v1065_v33 }
  0x64   : > { %1038 = vrot.lane.b32.xlu1 %v995_v58, %s5453_s26  ;;  %902 = vrot.lane.b32.xlu0 %v804_v38, %s5452_s25  ;;  %v1015_v63 = vsel %vm550_vm3, %v1014_v45, %v1013_v59  ;;  %v931_v1 = vld [vmem:[%s5668_s18 + $0x3f] sm:$0x1]  ;;  %v997_v2 = vsel %vm544_vm1, %v996_v57, %v924_v46  ;;  %v998_v3 = vrot.slane %v926_v55, 6  ;;  %v1000_v4 = vrot.slane %v927_v56, 5  ;;  %v940_v8 = vld [vmem:[%s5668_s18 + $0x63] sm:$0x1] }
  0x65   : > { %v1017_v5 = vsel %vm553_vm4, %v1016_v48, %v1015_v63  ;;  %v1002_v6 = vrot.slane %v928_v60, 4  ;;  %v1004_v7 = vrot.slane %v929_v61, 3  ;;  %v1006_v11 = vrot.slane %v930_v62, 2  ;;  %v941_v13 = vld [vmem:[%s5668_s18 + $0x67] sm:$0x1]  ;;  %s8051_s25 = smov 95  }
  0x66   : > { %v1019_v9 = vsel %vm556_vm5, %v1018_v49, %v1017_v5  ;;  %v999_v10 = vsel %vm547_vm2, %v998_v3, %v997_v2  ;;  %v1008_v12 = vrot.slane %v931_v1, 1  ;;  %v942_v14 = vld [vmem:[%s5668_s18 + $0x6b] sm:$0x1]  ;;  %v943_v17 = vld [vmem:[%s5668_s18 + $0x6f] sm:$0x1]  ;;  %v1024_v23 = vrot.slane %v941_v13, 7 }
  0x67   : > { %v1021_v15 = vsel %vm559_vm6, %v1020_v50, %v1019_v9  ;;  %v1001_v16 = vsel %vm550_vm3, %v1000_v4, %v999_v10  ;;  %v944_v18 = vld [vmem:[%s5668_s18 + $0x73] sm:$0x1]  ;;  %v945_v19 = vld [vmem:[%s5668_s18 + $0x77] sm:$0x1]  ;;  %v946_v22 = vld [vmem:[%s5668_s18 + $0x7b] sm:$0x1] }
  0x68   : > { %v1023_v20 = vsel %vm562_vm7, %v1022_v54, %v1021_v15  ;;  %v1003_v21 = vsel %vm553_vm4, %v1002_v6, %v1001_v16  ;;  %v1026_v24 = vrot.slane %v942_v14, 6  ;;  %v947_v26 = vld [vmem:[%s5668_s18 + $0x7f] sm:$0x1]  ;;  %v1028_v27 = vrot.slane %v943_v17, 5  ;;  %v948_v30 = vld [vmem:[%s5668_s18 + $0x83] sm:$0x1] }
  0x69   : > { %1042 = vrot.lane.b32.xlu1 %v1023_v20, %s5453_s26  ;;  %v1005_v25 = vsel %vm556_vm5, %v1004_v7, %v1003_v21  ;;  %v1030_v28 = vrot.slane %v944_v18, 4  ;;  %v1025_v31 = vsel %vm544_vm1, %v1024_v23, %v940_v8  ;;  %v1032_v32 = vrot.slane %v945_v19, 3  ;;  %s8047_s18 = smov 104   ;;  %v1832_v23 = vld [vmem:[%s8219_s4] sm:$0xff] }
  0x6a   : > { %v1007_v29 = vsel %vm559_vm6, %v1006_v11, %v1005_v25  ;;  %v1027_v35 = vsel %vm547_vm2, %v1026_v24, %v1025_v31  ;;  %v1034_v36 = vrot.slane %v946_v22, 2  ;;  %v1036_v38 = vrot.slane %v947_v26, 1  ;;  %v1552_v22 = vld [vmem:[%s8218_s3 + $0x8] sm:$0xff]  ;;  %v6006_v24 = vld [vmem:[%s8221_s5] sm:$0xff] }
  0x6b   : > { %v1009_v34 = vsel %vm562_vm7, %v1008_v12, %v1007_v29  ;;  %v1029_v37 = vsel %vm550_vm3, %v1028_v27, %v1027_v35  ;;  %v8118_v58 = vmov 3   ;;  %v8129_v17 = vmov 0   ;;  %v6020_v27 = vld [vmem:[%s8221_s5 + $0x8] sm:$0xff] }
  0x6c   : > { %1040 = vrot.lane.b32.xlu0 %v1009_v34, %s5453_s26  ;;  %v1031_v39 = vsel %vm553_vm4, %v1030_v28, %v1029_v37  ;;  %1789 = vmatprep.subr.bf16.mxu1 %v8129_v17  ;;  %v8155_v25 = vmov 1   ;;  %v8153_v26 = vmov 2   ;;  %v5358_v28 = vld [vmem:[%s8224_s2 + $0x4] ss:$16 sps:$4 sm:$0xff]   ;;  %v8151_v29 = vmov 4  }
  0x6d   : > { %1046 = vrot.lane.b32.xlu1 %v948_v30, %s5453_s26  ;;  %v1033_v41 = vsel %vm556_vm5, %v1032_v32, %v1031_v39  ;;  %5155 = vset.pattern.permute.xlu0 %v8118_v58  ;;  %v8149_v30 = vmov 5   ;;  %v8147_v32 = vmov 6   ;;  %v8080_v39 = vmov 8  }
  0x6e   : > { %v1035_v42 = vsel %vm559_vm6, %v1034_v36, %v1033_v41  ;;  %5152 = vset.pattern.permute.xlu1 %v8129_v17  ;;  %1780 = vmatprep.mubr.bf16.mxu0 %v5358_v28  ;;  %v8117_v36 = vmov 7   ;;  %vm1744_vm1 = vcmask 392192   ;;  %v8121_v28 = vmov 21  }
  0x6f   : > { %v1037_v43 = vsel %vm562_vm7, %v1036_v38, %v1035_v42  ;;  %v8131_v42 = vmov 9   ;;  %vm1864_vm4 = vcmask 597256  }
  0x70   : > { %1044 = vrot.lane.b32.xlu0 %v1037_v43, %s5453_s26  ;;  %s8060_s26 = smov 85  }
  0x71   : > { %1094 = vrot.lane.b32.xlu1 %v4858_v40, %s8043_s27  ;;  %s8045_s27 = smov 84  }
  0x75   : > { %1143 = vrot.lane.b32.xlu1 %v4858_v40, %s8055_s28 }
  0x79   : > { %1191 = vrot.lane.b32.xlu1 %v4858_v40, %s8047_s18 }
  0x7d   : > { %1239 = vrot.lane.b32.xlu1 %v4858_v40, %s8049_s21 }
  0x81   : > { %1287 = vrot.lane.b32.xlu1 %v4858_v40, %s8051_s25 }
  0x85   : > { %1335 = vrot.lane.b32.xlu1 %v4858_v40, %s8053_s20 }
  0x89   : > { %1383 = vrot.lane.b32.xlu1 %v4858_v40, %s8057_s0 }
  0x8d   : > { %1431 = vrot.lane.b32.xlu1 %v4858_v40, %s8060_s26 }
  0x91   : > { %1479 = vrot.lane.b32.xlu1 %v4858_v40, %s8045_s27  ;;  %s8213_s27 = smov 106  }
  0x9b   : > { %v615_v44 = vpop.permute.xlu0 %614  ;;  %v759_v45 = vpop.permute.xlu1 %758 }
  0x9c   : > { %627 = vst.msk [vmem:[#allocation2 + $0x20] sm:$0x1] %vm626_vm8, %v615_v44 }
  0x9d   : > { %771 = vst.msk [vmem:[#allocation2 + $0x20] sm:$0x1] %vm770_vm9, %v759_v45  ;;  %v5368_v45 = vld [vmem:[%s8224_s2 + $0xc] ss:$16 sps:$4 sm:$0xff]   ;;  %vm5528_vm9 = vmmov 0  }
  0x9e   : > { %4778 = vmatprep.mubr.msk.bf16.mxu1 %vm1744_vm1, %v5368_v45 }
  0xa5   : > { %v611_v46 = vpop.permute.xlu1 %610 }
  0xa6   : > { %624 = vst.msk [vmem:[#allocation2 + $0x10] sm:$0xff] %vm621_vm10, %v611_v46  ;;  %v8127_v46 = vmov 10  }
  0xaa   : > { %v607_v47 = vpop.permute.xlu0 %606 }
  0xab   : > { %622 = vst.msk [vmem:[#allocation2] sm:$0xff] %vm621_vm10, %v607_v47 }
  0xae   : > { %v613_v48 = vpop.permute.xlu1 %612 }
  0xaf   : > { %625 = vst.msk [vmem:[#allocation2 + $0x18] sm:$0xff] %vm621_vm10, %v613_v48 }
  0xb2   : > { %v609_v49 = vpop.permute.xlu0 %608 }
  0xb3   : > { %623 = vst.msk [vmem:[#allocation2 + $0x8] sm:$0xff] %vm621_vm10, %v609_v49  ;;  %vm4038_vm10 = vcmask 523264  }
  0xb6   : > { %v751_v50 = vpop.permute.xlu1 %750 }
  0xb7   : > { %766 = vst.msk [vmem:[#allocation2] sm:$0xff] %vm765_vm11, %v751_v50 }
  0xba   : > { %v753_v51 = vpop.permute.xlu0 %752 }
  0xbb   : > { %767 = vst.msk [vmem:[#allocation2 + $0x8] sm:$0xff] %vm765_vm11, %v753_v51  ;;  %v8145_v51 = vmov 11  }
  0xbe   : > { %v755_v52 = vpop.permute.xlu1 %754 }
  0xbf   : > { %768 = vst.msk [vmem:[#allocation2 + $0x10] sm:$0xff] %vm765_vm11, %v755_v52 }
  0xc2   : > { %v757_v53 = vpop.permute.xlu0 %756 }
  0xc3   : > { %769 = vst.msk [vmem:[#allocation2 + $0x18] sm:$0xff] %vm765_vm11, %v757_v53 }
  0xc6   : > { %v897_v54 = vpop.permute.xlu1 %896 }
  0xc7   : > { %911 = vst.msk [vmem:[#allocation2 + $0x8] sm:$0xff] %vm909_vm12, %v897_v54  ;;  %v8078_v54 = vmov 12  }
  0xca   : > { %v895_v55 = vpop.permute.xlu0 %894 }
  0xcb   : > { %910 = vst.msk [vmem:[#allocation2] sm:$0xff] %vm909_vm12, %v895_v55 }
  0xce   : > { %v901_v56 = vpop.permute.xlu1 %900 }
  0xcf   : > { %913 = vst.msk [vmem:[#allocation2 + $0x18] sm:$0xff] %vm909_vm12, %v901_v56 }
  0xd2   : > { %v899_v57 = vpop.permute.xlu0 %898 }
  0xd3   : > { %912 = vst.msk [vmem:[#allocation2 + $0x10] sm:$0xff] %vm909_vm12, %v899_v57  ;;  %v8109_v57 = vmov 13   ;;  %vm4101_vm12 = vcmask 326656  }
  0xd6   : > { %v1039_v59 = vpop.permute.xlu1 %1038  ;;  %v903_v60 = vpop.permute.xlu0 %902 }
  0xd7   : > { %1054 = vst.msk [vmem:[#allocation2] sm:$0xff] %vm1053_vm13, %v1039_v59 }
  0xd8   : > { %915 = vst.msk [vmem:[#allocation2 + $0x20] sm:$0x1] %vm914_vm14, %v903_v60 }
  0xdb   : > { %v1043_v61 = vpop.permute.xlu1 %1042 }
  0xdc   : > { %1056 = vst.msk [vmem:[#allocation2 + $0x10] sm:$0xff] %vm1053_vm13, %v1043_v61 }
  0xde   : > { %v1041_v62 = vpop.permute.xlu0 %1040  ;;  %v1060_v18 = vld [vmem:[#allocation2] sm:$0xff] }
  0xdf   : > { %1055 = vst.msk [vmem:[#allocation2 + $0x8] sm:$0xff] %vm1053_vm13, %v1041_v62  ;;  %v1047_v63 = vpop.permute.xlu1 %1046  ;;  %v4853_v19 = vpack.c.bf16 %v1060_v18, %v1060_v18 }
  0xe0   : > { %1059 = vst.msk [vmem:[#allocation2 + $0x20] sm:$0x1] %vm1058_vm15, %v1047_v63 }
  0xe2   : > { %v1045_v1 = vpop.permute.xlu0 %1044 }
  0xe3   : > { %v1095_v2 = vpop.permute.xlu1 %1094  ;;  %1057 = vst.msk [vmem:[#allocation2 + $0x18] sm:$0xff] %vm1053_vm13, %v1045_v1  ;;  %v1062_v20 = vld [vmem:[#allocation2 + $0x10] sm:$0xff]  ;;  %v8125_v1 = vmov 14  }
  0xe4   : > { %1108 = vst.msk [vmem:[#allocation4 + $0x14] sm:$0xf] %vm1102_vm0, %v1095_v2  ;;  %v4855_v21 = vpack.c.bf16 %v1062_v20, %v1062_v20 }
  0xe6   : > { %v1061_v3 = vld [vmem:[#allocation2 + $0x8] sm:$0xff] }
  0xe7   : > { %v4854_v4 = vpack.c.bf16 %v1061_v3, %v1061_v3  ;;  %v1064_v5 = vld [vmem:[#allocation2 + $0x20] sm:$0xff]  ;;  %v1144_v6 = vpop.permute.xlu1 %1143 }
  0xe8   : > { %v4857_v7 = vpack.c.bf16 %v1064_v5, %v1064_v5  ;;  %1156 = vst.msk [vmem:[#allocation4 + $0x2c] sm:$0xf] %vm1102_vm0, %v1144_v6 }
  0xe9   : > { %1086 = vrot.lane.b32.xlu1 %v4854_v4, %s8213_s27 }
  0xea   : > { %1092 = vrot.lane.b32.xlu0 %v4857_v7, %s8213_s27  ;;  %v1063_v8 = vld [vmem:[#allocation2 + $0x18] sm:$0xff] }
  0xeb   : > { %v1192_v9 = vpop.permute.xlu1 %1191  ;;  %v4856_v10 = vpack.c.bf16 %v1063_v8, %v1063_v8 }
  0xec   : > { %1204 = vst.msk [vmem:[#allocation4 + $0x44] sm:$0xf] %vm1102_vm0, %v1192_v9 }
  0xed   : > { %1090 = vrot.lane.b32.xlu1 %v4856_v10, %s8213_s27 }
  0xee   : > { %1141 = vrot.lane.b32.xlu0 %v4857_v7, %s8055_s28 }
  0xef   : > { %v1240_v11 = vpop.permute.xlu1 %1239 }
  0xf0   : > { %1252 = vst.msk [vmem:[#allocation4 + $0x5c] sm:$0xf] %vm1102_vm0, %v1240_v11 }
  0xf1   : > { %1135 = vrot.lane.b32.xlu1 %v4854_v4, %s8055_s28 }
  0xf2   : > { %1189 = vrot.lane.b32.xlu0 %v4857_v7, %s8047_s18 }
  0xf3   : > { %v1288_v12 = vpop.permute.xlu1 %1287 }
  0xf4   : > { %1300 = vst.msk [vmem:[#allocation4 + $0x74] sm:$0xf] %vm1102_vm0, %v1288_v12 }
  0xf5   : > { %1139 = vrot.lane.b32.xlu1 %v4856_v10, %s8055_s28 }
  0xf6   : > { %1237 = vrot.lane.b32.xlu0 %v4857_v7, %s8049_s21 }
  0xf7   : > { %v1336_v13 = vpop.permute.xlu1 %1335 }
  0xf8   : > { %1348 = vst.msk [vmem:[#allocation4 + $0x8c] sm:$0xf] %vm1102_vm0, %v1336_v13 }
  0xf9   : > { %1183 = vrot.lane.b32.xlu1 %v4854_v4, %s8047_s18 }
  0xfa   : > { %1285 = vrot.lane.b32.xlu0 %v4857_v7, %s8051_s25 }
  0xfb   : > { %v1384_v14 = vpop.permute.xlu1 %1383 }
  0xfc   : > { %1396 = vst.msk [vmem:[#allocation4 + $0xa4] sm:$0xf] %vm1102_vm0, %v1384_v14 }
  0xfd   : > { %1187 = vrot.lane.b32.xlu1 %v4856_v10, %s8047_s18  ;;  %s8214_s18 = smov 84  }
  0xfe   : > { %1333 = vrot.lane.b32.xlu0 %v4857_v7, %s8053_s20 }
  0xff   : > { %v1432_v15 = vpop.permute.xlu1 %1431 }
 0x100   : > { %1444 = vst.msk [vmem:[#allocation4 + $0xbc] sm:$0xf] %vm1102_vm0, %v1432_v15  ;;  %v8100_v15 = vmov 18  }
 0x101   : > { %1231 = vrot.lane.b32.xlu1 %v4854_v4, %s8049_s21 }
 0x102   : > { %1381 = vrot.lane.b32.xlu0 %v4857_v7, %s8057_s0 }
 0x103   : > { %v1480_v16 = vpop.permute.xlu1 %1479 }
 0x104   : > { %1492 = vst.msk [vmem:[#allocation4 + $0xd4] sm:$0xf] %vm1102_vm0, %v1480_v16 }
 0x105   : > { %1235 = vrot.lane.b32.xlu1 %v4856_v10, %s8049_s21  ;;  %s8215_s21 = smov 104  }
 0x106   : > { %1429 = vrot.lane.b32.xlu0 %v4857_v7, %s8060_s26 }
 0x109   : > { %1279 = vrot.lane.b32.xlu1 %v4854_v4, %s8051_s25 }
 0x10a   : > { %1477 = vrot.lane.b32.xlu0 %v4857_v7, %s8214_s18  ;;  %v8073_v7 = vmov 16  }
 0x10d   : > { %1283 = vrot.lane.b32.xlu1 %v4856_v10, %s8051_s25  ;;  %s8216_s25 = smov 96  }
 0x10e   : > { %1084 = vrot.lane.b32.xlu0 %v4853_v19, %s8213_s27 }
 0x111   : > { %1327 = vrot.lane.b32.xlu1 %v4854_v4, %s8053_s20 }
 0x112   : > { %1088 = vrot.lane.b32.xlu0 %v4855_v21, %s8213_s27 }
 0x115   : > { %1331 = vrot.lane.b32.xlu1 %v4856_v10, %s8053_s20  ;;  %s8217_s20 = smov 95  }
 0x116   : > { %1133 = vrot.lane.b32.xlu0 %v4853_v19, %s8055_s28 }
 0x119   : > { %1375 = vrot.lane.b32.xlu1 %v4854_v4, %s8057_s0 }
 0x11a   : > { %1137 = vrot.lane.b32.xlu0 %v4855_v21, %s8055_s28  ;;  %s8169_s28 = smov 99  }
 0x11d   : > { %1379 = vrot.lane.b32.xlu1 %v4856_v10, %s8057_s0  ;;  %s8222_s0 = smov 86  }
 0x11e   : > { %1181 = vrot.lane.b32.xlu0 %v4853_v19, %s8215_s21 }
 0x121   : > { %1423 = vrot.lane.b32.xlu1 %v4854_v4, %s8060_s26 }
 0x122   : > { %1185 = vrot.lane.b32.xlu0 %v4855_v21, %s8215_s21 }
 0x125   : > { %1427 = vrot.lane.b32.xlu1 %v4856_v10, %s8060_s26  ;;  %s8220_s26 = smov 94  }
 0x126   : > { %1229 = vrot.lane.b32.xlu0 %v4853_v19, %s8216_s25 }
 0x129   : > { %1471 = vrot.lane.b32.xlu1 %v4854_v4, %s8214_s18  ;;  %v8143_v4 = vmov 15  }
 0x12a   : > { %1233 = vrot.lane.b32.xlu0 %v4855_v21, %s8216_s25 }
 0x12d   : > { %1475 = vrot.lane.b32.xlu1 %v4856_v10, %s8214_s18  ;;  %v8123_v10 = vmov 17  }
 0x12e   : > { %1277 = vrot.lane.b32.xlu0 %v4853_v19, %s8217_s20 }
 0x131   : > { %1560 = vperm.xlu1 %5152, %v1552_v22   ;;  %v8076_v22 = vmov 20  }
 0x132   : > { %1281 = vrot.lane.b32.xlu0 %v4855_v21, %s8217_s20 }
 0x135   : > { %1836 = vperm.xlu1 %5152, %v1832_v23  }
 0x136   : > { %1325 = vrot.lane.b32.xlu0 %v4853_v19, %s8220_s26 }
 0x139   : > { %1873 = vperm.xlu1 %5152, %v6006_v24  }
 0x13a   : > { %1329 = vrot.lane.b32.xlu0 %v4855_v21, %s8220_s26 }
 0x13d   : > { %5153 = vset.pattern.permute.xlu1 %v8155_v25 }
 0x13e   : > { %1373 = vrot.lane.b32.xlu0 %v4853_v19, %s8222_s0  ;;  %1886 = vperm.xlu1 %5153, %v6006_v24  }
 0x142   : > { %1377 = vrot.lane.b32.xlu0 %v4855_v21, %s8222_s0  ;;  %5154 = vset.pattern.permute.xlu1 %v8153_v26 }
 0x143   : > { %1898 = vperm.xlu1 %5154, %v6006_v24  }
 0x146   : > { %1421 = vrot.lane.b32.xlu0 %v4853_v19, %s8223_s15 }
 0x147   : > { %1902 = vperm.xlu1 %5154, %v6020_v27  }
 0x14a   : > { %1425 = vrot.lane.b32.xlu0 %v4855_v21, %s8223_s15 }
 0x14b   : > { %5156 = vset.pattern.permute.xlu1 %v8118_v58 }
 0x14c   : > { %1914 = vperm.xlu1 %5156, %v6020_v27  }
 0x14e   : > { %1469 = vrot.lane.b32.xlu0 %v4853_v19, %s8214_s18  ;;  %v8116_v19 = vmov 19  }
 0x150   : > { %5157 = vset.pattern.permute.xlu1 %v8151_v29 }
 0x151   : > { %1922 = vperm.xlu1 %5157, %v6006_v24  }
 0x152   : > { %1473 = vrot.lane.b32.xlu0 %v4855_v21, %s8214_s18 }
 0x155   : > { %5160 = vset.pattern.permute.xlu1 %v8149_v30 }
 0x156   : > { %1910 = vperm.xlu0 %5155, %v6006_v24   ;;  %1946 = vperm.xlu1 %5160, %v6020_v27  }
 0x15a   : > { %5158 = vset.pattern.permute.xlu0 %v8151_v29  ;;  %5161 = vset.pattern.permute.xlu1 %v8147_v32 }
 0x15b   : > { %v1087_v31 = vpop.permute.xlu1 %1086  ;;  %1926 = vperm.xlu0 %5158, %v6020_v27   ;;  %1962 = vperm.xlu1 %5161, %v6006_v24  }
 0x15c   : > { %1104 = vst.msk [vmem:[#allocation4 + $0x4] sm:$0xf] %vm1102_vm0, %v1087_v31  ;;  %v1093_v33 = vpop.permute.xlu0 %1092 }
 0x15d   : > { %1107 = vst.msk [vmem:[#allocation4 + $0x10] sm:$0xf] %vm1102_vm0, %v1093_v33 }
 0x15f   : > { %5159 = vset.pattern.permute.xlu0 %v8149_v30  ;;  %v1091_v34 = vpop.permute.xlu1 %1090  ;;  %5164 = vset.pattern.permute.xlu1 %v8117_v36 }
 0x160   : > { %1942 = vperm.xlu0 %5159, %v6006_v24   ;;  %v1142_v35 = vpop.permute.xlu0 %1141  ;;  %1106 = vst.msk [vmem:[#allocation4 + $0xc] sm:$0xf] %vm1102_vm0, %v1091_v34  ;;  %1986 = vperm.xlu1 %5164, %v6020_v27   ;;  %v8105_v34 = vmov 22  }
 0x161   : > { %1155 = vst.msk [vmem:[#allocation4 + $0x28] sm:$0xf] %vm1102_vm0, %v1142_v35 }
 0x163   : > { %v1136_v37 = vpop.permute.xlu1 %1135 }
 0x164   : > { %5162 = vset.pattern.permute.xlu0 %v8147_v32  ;;  %v1190_v38 = vpop.permute.xlu0 %1189  ;;  %1152 = vst.msk [vmem:[#allocation4 + $0x1c] sm:$0xf] %vm1102_vm0, %v1136_v37  ;;  %5165 = vset.pattern.permute.xlu1 %v8080_v39 }
 0x165   : > { %1203 = vst.msk [vmem:[#allocation4 + $0x40] sm:$0xf] %vm1102_vm0, %v1190_v38  ;;  %1966 = vperm.xlu0 %5162, %v6020_v27   ;;  %2002 = vperm.xlu1 %5165, %v6006_v24  }
 0x167   : > { %v1140_v40 = vpop.permute.xlu1 %1139 }
 0x168   : > { %v1238_v41 = vpop.permute.xlu0 %1237  ;;  %1154 = vst.msk [vmem:[#allocation4 + $0x24] sm:$0xf] %vm1102_vm0, %v1140_v40  ;;  %v8141_v40 = vmov 23  }
 0x169   : > { %1251 = vst.msk [vmem:[#allocation4 + $0x58] sm:$0xf] %vm1102_vm0, %v1238_v41  ;;  %5163 = vset.pattern.permute.xlu0 %v8117_v36  ;;  %5168 = vset.pattern.permute.xlu1 %v8131_v42 }
 0x16a   : > { %1982 = vperm.xlu0 %5163, %v6006_v24   ;;  %2026 = vperm.xlu1 %5168, %v6020_v27  }
 0x16b   : > { %v1184_v43 = vpop.permute.xlu1 %1183 }
 0x16c   : > { %v1286_v44 = vpop.permute.xlu0 %1285  ;;  %1200 = vst.msk [vmem:[#allocation4 + $0x34] sm:$0xf] %vm1102_vm0, %v1184_v43 }
 0x16d   : > { %1299 = vst.msk [vmem:[#allocation4 + $0x70] sm:$0xf] %vm1102_vm0, %v1286_v44 }
 0x16e   : > { %5166 = vset.pattern.permute.xlu0 %v8080_v39  ;;  %5169 = vset.pattern.permute.xlu1 %v8127_v46 }
 0x16f   : > { %2006 = vperm.xlu0 %5166, %v6020_v27   ;;  %v1188_v47 = vpop.permute.xlu1 %1187  ;;  %2042 = vperm.xlu1 %5169, %v6006_v24  }
 0x170   : > { %v1334_v48 = vpop.permute.xlu0 %1333  ;;  %1202 = vst.msk [vmem:[#allocation4 + $0x3c] sm:$0xf] %vm1102_vm0, %v1188_v47  ;;  %v8074_v47 = vmov 24  }
 0x171   : > { %1347 = vst.msk [vmem:[#allocation4 + $0x88] sm:$0xf] %vm1102_vm0, %v1334_v48 }
 0x173   : > { %5167 = vset.pattern.permute.xlu0 %v8131_v42  ;;  %v1232_v49 = vpop.permute.xlu1 %1231  ;;  %5172 = vset.pattern.permute.xlu1 %v8145_v51 }
 0x174   : > { %2022 = vperm.xlu0 %5167, %v6006_v24   ;;  %v1382_v50 = vpop.permute.xlu0 %1381  ;;  %1248 = vst.msk [vmem:[#allocation4 + $0x4c] sm:$0xf] %vm1102_vm0, %v1232_v49  ;;  %2066 = vperm.xlu1 %5172, %v6020_v27   ;;  %v5339_v41 = vld [vmem:[#allocation4 + $0x70] sm:$0xff]   ;;  %v5342_v49 = vld [vmem:[#allocation4 + $0x28] sm:$0xff]  }
 0x175   : > { %1395 = vst.msk [vmem:[#allocation4 + $0xa0] sm:$0xf] %vm1102_vm0, %v1382_v50 }
 0x177   : > { %v1236_v52 = vpop.permute.xlu1 %1235 }
 0x178   : > { %5170 = vset.pattern.permute.xlu0 %v8127_v46  ;;  %v1430_v53 = vpop.permute.xlu0 %1429  ;;  %1250 = vst.msk [vmem:[#allocation4 + $0x54] sm:$0xf] %vm1102_vm0, %v1236_v52  ;;  %5173 = vset.pattern.permute.xlu1 %v8078_v54  ;;  %v8103_v52 = vmov 25  }
 0x179   : > { %1443 = vst.msk [vmem:[#allocation4 + $0xb8] sm:$0xf] %vm1102_vm0, %v1430_v53  ;;  %2046 = vperm.xlu0 %5170, %v6020_v27   ;;  %2082 = vperm.xlu1 %5173, %v6006_v24  }
 0x17b   : > { %v1280_v55 = vpop.permute.xlu1 %1279 }
 0x17c   : > { %v1478_v56 = vpop.permute.xlu0 %1477  ;;  %1296 = vst.msk [vmem:[#allocation4 + $0x64] sm:$0xf] %vm1102_vm0, %v1280_v55 }
 0x17d   : > { %1491 = vst.msk [vmem:[#allocation4 + $0xd0] sm:$0xf] %vm1102_vm0, %v1478_v56  ;;  %5171 = vset.pattern.permute.xlu0 %v8145_v51  ;;  %5176 = vset.pattern.permute.xlu1 %v8109_v57  ;;  %v5345_v56 = vld [vmem:[#allocation4 + $0x58] sm:$0xff]  }
 0x17e   : > { %2062 = vperm.xlu0 %5171, %v6006_v24   ;;  %2106 = vperm.xlu1 %5176, %v6020_v27  }
 0x17f   : > { %v1284_v59 = vpop.permute.xlu1 %1283 }
 0x180   : > { %v1085_v60 = vpop.permute.xlu0 %1084  ;;  %v5336_v61 = vld [vmem:[#allocation4 + $0xb8] sm:$0xff]   ;;  %1298 = vst.msk [vmem:[#allocation4 + $0x6c] sm:$0xf] %vm1102_vm0, %v1284_v59 }
 0x181   : > { %1103 = vst.msk [vmem:[#allocation4] sm:$0xf] %vm1102_vm0, %v1085_v60  ;;  %1790 = vmatpush1.bf16.msra.mxu1 %v5336_v61  ;;  %v8098_v60 = vmov 26  }
 0x182   : > { %5174 = vset.pattern.permute.xlu0 %v8078_v54  ;;  %1791 = vmatprep.subr.bf16.mxu1 %v8129_v17  ;;  %v8101_v54 = vmov 45  }
 0x183   : > { %2086 = vperm.xlu0 %5174, %v6020_v27   ;;  %v1328_v62 = vpop.permute.xlu1 %1327  ;;  %5177 = vset.pattern.permute.xlu1 %v8125_v1 }
 0x184   : > { %v1089_v63 = vpop.permute.xlu0 %1088  ;;  %1344 = vst.msk [vmem:[#allocation4 + $0x7c] sm:$0xf] %vm1102_vm0, %v1328_v62  ;;  %2122 = vperm.xlu1 %5177, %v6006_v24  }
 0x185   : > { %1105 = vst.msk [vmem:[#allocation4 + $0x8] sm:$0xf] %vm1102_vm0, %v1089_v63 }
 0x187   : > { %5175 = vset.pattern.permute.xlu0 %v8109_v57  ;;  %v1332_v2 = vpop.permute.xlu1 %1331 }
 0x188   : > { %2102 = vperm.xlu0 %5175, %v6006_v24   ;;  %v1134_v3 = vpop.permute.xlu0 %1133  ;;  %1346 = vst.msk [vmem:[#allocation4 + $0x84] sm:$0xf] %vm1102_vm0, %v1332_v2  ;;  %5180 = vset.pattern.permute.xlu1 %v8143_v4 }
 0x189   : > { %1151 = vst.msk [vmem:[#allocation4 + $0x18] sm:$0xf] %vm1102_vm0, %v1134_v3  ;;  %2146 = vperm.xlu1 %5180, %v6020_v27   ;;  %v5349_v3 = vld [vmem:[#allocation4 + $0x10] sm:$0xff]  }
 0x18b   : > { %v1376_v5 = vpop.permute.xlu1 %1375 }
 0x18c   : > { %5178 = vset.pattern.permute.xlu0 %v8125_v1  ;;  %v1138_v6 = vpop.permute.xlu0 %1137  ;;  %1392 = vst.msk [vmem:[#allocation4 + $0x94] sm:$0xf] %vm1102_vm0, %v1376_v5  ;;  %v8139_v5 = vmov 27  }
 0x18d   : > { %1153 = vst.msk [vmem:[#allocation4 + $0x20] sm:$0xf] %vm1102_vm0, %v1138_v6  ;;  %2126 = vperm.xlu0 %5178, %v6020_v27   ;;  %5181 = vset.pattern.permute.xlu1 %v8073_v7 }
 0x18e   : > { %2162 = vperm.xlu1 %5181, %v6006_v24  }
 0x18f   : > { %v1380_v8 = vpop.permute.xlu1 %1379 }
 0x190   : > { %v1182_v9 = vpop.permute.xlu0 %1181  ;;  %1394 = vst.msk [vmem:[#allocation4 + $0x9c] sm:$0xf] %vm1102_vm0, %v1380_v8  ;;  %v5346_v61 = vld [vmem:[#allocation4 + $0x18] sm:$0xff]  }
 0x191   : > { %1199 = vst.msk [vmem:[#allocation4 + $0x30] sm:$0xf] %vm1102_vm0, %v1182_v9  ;;  %5179 = vset.pattern.permute.xlu0 %v8143_v4  ;;  %v5352_v9 = vld [vmem:[#allocation4 + $0x8] sm:$0xff]  }
 0x192   : > { %2142 = vperm.xlu0 %5179, %v6006_v24   ;;  %5184 = vset.pattern.permute.xlu1 %v8123_v10 }
 0x193   : > { %v1424_v11 = vpop.permute.xlu1 %1423  ;;  %2186 = vperm.xlu1 %5184, %v6020_v27  }
 0x194   : > { %v1186_v12 = vpop.permute.xlu0 %1185  ;;  %1440 = vst.msk [vmem:[#allocation4 + $0xac] sm:$0xf] %vm1102_vm0, %v1424_v11  ;;  %v5344_v55 = vld [vmem:[#allocation4 + $0x20] sm:$0xff]  }
 0x195   : > { %1201 = vst.msk [vmem:[#allocation4 + $0x38] sm:$0xf] %vm1102_vm0, %v1186_v12  ;;  %v5353_v11 = vld [vmem:[#allocation4 + $0x40] sm:$0xff]   ;;  %v8071_v12 = vmov 28  }
 0x196   : > { %5182 = vset.pattern.permute.xlu0 %v8073_v7  ;;  %v8088_v7 = vmov 41  }
 0x197   : > { %2166 = vperm.xlu0 %5182, %v6020_v27   ;;  %v1428_v13 = vpop.permute.xlu1 %1427  ;;  %5185 = vset.pattern.permute.xlu1 %v8100_v15 }
 0x198   : > { %v1230_v14 = vpop.permute.xlu0 %1229  ;;  %1442 = vst.msk [vmem:[#allocation4 + $0xb4] sm:$0xf] %vm1102_vm0, %v1428_v13  ;;  %2202 = vperm.xlu1 %5185, %v6006_v24   ;;  %v5340_v44 = vld [vmem:[#allocation4 + $0x30] sm:$0xff]   ;;  %v5354_v13 = vld [vmem:[#allocation4 + $0xa0] sm:$0xff]  }
 0x199   : > { %1247 = vst.msk [vmem:[#allocation4 + $0x48] sm:$0xf] %vm1102_vm0, %v1230_v14  ;;  %v5355_v14 = vld [vmem:[#allocation4] sm:$0xff]  }
 0x19b   : > { %5183 = vset.pattern.permute.xlu0 %v8123_v10  ;;  %v1472_v16 = vpop.permute.xlu1 %1471 }
 0x19c   : > { %2182 = vperm.xlu0 %5183, %v6006_v24   ;;  %v1234_v18 = vpop.permute.xlu0 %1233  ;;  %1488 = vst.msk [vmem:[#allocation4 + $0xc4] sm:$0xf] %vm1102_vm0, %v1472_v16  ;;  %5188 = vset.pattern.permute.xlu1 %v8116_v19  ;;  %v5338_v38 = vld [vmem:[#allocation4 + $0x38] sm:$0xff]   ;;  %v5356_v16 = vld [vmem:[%s8224_s2] ss:$16 sps:$4 sm:$0xff]  }
 0x19d   : > { %1249 = vst.msk [vmem:[#allocation4 + $0x50] sm:$0xf] %vm1102_vm0, %v1234_v18  ;;  %2226 = vperm.xlu1 %5188, %v6020_v27   ;;  %v8096_v18 = vmov 29  }
 0x19f   : > { %v1476_v20 = vpop.permute.xlu1 %1475 }
 0x1a0   : > { %5186 = vset.pattern.permute.xlu0 %v8100_v15  ;;  %v1278_v21 = vpop.permute.xlu0 %1277  ;;  %1490 = vst.msk [vmem:[#allocation4 + $0xcc] sm:$0xf] %vm1102_vm0, %v1476_v20  ;;  %v5350_v6 = vld [vmem:[#allocation4 + $0x48] sm:$0xff]   ;;  %v1551_v15 = vld [vmem:[%s8218_s3] sm:$0xff]  ;;  %s8175_s3 = smov 124  }
 0x1a1   : > { %1295 = vst.msk [vmem:[#allocation4 + $0x60] sm:$0xf] %vm1102_vm0, %v1278_v21  ;;  %2206 = vperm.xlu0 %5186, %v6020_v27   ;;  %5189 = vset.pattern.permute.xlu1 %v8076_v22 }
 0x1a2   : > { %2242 = vperm.xlu1 %5189, %v6006_v24  }
 0x1a4   : > { %v1282_v23 = vpop.permute.xlu0 %1281  ;;  %v5347_v62 = vld [vmem:[#allocation4 + $0x50] sm:$0xff]  }
 0x1a5   : > { %1297 = vst.msk [vmem:[#allocation4 + $0x68] sm:$0xf] %vm1102_vm0, %v1282_v23  ;;  %5187 = vset.pattern.permute.xlu0 %v8116_v19 }
 0x1a6   : > { %2222 = vperm.xlu0 %5187, %v6006_v24   ;;  %5192 = vset.pattern.permute.xlu1 %v8121_v28 }
 0x1a7   : > { %2266 = vperm.xlu1 %5192, %v6020_v27  }
 0x1a8   : > { %v1326_v31 = vpop.permute.xlu0 %1325  ;;  %v5343_v50 = vld [vmem:[#allocation4 + $0x60] sm:$0xff]  }
 0x1a9   : > { %1343 = vst.msk [vmem:[#allocation4 + $0x78] sm:$0xf] %vm1102_vm0, %v1326_v31  ;;  %v8092_v31 = vmov 30  }
 0x1aa   : > { %5190 = vset.pattern.permute.xlu0 %v8076_v22 }
 0x1ab   : > { %2246 = vperm.xlu0 %5190, %v6020_v27   ;;  %5193 = vset.pattern.permute.xlu1 %v8105_v34 }
 0x1ac   : > { %v1330_v33 = vpop.permute.xlu0 %1329  ;;  %2282 = vperm.xlu1 %5193, %v6006_v24   ;;  %v5341_v45 = vld [vmem:[#allocation4 + $0x68] sm:$0xff]  }
 0x1ad   : > { %1345 = vst.msk [vmem:[#allocation4 + $0x80] sm:$0xf] %vm1102_vm0, %v1330_v33 }
 0x1af   : > { %5191 = vset.pattern.permute.xlu0 %v8121_v28 }
 0x1b0   : > { %2262 = vperm.xlu0 %5191, %v6006_v24   ;;  %v1374_v35 = vpop.permute.xlu0 %1373  ;;  %v5337_v37 = vld [vmem:[#allocation4 + $0x78] sm:$0xff]   ;;  %5196 = vset.pattern.permute.xlu1 %v8141_v40 }
 0x1b1   : > { %1391 = vst.msk [vmem:[#allocation4 + $0x90] sm:$0xf] %vm1102_vm0, %v1374_v35  ;;  %4940 = vmatprep.subr.bf16.mxu0 %v5337_v37  ;;  %2306 = vperm.xlu1 %5196, %v6020_v27   ;;  %v5361_v35 = vld [vmem:[#allocation4 + $0x88] sm:$0xff]   ;;  %v8113_v37 = vmov 31  }
 0x1b2   : > { %4941 = vmatpush3.bf16.msra.mxu0 %v5338_v38 }
 0x1b3   : > { %4942 = vmatprep.subr.bf16.mxu0 %v5339_v41 }
 0x1b4   : > { %5194 = vset.pattern.permute.xlu0 %v8105_v34  ;;  %v1378_v43 = vpop.permute.xlu0 %1377  ;;  %v5362_v41 = vld [vmem:[#allocation4 + $0x80] sm:$0xff]   ;;  %v1833_v34 = vld [vmem:[%s8219_s4 + $0x8] sm:$0xff]  ;;  %s8185_s4 = smov 70  }
 0x1b5   : > { %1393 = vst.msk [vmem:[#allocation4 + $0x98] sm:$0xf] %vm1102_vm0, %v1378_v43  ;;  %2286 = vperm.xlu0 %5194, %v6020_v27   ;;  %5197 = vset.pattern.permute.xlu1 %v8074_v47  ;;  %v8067_v43 = vmov 32  }
 0x1b6   : > { %4943 = vmatpush3.bf16.msra.mxu0 %v5340_v44  ;;  %2322 = vperm.xlu1 %5197, %v6006_v24  }
 0x1b7   : > { %4944 = vmatprep.subr.bf16.mxu0 %v5341_v45  ;;  %v5363_v45 = vld [vmem:[#allocation4 + $0xd0] sm:$0xff]  }
 0x1b8   : > { %v1422_v48 = vpop.permute.xlu0 %1421  ;;  %v5360_v23 = vld [vmem:[#allocation4 + $0x90] sm:$0xff]  }
 0x1b9   : > { %1439 = vst.msk [vmem:[#allocation4 + $0xa8] sm:$0xf] %vm1102_vm0, %v1422_v48  ;;  %5195 = vset.pattern.permute.xlu0 %v8141_v40  ;;  %v6213_v48 = vpop.permute.xlu1 %1560 }
 0x1ba   : > { %2302 = vperm.xlu0 %5195, %v6006_v24   ;;  %4945 = vmatpush3.bf16.msra.mxu0 %v5342_v49  ;;  %v8090_v49 = vmov 33  }
 0x1bb   : > { %5200 = vset.pattern.permute.xlu1 %v8103_v52  ;;  %4946 = vmatprep.subr.bf16.mxu0 %v5343_v50 }
 0x1bc   : > { %v1426_v53 = vpop.permute.xlu0 %1425  ;;  %2346 = vperm.xlu1 %5200, %v6020_v27   ;;  %v5359_v20 = vld [vmem:[#allocation4 + $0x98] sm:$0xff]  }
 0x1bd   : > { %1441 = vst.msk [vmem:[#allocation4 + $0xb0] sm:$0xf] %vm1102_vm0, %v1426_v53 }
 0x1be   : > { %5198 = vset.pattern.permute.xlu0 %v8074_v47  ;;  %4947 = vmatpush3.bf16.msra.mxu0 %v5344_v55  ;;  %v6223_v55 = vpop.permute.xlu1 %1836 }
 0x1bf   : > { %2326 = vperm.xlu0 %5198, %v6020_v27   ;;  %4948 = vmatprep.subr.bf16.mxu0 %v5345_v56 }
 0x1c0   : > { %v1470_v59 = vpop.permute.xlu0 %1469  ;;  %5201 = vset.pattern.permute.xlu1 %v8098_v60  ;;  %v5351_v8 = vld [vmem:[#allocation4 + $0xa8] sm:$0xff]  }
 0x1c1   : > { %1487 = vst.msk [vmem:[#allocation4 + $0xc0] sm:$0xf] %vm1102_vm0, %v1470_v59  ;;  %2362 = vperm.xlu1 %5201, %v6006_v24   ;;  %v8086_v59 = vmov 34  }
 0x1c2   : > { %4949 = vmatpush3.bf16.msra.mxu0 %v5346_v61  ;;  %v5366_v61 = vld [vmem:[%s8224_s2 + $0x8] ss:$16 sps:$4 sm:$0xff]   ;;  %s8163_s2 = smov 110  }
 0x1c3   : > { %5199 = vset.pattern.permute.xlu0 %v8103_v52  ;;  %4950 = vmatprep.subr.bf16.mxu0 %v5347_v62 }
 0x1c4   : > { %2342 = vperm.xlu0 %5199, %v6006_v24   ;;  %v1474_v63 = vpop.permute.xlu0 %1473  ;;  %v5348_v2 = vld [vmem:[#allocation4 + $0xb0] sm:$0xff]  }
 0x1c5   : > { %1489 = vst.msk [vmem:[#allocation4 + $0xc8] sm:$0xf] %vm1102_vm0, %v1474_v63  ;;  %5204 = vset.pattern.permute.xlu1 %v8139_v5  ;;  %1792 = vmatpush1.bf16.msra.mxu1 %v5348_v2  ;;  %v6236_v63 = vpop.permute.xlu1 %1873  ;;  %v8137_v2 = vmov 35  }
 0x1c6   : > { %2386 = vperm.xlu1 %5204, %v6020_v27   ;;  %4951 = vmatpush3.bf16.msra.mxu0 %v5349_v3  ;;  %8229 = vst [vmem:[#allocation18_spill] sm:$0xff] %v6236_v63 }
 0x1c7   : > { %1793 = vmatprep.subr.bf16.mxu1 %v8129_v17  ;;  %4952 = vmatprep.subr.bf16.mxu0 %v5350_v6 }
 0x1c8   : > { %5202 = vset.pattern.permute.xlu0 %v8098_v60  ;;  %v5365_v56 = vld [vmem:[#allocation4 + $0xc0] sm:$0xff]   ;;  %v8119_v60 = vmov 48  }
 0x1c9   : > { %2366 = vperm.xlu0 %5202, %v6020_v27   ;;  %1794 = vmatpush1.bf16.msra.mxu1 %v5351_v8  ;;  %v6244_v6 = vpop.permute.xlu1 %1886  ;;  %v8135_v8 = vmov 39  }
 0x1ca   : > { %5205 = vset.pattern.permute.xlu1 %v8071_v12  ;;  %4953 = vmatpush3.bf16.msra.mxu0 %v5352_v9  ;;  %8230 = vst [vmem:[#allocation19_spill] sm:$0xff] %v6244_v6 }
 0x1cb   : > { %1795 = vmatprep.subr.bf16.mxu1 %v8129_v17  ;;  %4954 = vmatprep.subr.bf16.mxu0 %v5353_v11 }
 0x1cc   : > { %2402 = vperm.xlu1 %5205, %v6006_v24   ;;  %v5364_v50 = vld [vmem:[#allocation4 + $0xc8] sm:$0xff]  }
 0x1cd   : > { %5203 = vset.pattern.permute.xlu0 %v8139_v5  ;;  %1796 = vmatpush1.bf16.msra.mxu1 %v5354_v13  ;;  %v6252_v11 = vpop.permute.xlu1 %1898 }
 0x1ce   : > { %2382 = vperm.xlu0 %5203, %v6006_v24   ;;  %4955 = vmatpush3.bf16.msra.mxu0 %v5355_v14  ;;  %8232 = vst [vmem:[#allocation21_spill] sm:$0xff] %v6252_v11  ;;  %v8110_v14 = vmov 43  }
 0x1cf   : > { %1797 = vmatprep.subr.bf16.mxu1 %v8129_v17  ;;  %4982 = vmatprep.subr.bf16.mxu0 %v8065_v0 }
 0x1d0   : > { %5208 = vset.pattern.permute.xlu1 %v8096_v18 }
 0x1d1   : > { %v6187_v21 = vpop.permute.xlu0 %1910  ;;  %2426 = vperm.xlu1 %5208, %v6020_v27   ;;  %1781 = vmatmul.mubr.bf16.vlgmr.msra.gmra.mxu0 %v5356_v16  ;;  %v6260_v16 = vpop.permute.xlu1 %1902 }
 0x1d2   : > { %8225 = vst [vmem:[#allocation14_spill] sm:$0xff] %v6187_v21  ;;  %5206 = vset.pattern.permute.xlu0 %v8071_v12  ;;  %1798 = vmatpush1.bf16.msra.mxu1 %v5359_v20  ;;  %8233 = vst [vmem:[#allocation22_spill] sm:$0xff] %v6260_v16 }
 0x1d3   : > { %2406 = vperm.xlu0 %5206, %v6020_v27   ;;  %1799 = vmatprep.subr.bf16.mxu1 %v8129_v17 }
 0x1d5   : > { %5209 = vset.pattern.permute.xlu1 %v8092_v31 }
 0x1d6   : > { %v6194_v33 = vpop.permute.xlu0 %1926  ;;  %2442 = vperm.xlu1 %5209, %v6006_v24   ;;  %1800 = vmatpush1.bf16.msra.mxu1 %v5360_v23  ;;  %v8133_v23 = vmov 47  }
 0x1d7   : > { %8226 = vst [vmem:[#allocation15_spill] sm:$0xff] %v6194_v33  ;;  %5207 = vset.pattern.permute.xlu0 %v8096_v18  ;;  %1801 = vmatprep.subr.bf16.mxu1 %v8129_v17 }
 0x1d8   : > { %2422 = vperm.xlu0 %5207, %v6006_v24  }
 0x1da   : > { %5212 = vset.pattern.permute.xlu1 %v8113_v37  ;;  %1802 = vmatpush1.bf16.msra.mxu1 %v5361_v35  ;;  %v6267_v35 = vpop.permute.xlu1 %1914 }
 0x1db   : > { %v6201_v38 = vpop.permute.xlu0 %1942  ;;  %2466 = vperm.xlu1 %5212, %v6020_v27   ;;  %1803 = vmatprep.subr.bf16.mxu1 %v8129_v17  ;;  %8235 = vst [vmem:[#allocation24_spill] sm:$0xff] %v6267_v35 }
 0x1dc   : > { %5210 = vset.pattern.permute.xlu0 %v8092_v31  ;;  %v8111_v31 = vmov 40  }
 0x1dd   : > { %2446 = vperm.xlu0 %5210, %v6020_v27  }
 0x1de   : > { %1804 = vmatpush1.bf16.msra.mxu1 %v5362_v41 }
 0x1df   : > { %5213 = vset.pattern.permute.xlu1 %v8067_v43  ;;  %1815 = vmatprep.subr.bf16.mxu1 %v8129_v17 }
 0x1e0   : > { %v6209_v44 = vpop.permute.xlu0 %1966  ;;  %2482 = vperm.xlu1 %5213, %v6006_v24  }
 0x1e1   : > { %8227 = vst [vmem:[#allocation16_spill] sm:$0xff] %v6209_v44  ;;  %5211 = vset.pattern.permute.xlu0 %v8113_v37 }
 0x1e2   : > { %2462 = vperm.xlu0 %5211, %v6006_v24   ;;  %1816 = vmatpush2.bf16.msra.mxu1 %v5363_v45  ;;  %v8069_v45 = vmov 36  }
 0x1e3   : > { %1817 = vmatprep.subr.bf16.mxu1 %v8129_v17 }
 0x1e4   : > { %5216 = vset.pattern.permute.xlu1 %v8090_v49 }
 0x1e5   : > { %v6218_v53 = vpop.permute.xlu0 %1982  ;;  %2506 = vperm.xlu1 %5216, %v6020_v27  }
 0x1e6   : > { %5214 = vset.pattern.permute.xlu0 %v8067_v43  ;;  %1818 = vmatpush2.bf16.msra.mxu1 %v5364_v50  ;;  %v6276_v50 = vpop.permute.xlu1 %1922 }
 0x1e7   : > { %2486 = vperm.xlu0 %5214, %v6020_v27   ;;  %1819 = vmatprep.subr.bf16.mxu1 %v8129_v17 }
 0x1e9   : > { %5217 = vset.pattern.permute.xlu1 %v8086_v59 }
 0x1ea   : > { %v6230_v62 = vpop.permute.xlu0 %2006  ;;  %2522 = vperm.xlu1 %5217, %v6006_v24   ;;  %1820 = vmatpush2.bf16.msra.mxu1 %v5365_v56  ;;  %v6287_v43 = vpop.permute.xlu1 %1946 }
 0x1eb   : > { %8228 = vst [vmem:[#allocation17_spill] sm:$0xff] %v6230_v62  ;;  %5215 = vset.pattern.permute.xlu0 %v8090_v49  ;;  %4994 = vmatprep.subr.bf16.mxu1 %v8065_v0 }
 0x1ec   : > { %2502 = vperm.xlu0 %5215, %v6006_v24  }
 0x1ed   : > { %1822 = vmatmul.mubr.bf16.vlgmr.msra.gmra.mxu1 %v5366_v61  ;;  %v8084_v61 = vmov 37  }
 0x1ee   : > { %5219 = vset.pattern.permute.xlu1 %v8137_v2  ;;  %v6296_v47 = vpop.permute.xlu1 %1962 }
 0x1ef   : > { %v6239_v3 = vpop.permute.xlu0 %2022  ;;  %2542 = vperm.xlu1 %5219, %v6006_v24  }
 0x1f0   : > { %5218 = vset.pattern.permute.xlu0 %v8086_v59  ;;  %v8107_v59 = vmov 46  }
 0x1f1   : > { %2526 = vperm.xlu0 %5218, %v6020_v27  }
 0x1f2   : > { %v6305_v39 = vpop.permute.xlu1 %1986 }
 0x1f3   : > { %5221 = vset.pattern.permute.xlu1 %v8135_v8 }
 0x1f4   : > { %v6247_v9 = vpop.permute.xlu0 %2046  ;;  %2622 = vperm.xlu1 %5221, %v6006_v24  }
 0x1f5   : > { %8231 = vst [vmem:[#allocation20_spill] sm:$0xff] %v6247_v9  ;;  %5220 = vset.pattern.permute.xlu0 %v8137_v2 }
 0x1f6   : > { %2546 = vperm.xlu0 %5220, %v6020_v27  }
 0x1f8   : > { %2626 = vperm.xlu1 %5221, %v6020_v27  }
 0x1f9   : > { %v6255_v13 = vpop.permute.xlu0 %2062 }
 0x1fa   : > { %5222 = vset.pattern.permute.xlu0 %v8110_v14 }
 0x1fb   : > { %2702 = vperm.xlu0 %5222, %v6006_v24  }
 0x1fc   : > { %5223 = vset.pattern.permute.xlu1 %v8110_v14  ;;  %v8114_v14 = vmov 44  }
 0x1fd   : > { %2706 = vperm.xlu1 %5223, %v6020_v27  }
 0x1fe   : > { %v6263_v20 = vpop.permute.xlu0 %2086 }
 0x1ff   : > { %8234 = vst [vmem:[#allocation23_spill] sm:$0xff] %v6263_v20  ;;  %5225 = vset.pattern.permute.xlu0 %v8133_v23 }
 0x200   : > { %2786 = vperm.xlu0 %5225, %v6020_v27  }
 0x201   : > { %5224 = vset.pattern.permute.xlu1 %v8133_v23 }
 0x202   : > { %2782 = vperm.xlu1 %5224, %v6006_v24  }
 0x203   : > { %v6271_v41 = vpop.permute.xlu0 %2102 }
 0x204   : > { %5227 = vset.pattern.permute.xlu0 %v8069_v45 }
 0x205   : > { %2566 = vperm.xlu0 %5227, %v6020_v27  }
 0x206   : > { %5226 = vset.pattern.permute.xlu1 %v8069_v45  ;;  %v8082_v45 = vmov 38  }
 0x207   : > { %2562 = vperm.xlu1 %5226, %v6006_v24  }
 0x208   : > { %v6279_v56 = vpop.permute.xlu0 %2126 }
 0x209   : > { %8236 = vst [vmem:[#allocation25_spill] sm:$0xff] %v6279_v56  ;;  %5228 = vset.pattern.permute.xlu0 %v8084_v61 }
 0x20a   : > { %2582 = vperm.xlu0 %5228, %v6006_v24  }
 0x20b   : > { %5229 = vset.pattern.permute.xlu1 %v8084_v61 }
 0x20c   : > { %2586 = vperm.xlu1 %5229, %v6020_v27  }
 0x20d   : > { %v6285_v0 = vpop.permute.xlu0 %2142 }
 0x20e   : > { %5230 = vset.pattern.permute.xlu0 %v8082_v45 }
 0x20f   : > { %2602 = vperm.xlu0 %5230, %v6006_v24  }
 0x210   : > { %5231 = vset.pattern.permute.xlu1 %v8082_v45  ;;  %v8094_v45 = vmov 42  }
 0x211   : > { %2606 = vperm.xlu1 %5231, %v6020_v27  }
 0x212   : > { %v6293_v12 = vpop.permute.xlu0 %2166 }
 0x213   : > { %8237 = vst [vmem:[#allocation26_spill] sm:$0xff] %v6293_v12  ;;  %5233 = vset.pattern.permute.xlu0 %v8088_v7 }
 0x214   : > { %2666 = vperm.xlu0 %5233, %v6020_v27  }
 0x215   : > { %5232 = vset.pattern.permute.xlu1 %v8088_v7  ;;  %v6313_v7 = vpop.permute.xlu1 %2002 }
 0x216   : > { %2662 = vperm.xlu1 %5232, %v6006_v24  }
 0x217   : > { %v6301_v22 = vpop.permute.xlu0 %2182 }
 0x218   : > { %5235 = vset.pattern.permute.xlu0 %v8101_v54 }
 0x219   : > { %2742 = vperm.xlu0 %5235, %v6006_v24  }
 0x21a   : > { %5234 = vset.pattern.permute.xlu1 %v8094_v45  ;;  %v6322_v45 = vpop.permute.xlu1 %2026 }
 0x21b   : > { %2682 = vperm.xlu1 %5234, %v6006_v24  }
 0x21c   : > { %v6309_v61 = vpop.permute.xlu0 %2206 }
 0x21d   : > { %8238 = vst [vmem:[#allocation27_spill] sm:$0xff] %v6309_v61  ;;  %5238 = vset.pattern.permute.xlu0 %v8107_v59 }
 0x21e   : > { %2766 = vperm.xlu0 %5238, %v6020_v27   ;;  %v6335_v52 = vpop.permute.xlu1 %2042 }
 0x21f   : > { %2686 = vperm.xlu1 %5234, %v6020_v27  }
 0x221   : > { %v6316_v49 = vpop.permute.xlu0 %2222 }
 0x222   : > { %5240 = vset.pattern.permute.xlu0 %v8111_v31  ;;  %v6345_v57 = vpop.permute.xlu1 %2066 }
 0x223   : > { %2646 = vperm.xlu0 %5240, %v6020_v27   ;;  %5236 = vset.pattern.permute.xlu1 %v8101_v54 }
 0x224   : > { %2746 = vperm.xlu1 %5236, %v6020_v27  }
 0x226   : > { %v6324_v18 = vpop.permute.xlu0 %2246 }
 0x227   : > { %8239 = vst [vmem:[#allocation28_spill] sm:$0xff] %v6324_v18  ;;  %5242 = vset.pattern.permute.xlu0 %v8119_v60 }
 0x228   : > { %2802 = vperm.xlu0 %5242, %v6006_v24   ;;  %5237 = vset.pattern.permute.xlu1 %v8107_v59 }
 0x229   : > { %2762 = vperm.xlu1 %5237, %v6006_v24  }
 0x22b   : > { %v6333_v54 = vpop.permute.xlu0 %2262 }
 0x22c   : > { %5243 = vset.pattern.permute.xlu0 %v8129_v17 }
 0x22d   : > { %1555 = vperm.xlu0 %5243, %v1551_v15   ;;  %5239 = vset.pattern.permute.xlu1 %v8111_v31  ;;  %v6352_v31 = vpop.permute.xlu1 %2082 }
 0x22e   : > { %2642 = vperm.xlu1 %5239, %v6006_v24  }
 0x230   : > { %v6343_v59 = vpop.permute.xlu0 %2286 }
 0x231   : > { %8240 = vst [vmem:[#allocation29_spill] sm:$0xff] %v6343_v59  ;;  %1841 = vperm.xlu0 %5243, %v1833_v34   ;;  %v6359_v34 = vpop.permute.xlu1 %2106 }
 0x232   : > { %5241 = vset.pattern.permute.xlu1 %v8114_v14 }
 0x233   : > { %2722 = vperm.xlu1 %5241, %v6006_v24   ;;  %v2851_v24 = vld [vmem:[%s8242_s6] sm:$0xff] }
 0x235   : > { %1878 = vperm.xlu0 %5243, %v6020_v27   ;;  %v6350_v15 = vpop.permute.xlu0 %2302  ;;  %v6367_v19 = vpop.permute.xlu1 %2122 }
 0x237   : > { %2726 = vperm.xlu1 %5241, %v6020_v27  }
 0x23a   : > { %v6355_v37 = vpop.permute.xlu0 %2326 }
 0x23b   : > { %8241 = vst [vmem:[#allocation30_spill] sm:$0xff] %v6355_v37  ;;  %5244 = vset.pattern.permute.xlu1 %v8119_v60  ;;  %v6373_v60 = vpop.permute.xlu1 %2146 }
 0x23c   : > { %2806 = vperm.xlu1 %5244, %v6020_v27  }
 0x23f   : > { %v6364_v14 = vpop.permute.xlu0 %2342  ;;  %v6377_v28 = vpop.permute.xlu1 %2162 }
 0x240   : > { %5245 = vset.pattern.permute.xlu1 %v8129_v17 }
 0x241   : > { %2855 = vperm.xlu1 %5245, %v2851_v24  }
 0x243   : > { %v6381_v1 = vpop.permute.xlu1 %2186 }
 0x244   : > { %v6369_v36 = vpop.permute.xlu0 %2366 }
 0x245   : > { %8243 = vst [vmem:[#allocation31_spill] sm:$0xff] %v6369_v36 }
 0x247   : > { %v6385_v17 = vpop.permute.xlu1 %2202 }
 0x249   : > { %v6371_v58 = vpop.permute.xlu0 %2382 }
 0x24b   : > { %v6389_v42 = vpop.permute.xlu1 %2226 }
 0x24e   : > { %v6375_v27 = vpop.permute.xlu0 %2406 }
 0x24f   : > { %8244 = vst [vmem:[#allocation32_spill] sm:$0xff] %v6375_v27  ;;  %v6395_v2 = vpop.permute.xlu1 %2242 }
 0x253   : > { %v6379_v10 = vpop.permute.xlu0 %2422  ;;  %v6399_v40 = vpop.permute.xlu1 %2266 }
 0x257   : > { %v6403_v51 = vpop.permute.xlu1 %2282 }
 0x258   : > { %v6383_v46 = vpop.permute.xlu0 %2446 }
 0x259   : > { %8245 = vst [vmem:[#allocation33_spill] sm:$0xff] %v6383_v46 }
 0x25b   : > { %v6407_v30 = vpop.permute.xlu1 %2306 }
 0x25d   : > { %v6387_v24 = vpop.permute.xlu0 %2462 }
 0x25e   : > { %8246 = vst [vmem:[#allocation34_spill] sm:$0xff] %v6387_v24 }
 0x25f   : > { %v6411_v26 = vpop.permute.xlu1 %2322 }
 0x262   : > { %v6391_v23 = vpop.permute.xlu0 %2486 }
 0x263   : > { %8247 = vst [vmem:[#allocation35_spill] sm:$0xff] %v6391_v23  ;;  %v6417_v11 = vpop.permute.xlu1 %2346 }
 0x267   : > { %v6393_v8 = vpop.permute.xlu0 %2502  ;;  %v6421_v6 = vpop.permute.xlu1 %2362 }
 0x268   : > { %8248 = vst [vmem:[#allocation36_spill] sm:$0xff] %v6393_v8 }
 0x26b   : > { %v6425_v35 = vpop.permute.xlu1 %2386 }
 0x26c   : > { %v6397_v5 = vpop.permute.xlu0 %2526 }
 0x26d   : > { %8249 = vst [vmem:[#allocation37_spill] sm:$0xff] %v6397_v5 }
 0x26f   : > { %v6429_v23 = vpop.permute.xlu1 %2402 }
 0x271   : > { %v6401_v4 = vpop.permute.xlu0 %2546 }
 0x273   : > { %v6433_v46 = vpop.permute.xlu1 %2426 }
 0x276   : > { %v6405_v32 = vpop.permute.xlu0 %2702 }
 0x277   : > { %v6437_v37 = vpop.permute.xlu1 %2442 }
 0x27b   : > { %v6409_v29 = vpop.permute.xlu0 %2786  ;;  %v6441_v12 = vpop.permute.xlu1 %2466 }
 0x27c   : > { %8250 = vst [vmem:[#allocation38_spill] sm:$0xff] %v6409_v29 }
 0x280   : > { %v6413_v25 = vpop.permute.xlu0 %2566 }
 0x281   : > { %8251 = vst [vmem:[#allocation39_spill] sm:$0xff] %v6413_v25 }
 0x285   : > { %v6415_v63 = vpop.permute.xlu0 %2582 }
 0x286   : > { %8252 = vst [vmem:[#allocation40_spill] sm:$0xff] %v6415_v63  ;;  %v4779_v63 = vld [vmem:[%s8257_s1] ss:$0 sm:$0xff] }
 0x28a   : > { %v6419_v16 = vpop.permute.xlu0 %2602 }
 0x28b   : > { %8253 = vst [vmem:[#allocation41_spill] sm:$0xff] %v6419_v16  ;;  %v6443_v16 = vpop.permute.xlu1 %2482 }
 0x28f   : > { %v6423_v21 = vpop.permute.xlu0 %2666 }
 0x291   : > { %v4956_v25 = vpop.f32.mrf.mxu0 }
 0x293   : > { %v4957_v36 = vpop.f32.mrf.mxu0 }
 0x294   : > { %v6427_v5 = vpop.permute.xlu0 %2742  ;;  %v4958_v61 = vadd.f32 %v4957_v36, %v4956_v25 }
 0x295   : > { %8254 = vst [vmem:[#allocation42_spill] sm:$0xff] %v6427_v5  ;;  %v4959_v18 = vpop.f32.mrf.mxu0 }
 0x297   : > { %v4960_v56 = vpop.f32.mrf.mxu0 }
 0x298   : > { %v4961_v9 = vadd.f32 %v4960_v56, %v4959_v18  ;;  %v2867_v56 = vld [vmem:[%s8259_s7] sm:$0xff] }
 0x299   : > { %v6431_v29 = vpop.permute.xlu0 %2766 }
 0x29a   : > { %v1786_v25 = vadd.f32 %v4961_v9, %v6213_v48  ;;  %v2852_v48 = vld [vmem:[%s8242_s6 + $0x8] sm:$0xff]  ;;  %s8350_s6 = smov 66  }
 0x29e   : > { %v6435_v27 = vpop.permute.xlu0 %2646 }
 0x29f   : > { %8255 = vst [vmem:[#allocation43_spill] sm:$0xff] %v6435_v27 }
 0x2a3   : > { %v6439_v59 = vpop.permute.xlu0 %2802 }
 0x2a4   : > { %8256 = vst [vmem:[#allocation44_spill] sm:$0xff] %v6439_v59 }
 0x2a8   : > { %v1556_v20 = vpop.permute.xlu0 %1555 }
 0x2a9   : > { %v1783_v62 = vadd.f32 %v4958_v61, %v1556_v20  ;;  %v5381_v61 = vld [vmem:[%s8221_s5 + $0x8] sm:$0xff]  ;;  %s8348_s5 = smov 70  }
 0x2ac   : > { %v1842_v27 = vpop.permute.xlu0 %1841 }
 0x2ad   : > { %v1823_v44 = vpop.f32.mrf.mxu1 }
 0x2ae   : > { %v1824_v33 = vadd.f32 %v1823_v44, %v1783_v62 }
 0x2af   : > { %v1825_v5 = vpop.f32.mrf.mxu1 }
 0x2b0   : > { %vm1830_vm2 = vcmp.gt.f32.partialorder %v1824_v33, 0.0  ;;  %v1844_v59 = vmul.f32 %v6223_v55, %v1824_v33  ;;  %v6451_v5 = vpop.permute.xlu1 %2506 }
 0x2b1   : > { %v1826_v36 = vpop.f32.mrf.mxu1 }
 0x2b2   : > { %v1846_v8 = vsel %vm1830_vm2, %v1824_v33, %v1844_v59  ;;  %v1827_v24 = vadd.f32 %v1826_v36, %v1786_v25  ;;  %v2868_v33 = vld [vmem:[%s8259_s7 + $0x8] sm:$0xff]  ;;  %s8191_s7 = smov 126  }
 0x2b3   : > { %v1854_v18 = vmul.f32 %v4779_v63, %v1846_v8  ;;  %v1828_v20 = vpop.f32.mrf.mxu1  ;;  %v6468_v8 = vld [vmem:[%s8260_s8 + $0x8] sm:$0xff] }
 0x2b4   : > { %vm1831_vm3 = vcmp.gt.f32.partialorder %v1827_v24, 0.0  ;;  %v1845_v44 = vmul.f32 %v1842_v27, %v1827_v24  ;;  %v6463_v59 = vpop.permute.xlu1 %2522  ;;  %8261 = vst [vmem:[#allocation45_spill] sm:$0xff] %v6468_v8 }
 0x2b5   : > { %1858 = vrot.lane.b32.xlu1 %v1854_v18, %s8258_s24 }
 0x2b6   : > { %v1847_v62 = vsel %vm1831_vm3, %v1827_v24, %v1845_v44 }
 0x2b7   : > { %v1855_v55 = vmul.f32 %v4779_v63, %v1847_v62  ;;  %v8262_v63 = vmov 1  }
 0x2b8   : > { %v6472_v9 = vpop.permute.xlu1 %2542 }
 0x2b9   : > { %2871 = vperm.xlu1 %5245, %v2867_v56   ;;  %1860 = vrot.lane.b32.xlu0 %v1855_v55, %s8258_s24 }
 0x2bc   : > { %v6478_v27 = vpop.permute.xlu1 %2622 }
 0x2bd   : > { %2876 = vperm.xlu1 %5245, %v2868_v33   ;;  %2860 = vperm.xlu0 %5243, %v2852_v48   ;;  %8263 = vst [vmem:[#allocation46_spill] sm:$0xff] %v6478_v27 }
 0x2c0   : > { %v6480_v24 = vpop.permute.xlu1 %2626 }
 0x2c1   : > { %2906 = vperm.xlu1 %5245, %v6468_v8   ;;  %5246 = vset.pattern.permute.xlu0 %v8262_v63  ;;  %8264 = vst [vmem:[#allocation47_spill] sm:$0xff] %v6480_v24 }
 0x2c2   : > { %1890 = vperm.xlu0 %5246, %v5381_v61  }
 0x2c4   : > { %v6482_v25 = vpop.permute.xlu1 %2706 }
 0x2c5   : > { %5247 = vset.pattern.permute.xlu1 %v8262_v63  ;;  %8265 = vst [vmem:[#allocation48_spill] sm:$0xff] %v6482_v25 }
 0x2c8   : > { %v2783_v36 = vpop.permute.xlu1 %2782 }
 0x2cc   : > { %v6484_v18 = vpop.permute.xlu1 %2562 }
 0x2d0   : > { %v6486_v20 = vpop.permute.xlu1 %2586 }
 0x2d4   : > { %v6488_v44 = vpop.permute.xlu1 %2606 }
 0x2d8   : > { %v6490_v62 = vpop.permute.xlu1 %2662 }
 0x2d9   : > { %8266 = vst [vmem:[#allocation49_spill] sm:$0xff] %v6490_v62  ;;  %v6510_v62 = vpop.permute.xlu0 %1878 }
 0x2da   : > { %8271 = vst [vmem:[#allocation54_spill] sm:$0xff] %v6510_v62 }
 0x2dc   : > { %v6492_v56 = vpop.permute.xlu1 %2682 }
 0x2dd   : > { %8267 = vst [vmem:[#allocation50_spill] sm:$0xff] %v6492_v56 }
 0x2e0   : > { %v6494_v55 = vpop.permute.xlu1 %2686 }
 0x2e4   : > { %v6496_v33 = vpop.permute.xlu1 %2746 }
 0x2e8   : > { %v6498_v48 = vpop.permute.xlu1 %2762 }
 0x2e9   : > { %8268 = vst [vmem:[#allocation51_spill] sm:$0xff] %v6498_v48 }
 0x2ec   : > { %v6500_v63 = vpop.permute.xlu1 %2642 }
 0x2f0   : > { %v6502_v61 = vpop.permute.xlu1 %2722 }
 0x2f1   : > { %8269 = vst [vmem:[#allocation52_spill] sm:$0xff] %v6502_v61 }
 0x2f4   : > { %v6504_v25 = vpop.permute.xlu1 %2726 }
 0x2f8   : > { %v6506_v24 = vpop.permute.xlu1 %2806 }
 0x2fc   : > { %v6508_v8 = vpop.permute.xlu1 %2855 }
 0x2fd   : > { %8270 = vst [vmem:[#allocation53_spill] sm:$0xff] %v6508_v8 }
 0x327   : > { %v1859_v56 = vpop.permute.xlu1 %1858 }
 0x328   : > { %1865 = vst.msk [vmem:[#allocation3] sm:$0xff] %vm1864_vm4, %v1859_v56 }
 0x32b   : > { %v1861_v27 = vpop.permute.xlu0 %1860 }
 0x32c   : > { %1866 = vst.msk [vmem:[#allocation3 + $0x8] sm:$0xff] %vm1864_vm4, %v1861_v27 }
 0x32f   : > { %v6514_v48 = vld [vmem:[#allocation3] sm:$0xff] }
 0x330   : > { %v1929_v61 = vmul.f32 %v6276_v50, %v6514_v48  ;;  %v1949_v8 = vmul.f32 %v6201_v38, %v6514_v48  ;;  %v1969_v62 = vmul.f32 %v6296_v47, %v6514_v48  ;;  %v2709_v56 = vmul.f32 %v6405_v32, %v6514_v48 }
 0x331   : > { %v1989_v50 = vmul.f32 %v6218_v53, %v6514_v48  ;;  %v2789_v27 = vmul.f32 %v2783_v36, %v6514_v48  ;;  %v2009_v32 = vmul.f32 %v6313_v7, %v6514_v48  ;;  %v2029_v38 = vmul.f32 %v6239_v3, %v6514_v48 }
 0x332   : > { %1933 = vrot.lane.b32.xlu1 %v1929_v61, %s8175_s3  ;;  %2713 = vrot.lane.b32.xlu0 %v2709_v56, %s8185_s4  ;;  %v2049_v7 = vmul.f32 %v6335_v52, %v6514_v48  ;;  %v2069_v3 = vmul.f32 %v6255_v13, %v6514_v48  ;;  %v2089_v52 = vmul.f32 %v6352_v31, %v6514_v48 }
 0x333   : > { %v6531_v61 = vld [vmem:[#allocation3 + $0x8] sm:$0xff]  ;;  %v2109_v13 = vmul.f32 %v6271_v41, %v6514_v48  ;;  %v2129_v31 = vmul.f32 %v6367_v19, %v6514_v48  ;;  %v2149_v41 = vmul.f32 %v6285_v0, %v6514_v48  ;;  %v2169_v19 = vmul.f32 %v6377_v28, %v6514_v48 }
 0x334   : > { %v1950_v47 = vmul.f32 %v6287_v43, %v6531_v61  ;;  %v1990_v53 = vmul.f32 %v6305_v39, %v6531_v61  ;;  %v2030_v43 = vmul.f32 %v6322_v45, %v6531_v61  ;;  %v2070_v39 = vmul.f32 %v6345_v57, %v6531_v61 }
 0x335   : > { %v2110_v45 = vmul.f32 %v6359_v34, %v6531_v61  ;;  %v2150_v57 = vmul.f32 %v6373_v60, %v6531_v61  ;;  %v2190_v34 = vmul.f32 %v6381_v1, %v6531_v61  ;;  %v2230_v60 = vmul.f32 %v6389_v42, %v6531_v61 }
 0x336   : > { %1953 = vrot.lane.b32.xlu1 %v1949_v8, %s8175_s3  ;;  %2793 = vrot.lane.b32.xlu0 %v2789_v27, %s8183_s16  ;;  %v2270_v1 = vmul.f32 %v6399_v40, %v6531_v61  ;;  %v2189_v0 = vmul.f32 %v6301_v22, %v6514_v48  ;;  %v2310_v42 = vmul.f32 %v6407_v30, %v6531_v61 }
 0x337   : > { %v2209_v28 = vmul.f32 %v6385_v17, %v6514_v48  ;;  %v2350_v40 = vmul.f32 %v6417_v11, %v6531_v61  ;;  %v2229_v22 = vmul.f32 %v6316_v49, %v6514_v48  ;;  %v2390_v30 = vmul.f32 %v6425_v35, %v6531_v61 }
 0x338   : > { %v2249_v17 = vmul.f32 %v6395_v2, %v6514_v48  ;;  %v2430_v11 = vmul.f32 %v6433_v46, %v6531_v61  ;;  %v2269_v49 = vmul.f32 %v6333_v54, %v6514_v48  ;;  %v2470_v35 = vmul.f32 %v6441_v12, %v6531_v61 }
 0x339   : > { %v2289_v2 = vmul.f32 %v6403_v51, %v6514_v48  ;;  %v2510_v46 = vmul.f32 %v6451_v5, %v6531_v61  ;;  %v2309_v54 = vmul.f32 %v6350_v15, %v6514_v48  ;;  %v2550_v12 = vmul.f32 %v6401_v4, %v6531_v61 }
 0x33a   : > { %1973 = vrot.lane.b32.xlu1 %v1969_v62, %s8175_s3  ;;  %1955 = vrot.lane.b32.xlu0 %v1950_v47, %s8175_s3  ;;  %v2329_v51 = vmul.f32 %v6411_v26, %v6514_v48  ;;  %v2590_v5 = vmul.f32 %v6486_v20, %v6531_v61  ;;  %v2349_v15 = vmul.f32 %v6364_v14, %v6514_v48  ;;  %v6663_v20 = vpop.permute.xlu1 %2871  ;;  %v8273_v62 = vld [vmem:[#allocation43_spill] sm:$0xff]  ;;  %s8305_s3 = smov 124  }
 0x33b   : > { %v2610_v4 = vmul.f32 %v6488_v44, %v6531_v61  ;;  %v2369_v26 = vmul.f32 %v6421_v6, %v6514_v48  ;;  %v2670_v8 = vmul.f32 %v6423_v21, %v6531_v61  ;;  %v2389_v14 = vmul.f32 %v6371_v58, %v6514_v48  ;;  %8272 = vst [vmem:[#allocation55_spill] sm:$0xff] %v6663_v20 }
 0x33c   : > { %v2690_v36 = vmul.f32 %v6494_v55, %v6531_v61  ;;  %v2409_v6 = vmul.f32 %v6429_v23, %v6514_v48  ;;  %v2750_v21 = vmul.f32 %v6496_v33, %v6531_v61  ;;  %v2429_v58 = vmul.f32 %v6379_v10, %v6514_v48  ;;  %v8275_v10 = vld [vmem:[#allocation34_spill] sm:$0xff] }
 0x33d   : > { %v2770_v44 = vmul.f32 %v6431_v29, %v6531_v61  ;;  %v2449_v23 = vmul.f32 %v6437_v37, %v6514_v48  ;;  %v2650_v55 = vmul.f32 %v8273_v62, %v6531_v61  ;;  %v2469_v56 = vmul.f32 %v8275_v10, %v6514_v48  ;;  %v8307_v62 = vld [vmem:[#allocation16_spill] sm:$0xff] }
 0x33e   : > { %1993 = vrot.lane.b32.xlu1 %v1989_v50, %s8161_s29  ;;  %1995 = vrot.lane.b32.xlu0 %v1990_v53, %s8161_s29  ;;  %s8165_s29 = smov 102   ;;  %v6673_v33 = vpop.permute.xlu1 %2876  ;;  %v2730_v29 = vmul.f32 %v6504_v25, %v6531_v61  ;;  %v2489_v37 = vmul.f32 %v6443_v16, %v6514_v48  ;;  %v2810_v27 = vmul.f32 %v6506_v24, %v6531_v61 }
 0x33f   : > { %8274 = vst [vmem:[#allocation43_spill] sm:$0xff] %v6673_v33  ;;  %v2529_v16 = vmul.f32 %v6463_v59, %v6514_v48  ;;  %v2549_v24 = vmul.f32 %v6472_v9, %v6514_v48  ;;  %v6714_v59 = vld [vmem:[%s8260_s8] sm:$0xff]  ;;  %v8280_v9 = vld [vmem:[#allocation40_spill] sm:$0xff] }
 0x342   : > { %2013 = vrot.lane.b32.xlu1 %v2009_v32, %s8171_s19  ;;  %2035 = vrot.lane.b32.xlu0 %v2030_v43, %s8171_s19  ;;  %v6685_v50 = vpop.permute.xlu1 %2906  ;;  %v8277_v32 = vld [vmem:[#allocation36_spill] sm:$0xff] }
 0x343   : > { %8276 = vst [vmem:[#allocation34_spill] sm:$0xff] %v6685_v50  ;;  %v2509_v25 = vmul.f32 %v8277_v32, %v6514_v48  ;;  %v8312_v32 = vld [vmem:[#allocation20_spill] sm:$0xff] }
 0x346   : > { %2033 = vrot.lane.b32.xlu1 %v2029_v38, %s8171_s19  ;;  %2075 = vrot.lane.b32.xlu0 %v2070_v39, %s8171_s19 }
 0x34a   : > { %2053 = vrot.lane.b32.xlu1 %v2049_v7, %s8171_s19  ;;  %2115 = vrot.lane.b32.xlu0 %v2110_v45, %s8167_s22  ;;  %v2569_v7 = vmul.f32 %v6484_v18, %v6514_v48  ;;  %v8283_v18 = vld [vmem:[#allocation46_spill] sm:$0xff] }
 0x34b   : > { %v2629_v45 = vmul.f32 %v8283_v18, %v6514_v48  ;;  %v8317_v18 = vmov 9  }
 0x34e   : > { %2073 = vrot.lane.b32.xlu1 %v2069_v3, %s8171_s19  ;;  %2155 = vrot.lane.b32.xlu0 %v2150_v57, %s8163_s2  ;;  %s8177_s19 = smov 62   ;;  %v2589_v3 = vmul.f32 %v8280_v9, %v6514_v48  ;;  %v8284_v57 = vld [vmem:[#allocation45_spill] sm:$0xff] }
 0x352   : > { %2093 = vrot.lane.b32.xlu1 %v2089_v52, %s8167_s22  ;;  %2195 = vrot.lane.b32.xlu0 %v2190_v34, %s8213_s27  ;;  %v8282_v52 = vmov 2  }
 0x356   : > { %2113 = vrot.lane.b32.xlu1 %v2109_v13, %s8167_s22  ;;  %2235 = vrot.lane.b32.xlu0 %v2230_v60, %s8213_s27  ;;  %s8187_s22 = smov 77   ;;  %v8287_v60 = vmov 4  }
 0x35a   : > { %2133 = vrot.lane.b32.xlu1 %v2129_v31, %s8163_s2  ;;  %2275 = vrot.lane.b32.xlu0 %v2270_v1, %s8169_s28  ;;  %v8285_v31 = vld [vmem:[#allocation41_spill] sm:$0xff] }
 0x35b   : > { %v2609_v34 = vmul.f32 %v8285_v31, %v6514_v48 }
 0x35e   : > { %2153 = vrot.lane.b32.xlu1 %v2149_v41, %s8163_s2  ;;  %2315 = vrot.lane.b32.xlu0 %v2310_v42, %s8169_s28  ;;  %s8173_s2 = smov 88   ;;  %v8289_v42 = vmov 5  }
 0x362   : > { %2173 = vrot.lane.b32.xlu1 %v2169_v19, %s8213_s27  ;;  %2355 = vrot.lane.b32.xlu0 %v2350_v40, %s8217_s20  ;;  %v8288_v19 = vld [vmem:[#allocation49_spill] sm:$0xff] }
 0x363   : > { %v2669_v1 = vmul.f32 %v8288_v19, %v6514_v48  ;;  %v8320_v19 = vmov 10  }
 0x366   : > { %2193 = vrot.lane.b32.xlu1 %v2189_v0, %s8213_s27  ;;  %2395 = vrot.lane.b32.xlu0 %v2390_v30, %s8217_s20  ;;  %v8292_v30 = vmov 6  }
 0x36a   : > { %2213 = vrot.lane.b32.xlu1 %v2209_v28, %s8213_s27  ;;  %2435 = vrot.lane.b32.xlu0 %v2430_v11, %s8173_s2  ;;  %v8290_v28 = vld [vmem:[#allocation50_spill] sm:$0xff] }
 0x36b   : > { %v2689_v40 = vmul.f32 %v8290_v28, %v6514_v48 }
 0x36e   : > { %2233 = vrot.lane.b32.xlu1 %v2229_v22, %s8213_s27  ;;  %2475 = vrot.lane.b32.xlu0 %v2470_v35, %s8173_s2  ;;  %v8294_v35 = vmov 11  }
 0x372   : > { %2253 = vrot.lane.b32.xlu1 %v2249_v17, %s8165_s29  ;;  %2515 = vrot.lane.b32.xlu0 %v2510_v46, %s8214_s18  ;;  %s8181_s29 = smov 81   ;;  %v8293_v17 = vld [vmem:[#allocation42_spill] sm:$0xff] }
 0x373   : > { %v2749_v11 = vmul.f32 %v8293_v17, %v6514_v48  ;;  %v8323_v17 = vld [vmem:[#allocation27_spill] sm:$0xff] }
 0x376   : > { %2273 = vrot.lane.b32.xlu1 %v2269_v49, %s8169_s28  ;;  %2555 = vrot.lane.b32.xlu0 %v2550_v12, %s8181_s29  ;;  %v2649_v12 = vmul.f32 %v6500_v63, %v6514_v48  ;;  %v8301_v63 = vld [vmem:[#allocation44_spill] sm:$0xff] }
 0x37a   : > { %2293 = vrot.lane.b32.xlu1 %v2289_v2, %s8169_s28  ;;  %2595 = vrot.lane.b32.xlu0 %v2590_v5, %s8187_s22  ;;  %v8295_v2 = vld [vmem:[#allocation51_spill] sm:$0xff]  ;;  %v8297_v5 = vmov 15  }
 0x37b   : > { %v2769_v46 = vmul.f32 %v8295_v2, %v6514_v48 }
 0x37e   : > { %2313 = vrot.lane.b32.xlu1 %v2309_v54, %s8169_s28  ;;  %2615 = vrot.lane.b32.xlu0 %v2610_v4, %s8187_s22  ;;  %s8179_s28 = smov 73  }
 0x382   : > { %2333 = vrot.lane.b32.xlu1 %v2329_v51, %s8217_s20  ;;  %2675 = vrot.lane.b32.xlu0 %v2670_v8, %s8179_s28  ;;  %v8300_v8 = vmov 23  }
 0x386   : > { %2353 = vrot.lane.b32.xlu1 %v2349_v15, %s8217_s20  ;;  %2695 = vrot.lane.b32.xlu0 %v2690_v36, %s8185_s4  ;;  %v8298_v15 = vld [vmem:[#allocation52_spill] sm:$0xff] }
 0x387   : > { %v2729_v4 = vmul.f32 %v8298_v15, %v6514_v48 }
 0x38a   : > { %2373 = vrot.lane.b32.xlu1 %v2369_v26, %s8217_s20  ;;  %2755 = vrot.lane.b32.xlu0 %v2750_v21, %s8183_s16  ;;  %v8303_v21 = vld [vmem:[#allocation15_spill] sm:$0xff] }
 0x38e   : > { %2393 = vrot.lane.b32.xlu1 %v2389_v14, %s8217_s20  ;;  %2775 = vrot.lane.b32.xlu0 %v2770_v44, %s8183_s16  ;;  %v2809_v14 = vmul.f32 %v8301_v63, %v6514_v48  ;;  %v8327_v63 = vmov 17  }
 0x392   : > { %2413 = vrot.lane.b32.xlu1 %v2409_v6, %s8173_s2  ;;  %2655 = vrot.lane.b32.xlu0 %v2650_v55, %s8179_s28  ;;  %v8302_v6 = vmov 27   ;;  %v1970_v55 = vmul.f32 %v8307_v62, %v6531_v61  ;;  %v8331_v62 = vmov 21  }
 0x396   : > { %2433 = vrot.lane.b32.xlu1 %v2429_v58, %s8173_s2  ;;  %2735 = vrot.lane.b32.xlu0 %v2730_v29, %s8183_s16  ;;  %v1930_v58 = vmul.f32 %v8303_v21, %v6531_v61 }
 0x39a   : > { %2453 = vrot.lane.b32.xlu1 %v2449_v23, %s8173_s2  ;;  %2815 = vrot.lane.b32.xlu0 %v2810_v27, %s8177_s19  ;;  %v8306_v23 = vmov 35   ;;  %v8310_v27 = vmov 39  }
 0x39e   : > { %2473 = vrot.lane.b32.xlu1 %v2469_v56, %s8173_s2  ;;  %2914 = vperm.xlu0 %5246, %v6714_v59   ;;  %v8308_v56 = vld [vmem:[#allocation17_spill] sm:$0xff]  ;;  %s8311_s2 = smov 117  }
 0x39f   : > { %v2010_v29 = vmul.f32 %v8308_v56, %v6531_v61 }
 0x3a2   : > { %2493 = vrot.lane.b32.xlu1 %v2489_v37, %s8214_s18  ;;  %5249 = vset.pattern.permute.xlu0 %v8282_v52 }
 0x3a3   : > { %2930 = vperm.xlu0 %5249, %v8284_v57  }
 0x3a4   : > { %v6693_v47 = vpop.permute.xlu1 %1933 }
 0x3a5   : > { %8278 = vst [vmem:[#allocation36_spill] sm:$0xff] %v6693_v47 }
 0x3a6   : > { %2513 = vrot.lane.b32.xlu1 %v2509_v25, %s8214_s18  ;;  %v2050_v25 = vmul.f32 %v8312_v32, %v6531_v61  ;;  %v8334_v32 = vld [vmem:[#allocation31_spill] sm:$0xff] }
 0x3a7   : > { %5251 = vset.pattern.permute.xlu0 %v8287_v60 }
 0x3a8   : > { %v6698_v38 = vpop.permute.xlu1 %1953  ;;  %2950 = vperm.xlu0 %5251, %v6714_v59  }
 0x3aa   : > { %2533 = vrot.lane.b32.xlu1 %v2529_v16, %s8214_s18 }
 0x3ac   : > { %v6703_v53 = vpop.permute.xlu1 %1973  ;;  %5254 = vset.pattern.permute.xlu0 %v8289_v42 }
 0x3ad   : > { %8279 = vst [vmem:[#allocation56_spill] sm:$0xff] %v6703_v53  ;;  %2974 = vperm.xlu0 %5254, %v8284_v57  }
 0x3ae   : > { %2553 = vrot.lane.b32.xlu1 %v2549_v24, %s8181_s29  ;;  %v8313_v24 = vmov 47   ;;  %s8328_s29 = smov 102  }
 0x3b0   : > { %v6708_v43 = vpop.permute.xlu1 %1993 }
 0x3b1   : > { %5255 = vset.pattern.permute.xlu0 %v8292_v30 }
 0x3b2   : > { %2573 = vrot.lane.b32.xlu1 %v2569_v7, %s8187_s22  ;;  %2990 = vperm.xlu0 %5255, %v6714_v59   ;;  %v8314_v7 = vld [vmem:[#allocation23_spill] sm:$0xff] }
 0x3b3   : > { %v2090_v9 = vmul.f32 %v8314_v7, %v6531_v61 }
 0x3b4   : > { %v6719_v39 = vpop.permute.xlu1 %2013 }
 0x3b5   : > { %8281 = vst [vmem:[#allocation40_spill] sm:$0xff] %v6719_v39 }
 0x3b6   : > { %2593 = vrot.lane.b32.xlu1 %v2589_v3, %s8187_s22  ;;  %5257 = vset.pattern.permute.xlu0 %v8294_v35 }
 0x3b7   : > { %3090 = vperm.xlu0 %5257, %v6714_v59  }
 0x3b8   : > { %v6725_v13 = vpop.permute.xlu1 %2033 }
 0x3ba   : > { %2633 = vrot.lane.b32.xlu1 %v2629_v45, %s8187_s22  ;;  %v8318_v45 = vld [vmem:[#allocation25_spill] sm:$0xff] }
 0x3bb   : > { %5260 = vset.pattern.permute.xlu0 %v8297_v5  ;;  %v2130_v31 = vmul.f32 %v8318_v45, %v6531_v61  ;;  %v8336_v45 = vld [vmem:[#allocation32_spill] sm:$0xff] }
 0x3bc   : > { %v6731_v41 = vpop.permute.xlu1 %2053  ;;  %3174 = vperm.xlu0 %5260, %v8284_v57  }
 0x3bd   : > { %8286 = vst [vmem:[#allocation46_spill] sm:$0xff] %v6731_v41 }
 0x3be   : > { %2613 = vrot.lane.b32.xlu1 %v2609_v34, %s8187_s22 }
 0x3c0   : > { %v6738_v0 = vpop.permute.xlu1 %2073  ;;  %5262 = vset.pattern.permute.xlu0 %v8300_v8 }
 0x3c1   : > { %3330 = vperm.xlu0 %5262, %v6714_v59  }
 0x3c2   : > { %2673 = vrot.lane.b32.xlu1 %v2669_v1, %s8179_s28  ;;  %v8321_v1 = vld [vmem:[#allocation26_spill] sm:$0xff] }
 0x3c3   : > { %v2170_v28 = vmul.f32 %v8321_v1, %v6531_v61 }
 0x3c4   : > { %v6745_v22 = vpop.permute.xlu1 %2093 }
 0x3c5   : > { %8291 = vst [vmem:[#allocation45_spill] sm:$0xff] %v6745_v22  ;;  %5265 = vset.pattern.permute.xlu0 %v8302_v6 }
 0x3c6   : > { %2693 = vrot.lane.b32.xlu1 %v2689_v40, %s8185_s4  ;;  %3414 = vperm.xlu0 %5265, %v8284_v57   ;;  %s8338_s4 = smov 88  }
 0x3c8   : > { %v6752_v49 = vpop.permute.xlu1 %2113 }
 0x3ca   : > { %2753 = vrot.lane.b32.xlu1 %v2749_v11, %s8183_s16  ;;  %5267 = vset.pattern.permute.xlu0 %v8306_v23  ;;  %v2210_v11 = vmul.f32 %v8323_v17, %v6531_v61  ;;  %v8339_v17 = vld [vmem:[#allocation33_spill] sm:$0xff] }
 0x3cb   : > { %3570 = vperm.xlu0 %5267, %v6714_v59  }
 0x3cc   : > { %v6758_v54 = vpop.permute.xlu1 %2133 }
 0x3cd   : > { %8296 = vst [vmem:[#allocation41_spill] sm:$0xff] %v6758_v54  ;;  %v8371_v54 = vmov 43  }
 0x3ce   : > { %2773 = vrot.lane.b32.xlu1 %v2769_v46, %s8183_s16  ;;  %v8324_v46 = vmov 14  }
 0x3cf   : > { %5270 = vset.pattern.permute.xlu0 %v8310_v27 }
 0x3d0   : > { %v6764_v51 = vpop.permute.xlu1 %2153  ;;  %3654 = vperm.xlu0 %5270, %v8284_v57  }
 0x3d2   : > { %2653 = vrot.lane.b32.xlu1 %v2649_v12, %s8179_s28  ;;  %s8319_s28 = smov 110   ;;  %v8325_v12 = vld [vmem:[#allocation28_spill] sm:$0xff] }
 0x3d3   : > { %v2250_v15 = vmul.f32 %v8325_v12, %v6531_v61 }
 0x3d4   : > { %v6771_v26 = vpop.permute.xlu1 %2173  ;;  %5272 = vset.pattern.permute.xlu0 %v8313_v24 }
 0x3d5   : > { %8299 = vst [vmem:[#allocation49_spill] sm:$0xff] %v6771_v26  ;;  %3810 = vperm.xlu0 %5272, %v6714_v59  }
 0x3d6   : > { %2733 = vrot.lane.b32.xlu1 %v2729_v4, %s8183_s16  ;;  %s8330_s16 = smov 99  }
 0x3d8   : > { %v6778_v36 = vpop.permute.xlu1 %2193 }
 0x3d9   : > { %5275 = vset.pattern.permute.xlu0 %v8317_v18 }
 0x3da   : > { %2813 = vrot.lane.b32.xlu1 %v2809_v14, %s8177_s19  ;;  %s8316_s19 = smov 113   ;;  %3050 = vperm.xlu0 %5275, %v6714_v59   ;;  %v8329_v14 = vld [vmem:[#allocation29_spill] sm:$0xff] }
 0x3db   : > { %v2290_v21 = vmul.f32 %v8329_v14, %v6531_v61  ;;  %v8340_v14 = vld [vmem:[#allocation35_spill] sm:$0xff] }
 0x3dc   : > { %v6785_v44 = vpop.permute.xlu1 %2213 }
 0x3dd   : > { %8304 = vst [vmem:[#allocation50_spill] sm:$0xff] %v6785_v44 }
 0x3de   : > { %1935 = vrot.lane.b32.xlu1 %v1930_v58, %s8305_s3  ;;  %5278 = vset.pattern.permute.xlu0 %v8320_v19 }
 0x3df   : > { %3074 = vperm.xlu0 %5278, %v8284_v57  }
 0x3e0   : > { %v6791_v10 = vpop.permute.xlu1 %2233 }
 0x3e2   : > { %1975 = vrot.lane.b32.xlu1 %v1970_v55, %s8305_s3  ;;  %v8332_v55 = vld [vmem:[#allocation30_spill] sm:$0xff] }
 0x3e3   : > { %5280 = vset.pattern.permute.xlu0 %v8324_v46  ;;  %v2330_v56 = vmul.f32 %v8332_v55, %v6531_v61 }
 0x3e4   : > { %v6797_v37 = vpop.permute.xlu1 %2253  ;;  %3150 = vperm.xlu0 %5280, %v6714_v59  }
 0x3e5   : > { %8309 = vst [vmem:[#allocation42_spill] sm:$0xff] %v6797_v37 }
 0x3e6   : > { %2015 = vrot.lane.b32.xlu1 %v2010_v29, %s8311_s2 }
 0x3e8   : > { %v6804_v16 = vpop.permute.xlu1 %2273  ;;  %5283 = vset.pattern.permute.xlu0 %v8327_v63 }
 0x3e9   : > { %3214 = vperm.xlu0 %5283, %v8284_v57  }
 0x3ea   : > { %2055 = vrot.lane.b32.xlu1 %v2050_v25, %s8311_s2  ;;  %v2370_v25 = vmul.f32 %v8334_v32, %v6531_v61 }
 0x3ec   : > { %v6811_v3 = vpop.permute.xlu1 %2293 }
 0x3ed   : > { %8315 = vst [vmem:[#allocation51_spill] sm:$0xff] %v6811_v3  ;;  %5285 = vset.pattern.permute.xlu0 %v8331_v62 }
 0x3ee   : > { %2095 = vrot.lane.b32.xlu1 %v2090_v9, %s8316_s19  ;;  %v6857_v9 = vpop.permute.xlu0 %2860 }
 0x3ef   : > { %8335 = vst [vmem:[#allocation16_spill] sm:$0xff] %v6857_v9  ;;  %v8357_v9 = vmov 7  }
 0x3f0   : > { %v6818_v34 = vpop.permute.xlu1 %2313 }
 0x3f2   : > { %2135 = vrot.lane.b32.xlu1 %v2130_v31, %s8319_s28  ;;  %v2410_v31 = vmul.f32 %v8336_v45, %v6531_v61 }
 0x3f4   : > { %v6824_v40 = vpop.permute.xlu1 %2333 }
 0x3f5   : > { %8322 = vst [vmem:[#allocation52_spill] sm:$0xff] %v6824_v40 }
 0x3f6   : > { %2175 = vrot.lane.b32.xlu1 %v2170_v28, %s8213_s27  ;;  %v6865_v28 = vpop.permute.xlu0 %1890 }
 0x3f8   : > { %v6830_v2 = vpop.permute.xlu1 %2353 }
 0x3fa   : > { %2215 = vrot.lane.b32.xlu1 %v2210_v11, %s8213_s27  ;;  %v2450_v11 = vmul.f32 %v8339_v17, %v6531_v61 }
 0x3fc   : > { %v6837_v4 = vpop.permute.xlu1 %2373 }
 0x3fd   : > { %8326 = vst [vmem:[#allocation44_spill] sm:$0xff] %v6837_v4 }
 0x3fe   : > { %2255 = vrot.lane.b32.xlu1 %v2250_v15, %s8328_s29  ;;  %v6872_v15 = vpop.permute.xlu0 %2713 }
 0x400   : > { %v6844_v58 = vpop.permute.xlu1 %2393 }
 0x402   : > { %2295 = vrot.lane.b32.xlu1 %v2290_v21, %s8330_s16  ;;  %v2490_v21 = vmul.f32 %v8340_v14, %v6531_v61  ;;  %v6883_v45 = vpop.permute.xlu0 %2793 }
 0x404   : > { %v6850_v29 = vpop.permute.xlu1 %2413 }
 0x405   : > { %8333 = vst [vmem:[#allocation15_spill] sm:$0xff] %v6850_v29 }
 0x406   : > { %2335 = vrot.lane.b32.xlu1 %v2330_v56, %s8217_s20  ;;  %v8342_v56 = vld [vmem:[#allocation37_spill] sm:$0xff]  ;;  %v6891_v14 = vpop.permute.xlu0 %1955 }
 0x407   : > { %v2530_v32 = vmul.f32 %v8342_v56, %v6531_v61  ;;  %v8346_v56 = vld [vmem:[#allocation48_spill] sm:$0xff] }
 0x408   : > { %v6855_v7 = vpop.permute.xlu1 %2433 }
 0x40a   : > { %2375 = vrot.lane.b32.xlu1 %v2370_v25, %s8217_s20  ;;  %v6902_v29 = vpop.permute.xlu0 %1995 }
 0x40c   : > { %v6862_v1 = vpop.permute.xlu1 %2453 }
 0x40d   : > { %8337 = vst [vmem:[#allocation17_spill] sm:$0xff] %v6862_v1 }
 0x40e   : > { %2415 = vrot.lane.b32.xlu1 %v2410_v31, %s8338_s4  ;;  %v8343_v31 = vld [vmem:[#allocation39_spill] sm:$0xff] }
 0x40f   : > { %v2570_v17 = vmul.f32 %v8343_v31, %v6531_v61  ;;  %v8349_v31 = vld [vmem:[#allocation38_spill] sm:$0xff] }
 0x410   : > { %v6869_v12 = vpop.permute.xlu1 %2473 }
 0x412   : > { %2455 = vrot.lane.b32.xlu1 %v2450_v11, %s8338_s4 }
 0x414   : > { %v6876_v55 = vpop.permute.xlu1 %2493 }
 0x415   : > { %8341 = vst [vmem:[#allocation20_spill] sm:$0xff] %v6876_v55  ;;  %v2710_v55 = vmul.f32 %v8346_v56, %v6531_v61 }
 0x416   : > { %2495 = vrot.lane.b32.xlu1 %v2490_v21, %s8214_s18  ;;  %v8345_v21 = vld [vmem:[#allocation47_spill] sm:$0xff] }
 0x417   : > { %v2630_v50 = vmul.f32 %v8345_v21, %v6531_v61  ;;  %v6910_v21 = vpop.permute.xlu0 %2035 }
 0x418   : > { %v6881_v25 = vpop.permute.xlu1 %2513 }
 0x41a   : > { %2535 = vrot.lane.b32.xlu1 %v2530_v32, %s8214_s18 }
 0x41b   : > { %v6917_v56 = vpop.permute.xlu0 %2075 }
 0x41c   : > { %v6888_v11 = vpop.permute.xlu1 %2533 }
 0x41d   : > { %8344 = vst [vmem:[#allocation23_spill] sm:$0xff] %v6888_v11 }
 0x41e   : > { %2575 = vrot.lane.b32.xlu1 %v2570_v17, %s8187_s22  ;;  %v2790_v17 = vmul.f32 %v8349_v31, %v6531_v61 }
 0x41f   : > { %v6923_v31 = vpop.permute.xlu0 %2115 }
 0x420   : > { %v6895_v20 = vpop.permute.xlu1 %2553 }
 0x422   : > { %2635 = vrot.lane.b32.xlu1 %v2630_v50, %s8187_s22  ;;  %s8189_s22 = smov 127  }
 0x423   : > { %v6932_v22 = vpop.permute.xlu0 %2155 }
 0x424   : > { %v6900_v32 = vpop.permute.xlu1 %2573 }
 0x425   : > { %8347 = vst [vmem:[#allocation25_spill] sm:$0xff] %v6900_v32  ;;  %v8352_v32 = vmov 3  }
 0x426   : > { %2715 = vrot.lane.b32.xlu1 %v2710_v55, %s8348_s5 }
 0x428   : > { %v6907_v40 = vpop.permute.xlu1 %2593 }
 0x42a   : > { %2795 = vrot.lane.b32.xlu1 %v2790_v17, %s8350_s6 }
 0x42c   : > { %v6912_v37 = vpop.permute.xlu1 %2633 }
 0x42e   : > { %2918 = vperm.xlu1 %5247, %v8284_v57  }
 0x430   : > { %v6915_v50 = vpop.permute.xlu1 %2613 }
 0x431   : > { %8351 = vst [vmem:[#allocation26_spill] sm:$0xff] %v6915_v50  ;;  %v8361_v50 = vmov 19  }
 0x432   : > { %5248 = vset.pattern.permute.xlu1 %v8282_v52  ;;  %v6938_v52 = vpop.permute.xlu0 %2195 }
 0x433   : > { %2926 = vperm.xlu1 %5248, %v6714_v59  }
 0x434   : > { %v6921_v55 = vpop.permute.xlu1 %2673 }
 0x436   : > { %v2236_v33 = vpop.permute.xlu0 %2235 }
 0x437   : > { %5250 = vset.pattern.permute.xlu1 %v8352_v32 }
 0x438   : > { %v6926_v17 = vpop.permute.xlu1 %2693  ;;  %2938 = vperm.xlu1 %5250, %v6714_v59  }
 0x439   : > { %8353 = vst [vmem:[#allocation27_spill] sm:$0xff] %v6926_v17 }
 0x43c   : > { %v6929_v26 = vpop.permute.xlu1 %2753  ;;  %2942 = vperm.xlu1 %5250, %v8284_v57  }
 0x440   : > { %v6934_v39 = vpop.permute.xlu1 %2773  ;;  %5252 = vset.pattern.permute.xlu1 %v8287_v60  ;;  %v6950_v60 = vpop.permute.xlu0 %2275 }
 0x441   : > { %8354 = vst [vmem:[#allocation28_spill] sm:$0xff] %v6934_v39  ;;  %2954 = vperm.xlu1 %5252, %v8284_v57  }
 0x444   : > { %v6940_v47 = vpop.permute.xlu1 %2653 }
 0x445   : > { %8355 = vst [vmem:[#allocation29_spill] sm:$0xff] %v6940_v47  ;;  %5253 = vset.pattern.permute.xlu1 %v8289_v42 }
 0x446   : > { %2970 = vperm.xlu1 %5253, %v6714_v59  }
 0x448   : > { %v6944_v32 = vpop.permute.xlu1 %2733 }
 0x449   : > { %8356 = vst [vmem:[#allocation30_spill] sm:$0xff] %v6944_v32  ;;  %v2316_v32 = vpop.permute.xlu0 %2315 }
 0x44a   : > { %5256 = vset.pattern.permute.xlu1 %v8357_v9 }
 0x44b   : > { %3010 = vperm.xlu1 %5256, %v6714_v59  }
 0x44c   : > { %v6948_v39 = vpop.permute.xlu1 %2813 }
 0x44d   : > { %8358 = vst [vmem:[#allocation31_spill] sm:$0xff] %v6948_v39  ;;  %v2356_v39 = vpop.permute.xlu0 %2355 }
 0x44f   : > { %3014 = vperm.xlu1 %5256, %v8284_v57  }
 0x450   : > { %v6953_v17 = vpop.permute.xlu1 %1935 }
 0x451   : > { %8359 = vst [vmem:[#allocation32_spill] sm:$0xff] %v6953_v17 }
 0x453   : > { %5258 = vset.pattern.permute.xlu1 %v8294_v35  ;;  %v2396_v35 = vpop.permute.xlu0 %2395 }
 0x454   : > { %3094 = vperm.xlu1 %5258, %v8284_v57   ;;  %v6957_v42 = vpop.permute.xlu1 %1975 }
 0x458   : > { %5259 = vset.pattern.permute.xlu1 %v8297_v5  ;;  %v6960_v9 = vpop.permute.xlu1 %2015  ;;  %v2436_v5 = vpop.permute.xlu0 %2435 }
 0x459   : > { %8360 = vst [vmem:[#allocation33_spill] sm:$0xff] %v6960_v9  ;;  %3170 = vperm.xlu1 %5259, %v6714_v59  }
 0x45c   : > { %v6963_v47 = vpop.permute.xlu1 %2055  ;;  %v2476_v1 = vpop.permute.xlu0 %2475 }
 0x45d   : > { %5261 = vset.pattern.permute.xlu1 %v8361_v50 }
 0x45e   : > { %3250 = vperm.xlu1 %5261, %v6714_v59  }
 0x460   : > { %v6967_v17 = vpop.permute.xlu1 %2095  ;;  %v2516_v3 = vpop.permute.xlu0 %2515 }
 0x461   : > { %8362 = vst [vmem:[#allocation35_spill] sm:$0xff] %v6967_v17  ;;  %v8365_v17 = vmov 31  }
 0x462   : > { %3254 = vperm.xlu1 %5261, %v8284_v57  }
 0x464   : > { %v6970_v11 = vpop.permute.xlu1 %2135 }
 0x466   : > { %5263 = vset.pattern.permute.xlu1 %v8300_v8 }
 0x467   : > { %3334 = vperm.xlu1 %5263, %v8284_v57  }
 0x468   : > { %v6974_v9 = vpop.permute.xlu1 %2175 }
 0x469   : > { %8363 = vst [vmem:[#allocation37_spill] sm:$0xff] %v6974_v9  ;;  %v2556_v9 = vpop.permute.xlu0 %2555 }
 0x46b   : > { %5264 = vset.pattern.permute.xlu1 %v8302_v6 }
 0x46c   : > { %3410 = vperm.xlu1 %5264, %v6714_v59   ;;  %v6978_v50 = vpop.permute.xlu1 %2215 }
 0x46d   : > { %8364 = vst [vmem:[#allocation39_spill] sm:$0xff] %v6978_v50 }
 0x470   : > { %5266 = vset.pattern.permute.xlu1 %v8365_v17  ;;  %v6981_v4 = vpop.permute.xlu1 %2255  ;;  %v2596_v17 = vpop.permute.xlu0 %2595 }
 0x471   : > { %8366 = vst [vmem:[#allocation47_spill] sm:$0xff] %v6981_v4  ;;  %3490 = vperm.xlu1 %5266, %v6714_v59  }
 0x474   : > { %v6984_v8 = vpop.permute.xlu1 %2295 }
 0x475   : > { %8367 = vst [vmem:[#allocation48_spill] sm:$0xff] %v6984_v8  ;;  %3494 = vperm.xlu1 %5266, %v8284_v57  }
 0x478   : > { %v6987_v44 = vpop.permute.xlu1 %2335 }
 0x479   : > { %8368 = vst [vmem:[#allocation38_spill] sm:$0xff] %v6987_v44  ;;  %5268 = vset.pattern.permute.xlu1 %v8306_v23  ;;  %v7001_v44 = vpop.permute.xlu0 %2615  ;;  %v8374_v23 = vld [vmem:[#allocation24_spill] sm:$0xff] }
 0x47a   : > { %3574 = vperm.xlu1 %5268, %v8284_v57   ;;  %8373 = vst [vmem:[#allocation60_spill] sm:$0xff] %v7001_v44  ;;  %v1918_v53 = vmul.f32 %v8374_v23, %v6531_v61 }
 0x47c   : > { %v6991_v6 = vpop.permute.xlu1 %2375 }
 0x47d   : > { %8369 = vst [vmem:[#allocation57_spill] sm:$0xff] %v6991_v6  ;;  %v2676_v8 = vpop.permute.xlu0 %2675 }
 0x47e   : > { %5269 = vset.pattern.permute.xlu1 %v8310_v27  ;;  %v2000_v27 = vadd.f32 %v6902_v29, %v1918_v53 }
 0x47f   : > { %3650 = vperm.xlu1 %5269, %v6714_v59  }
 0x480   : > { %v6995_v4 = vpop.permute.xlu1 %2415 }
 0x481   : > { %8370 = vst [vmem:[#allocation58_spill] sm:$0xff] %v6995_v4  ;;  %v1894_v4 = vmul.f32 %v6865_v28, %v6531_v61 }
 0x483   : > { %5271 = vset.pattern.permute.xlu1 %v8371_v54  ;;  %v2080_v54 = vadd.f32 %v6917_v56, %v2000_v27  ;;  %v1960_v44 = vadd.f32 %v6891_v14, %v1894_v4  ;;  %v7022_v56 = vpop.permute.xlu0 %2695 }
 0x484   : > { %3730 = vperm.xlu1 %5271, %v6714_v59   ;;  %v6999_v41 = vpop.permute.xlu1 %2455 }
 0x485   : > { %8372 = vst [vmem:[#allocation59_spill] sm:$0xff] %v6999_v41  ;;  %v2160_v23 = vadd.f32 %v6932_v22, %v2080_v54 }
 0x487   : > { %v2240_v50 = vadd.f32 %v2236_v33, %v2160_v23  ;;  %v8378_v23 = vld [vmem:[#allocation19_spill] sm:$0xff] }
 0x488   : > { %3734 = vperm.xlu1 %5271, %v8284_v57   ;;  %v7006_v6 = vpop.permute.xlu1 %2495 }
 0x489   : > { %8375 = vst [vmem:[#allocation24_spill] sm:$0xff] %v7006_v6  ;;  %v2040_v6 = vadd.f32 %v6910_v21, %v1960_v44  ;;  %v2320_v28 = vadd.f32 %v2316_v32, %v2240_v50  ;;  %v2756_v21 = vpop.permute.xlu0 %2755 }
 0x48b   : > { %v2120_v29 = vadd.f32 %v6923_v31, %v2040_v6  ;;  %v2400_v4 = vadd.f32 %v2396_v35, %v2320_v28 }
 0x48c   : > { %5273 = vset.pattern.permute.xlu1 %v8313_v24  ;;  %v7013_v41 = vpop.permute.xlu1 %2535 }
 0x48d   : > { %3814 = vperm.xlu1 %5273, %v8284_v57   ;;  %v2200_v24 = vadd.f32 %v6938_v52, %v2120_v29  ;;  %v2480_v27 = vadd.f32 %v2476_v1, %v2400_v4  ;;  %v1893_v29 = vmul.f32 %v8378_v23, %v6514_v48 }
 0x48f   : > { %v2280_v14 = vadd.f32 %v6950_v60, %v2200_v24  ;;  %v2560_v44 = vadd.f32 %v2556_v9, %v2480_v27  ;;  %v7032_v60 = vpop.permute.xlu0 %2775  ;;  %v1959_v4 = vadd.f32 %v6698_v38, %v1893_v29  ;;  %v8382_v27 = vmov 25  }
 0x490   : > { %v7019_v53 = vpop.permute.xlu1 %2575 }
 0x491   : > { %5274 = vset.pattern.permute.xlu1 %v8292_v30  ;;  %v2360_v33 = vadd.f32 %v2356_v39, %v2280_v14  ;;  %v8376_v39 = vld [vmem:[#allocation14_spill] sm:$0xff] }
 0x492   : > { %2994 = vperm.xlu1 %5274, %v8284_v57   ;;  %v1917_v9 = vmul.f32 %v8376_v39, %v6514_v48 }
 0x493   : > { %v2440_v32 = vadd.f32 %v2436_v5, %v2360_v33  ;;  %v8377_v5 = vmov 13   ;;  %v7040_v54 = vpop.permute.xlu0 %2655 }
 0x494   : > { %v2636_v22 = vpop.permute.xlu1 %2635 }
 0x495   : > { %v2640_v50 = vadd.f32 %v2636_v22, %v2560_v44  ;;  %v2520_v30 = vadd.f32 %v2516_v3, %v2440_v32  ;;  %v2039_v22 = vadd.f32 %v6725_v13, %v1959_v4 }
 0x496   : > { %5276 = vset.pattern.permute.xlu1 %v8317_v18 }
 0x497   : > { %3054 = vperm.xlu1 %5276, %v8284_v57   ;;  %v2600_v35 = vadd.f32 %v2596_v17, %v2520_v30  ;;  %v7050_v24 = vpop.permute.xlu0 %2735 }
 0x498   : > { %v2716_v31 = vpop.permute.xlu1 %2715 }
 0x499   : > { %v2720_v6 = vadd.f32 %v2716_v31, %v2640_v50  ;;  %v2680_v18 = vadd.f32 %v2676_v8, %v2600_v35  ;;  %v8389_v50 = vmov 29  }
 0x49b   : > { %5277 = vset.pattern.permute.xlu1 %v8320_v19  ;;  %v2760_v3 = vadd.f32 %v2756_v21, %v2680_v18  ;;  %v1999_v19 = vadd.f32 %v6708_v43, %v1917_v9  ;;  %v7067_v38 = vpop.permute.xlu0 %2815  ;;  %v8397_v9 = vmov 38  }
 0x49c   : > { %3070 = vperm.xlu1 %5277, %v6714_v59   ;;  %v2796_v52 = vpop.permute.xlu1 %2795 }
 0x49d   : > { %v2800_v1 = vadd.f32 %v2796_v52, %v2720_v6  ;;  %v2079_v17 = vadd.f32 %v6738_v0, %v1999_v19  ;;  %v8390_v6 = vmov 30  }
 0x49f   : > { %2835 = vrot.lane.b32.xlu0 %v2800_v1, %s8189_s22  ;;  %v2159_v8 = vadd.f32 %v6764_v51, %v2079_v17  ;;  %v8380_v51 = vmov 22   ;;  %v7079_v33 = vpop.permute.xlu0 %2914  ;;  %v8395_v1 = vmov 37  }
 0x4a0   : > { %5279 = vset.pattern.permute.xlu1 %v8377_v5  ;;  %8385 = vst [vmem:[#allocation62_spill] sm:$0xff] %v7079_v33 }
 0x4a1   : > { %3130 = vperm.xlu1 %5279, %v6714_v59   ;;  %v2239_v28 = vadd.f32 %v6791_v10, %v2159_v8  ;;  %v2119_v10 = vadd.f32 %v6752_v49, %v2039_v22 }
 0x4a3   : > { %2825 = vrot.lane.b32.xlu0 %v2760_v3, %s8189_s22  ;;  %v2319_v0 = vadd.f32 %v6818_v34, %v2239_v28  ;;  %v2199_v34 = vadd.f32 %v6778_v36, %v2119_v10  ;;  %v8386_v36 = vmov 26   ;;  %v8404_v10 = vld [vmem:[#allocation22_spill] sm:$0xff] }
 0x4a5   : > { %3134 = vperm.xlu1 %5279, %v8284_v57   ;;  %v2399_v48 = vadd.f32 %v6844_v58, %v2319_v0  ;;  %v2279_v49 = vadd.f32 %v6804_v16, %v2199_v34 }
 0x4a7   : > { %3290 = vperm.xlu0 %5285, %v6714_v59   ;;  %v2359_v44 = vadd.f32 %v6830_v2, %v2279_v49 }
 0x4a9   : > { %5281 = vset.pattern.permute.xlu1 %v8324_v46  ;;  %v7053_v43 = vpop.permute.xlu1 %2918  ;;  %v2479_v46 = vadd.f32 %v6869_v12, %v2399_v48  ;;  %v8383_v12 = vmov 18  }
 0x4aa   : > { %8379 = vst [vmem:[#allocation14_spill] sm:$0xff] %v7053_v43  ;;  %3154 = vperm.xlu1 %5281, %v8284_v57   ;;  %v8429_v43 = vmov 8  }
 0x4ab   : > { %5288 = vset.pattern.permute.xlu0 %v8380_v51  ;;  %v2559_v13 = vadd.f32 %v6895_v20, %v2479_v46  ;;  %v2439_v20 = vadd.f32 %v6855_v7, %v2359_v44  ;;  %v1906_v46 = vmul.f32 %v8404_v10, %v6531_v61 }
 0x4ac   : > { %3314 = vperm.xlu0 %5288, %v8284_v57  }
 0x4ad   : > { %v2639_v58 = vadd.f32 %v6912_v37, %v2559_v13  ;;  %v7089_v37 = vpop.permute.xlu0 %2930  ;;  %v2519_v31 = vadd.f32 %v6881_v25, %v2439_v20  ;;  %v8406_v13 = vmov 41  }
 0x4ae   : > { %5282 = vset.pattern.permute.xlu1 %v8327_v63  ;;  %v7065_v14 = vpop.permute.xlu1 %2926  ;;  %8388 = vst [vmem:[#allocation64_spill] sm:$0xff] %v7089_v37 }
 0x4af   : > { %8381 = vst [vmem:[#allocation19_spill] sm:$0xff] %v7065_v14  ;;  %3210 = vperm.xlu1 %5282, %v6714_v59   ;;  %v2719_v21 = vadd.f32 %v6872_v15, %v2639_v58  ;;  %v2599_v2 = vadd.f32 %v6907_v40, %v2519_v31  ;;  %v8425_v14 = vmov 46  }
 0x4b0   : > { %5289 = vset.pattern.permute.xlu0 %v8382_v27 }
 0x4b1   : > { %3370 = vperm.xlu0 %5289, %v6714_v59   ;;  %v2799_v32 = vadd.f32 %v6883_v45, %v2719_v21  ;;  %v2679_v7 = vadd.f32 %v6921_v55, %v2599_v2  ;;  %v7101_v30 = vpop.permute.xlu0 %2950  ;;  %v8392_v55 = vmov 33   ;;  %v8408_v21 = vld [vmem:[#allocation48_spill] sm:$0xff] }
 0x4b3   : > { %5284 = vset.pattern.permute.xlu1 %v8383_v12  ;;  %v7077_v63 = vpop.permute.xlu1 %2938  ;;  %v2759_v25 = vadd.f32 %v6929_v26, %v2679_v7  ;;  %v8411_v7 = vld [vmem:[#allocation59_spill] sm:$0xff] }
 0x4b4   : > { %8384 = vst [vmem:[#allocation61_spill] sm:$0xff] %v7077_v63  ;;  %3230 = vperm.xlu1 %5284, %v6714_v59   ;;  %v8444_v63 = vmov 28  }
 0x4b5   : > { %5292 = vset.pattern.permute.xlu0 %v8386_v36  ;;  %v7110_v45 = vpop.permute.xlu0 %2974 }
 0x4b6   : > { %3394 = vperm.xlu0 %5292, %v8284_v57   ;;  %8391 = vst [vmem:[#allocation65_spill] sm:$0xff] %v7110_v45 }
 0x4b7   : > { %v7087_v16 = vpop.permute.xlu1 %2942 }
 0x4b8   : > { %8387 = vst [vmem:[#allocation63_spill] sm:$0xff] %v7087_v16  ;;  %3234 = vperm.xlu1 %5284, %v8284_v57   ;;  %v8433_v16 = vmov 12  }
 0x4b9   : > { %v7118_v26 = vpop.permute.xlu0 %2990 }
 0x4ba   : > { %5293 = vset.pattern.permute.xlu0 %v8389_v50 }
 0x4bb   : > { %3450 = vperm.xlu0 %5293, %v6714_v59  }
 0x4bc   : > { %v7098_v15 = vpop.permute.xlu1 %2954  ;;  %2833 = vrot.lane.b32.xlu1 %v2799_v32, %s8189_s22  ;;  %v8410_v32 = vld [vmem:[#allocation57_spill] sm:$0xff] }
 0x4bd   : > { %5286 = vset.pattern.permute.xlu1 %v8331_v62  ;;  %v8393_v62 = vmov 34   ;;  %v7130_v39 = vpop.permute.xlu0 %3090 }
 0x4bf   : > { %5296 = vset.pattern.permute.xlu0 %v8390_v6 }
 0x4c0   : > { %2823 = vrot.lane.b32.xlu1 %v2759_v25, %s8189_s22  ;;  %3474 = vperm.xlu0 %5296, %v8284_v57   ;;  %s8482_s22 = smov 77  }
 0x4c1   : > { %v7108_v40 = vpop.permute.xlu1 %2970  ;;  %v7138_v3 = vpop.permute.xlu0 %3174 }
 0x4c2   : > { %8398 = vst [vmem:[#allocation68_spill] sm:$0xff] %v7138_v3 }
 0x4c4   : > { %5297 = vset.pattern.permute.xlu0 %v8392_v55  ;;  %3294 = vperm.xlu1 %5286, %v8284_v57  }
 0x4c5   : > { %3530 = vperm.xlu0 %5297, %v6714_v59   ;;  %v7144_v17 = vpop.permute.xlu0 %3330 }
 0x4c6   : > { %v7115_v52 = vpop.permute.xlu1 %3010 }
 0x4c8   : > { %5287 = vset.pattern.permute.xlu1 %v8380_v51  ;;  %v7168_v51 = vld [vmem:[%s8260_s8 + $0x8] sm:$0xff] }
 0x4c9   : > { %5300 = vset.pattern.permute.xlu0 %v8393_v62  ;;  %3310 = vperm.xlu1 %5287, %v6714_v59   ;;  %v7150_v23 = vpop.permute.xlu0 %3414 }
 0x4ca   : > { %v7122_v35 = vpop.permute.xlu1 %3014  ;;  %3554 = vperm.xlu0 %5300, %v8284_v57   ;;  %8400 = vst [vmem:[#allocation70_spill] sm:$0xff] %v7150_v23 }
 0x4cb   : > { %8394 = vst [vmem:[#allocation66_spill] sm:$0xff] %v7122_v35  ;;  %v8470_v35 = vld [vmem:[#allocation52_spill] sm:$0xff] }
 0x4cd   : > { %5290 = vset.pattern.permute.xlu1 %v8382_v27  ;;  %v7159_v4 = vpop.permute.xlu0 %3570  ;;  %v1980_v27 = vadd.f32 %v6957_v42, %v1906_v46 }
 0x4ce   : > { %5301 = vset.pattern.permute.xlu0 %v8395_v1  ;;  %3374 = vperm.xlu1 %5290, %v8284_v57  }
 0x4cf   : > { %v7128_v18 = vpop.permute.xlu1 %3094  ;;  %3610 = vperm.xlu0 %5301, %v6714_v59   ;;  %v2060_v49 = vadd.f32 %v6963_v47, %v1980_v27 }
 0x4d0   : > { %8396 = vst [vmem:[#allocation67_spill] sm:$0xff] %v7128_v18 }
 0x4d1   : > { %v2140_v12 = vadd.f32 %v6970_v11, %v2060_v49  ;;  %v8413_v11 = vld [vmem:[#allocation60_spill] sm:$0xff] }
 0x4d2   : > { %5291 = vset.pattern.permute.xlu1 %v8386_v36  ;;  %v8407_v36 = vld [vmem:[#allocation39_spill] sm:$0xff] }
 0x4d3   : > { %3390 = vperm.xlu1 %5291, %v6714_v59   ;;  %5304 = vset.pattern.permute.xlu0 %v8397_v9  ;;  %v2220_v20 = vadd.f32 %v8407_v36, %v2140_v12 }
 0x4d4   : > { %v7136_v5 = vpop.permute.xlu1 %3170 }
 0x4d5   : > { %v2300_v31 = vadd.f32 %v8408_v21, %v2220_v20 }
 0x4d7   : > { %5294 = vset.pattern.permute.xlu1 %v8389_v50  ;;  %v2380_v50 = vadd.f32 %v8410_v32, %v2300_v31  ;;  %v8418_v31 = vmov 42   ;;  %v8419_v32 = vld [vmem:[#allocation56_spill] sm:$0xff] }
 0x4d8   : > { %3454 = vperm.xlu1 %5294, %v8284_v57  }
 0x4d9   : > { %v7142_v19 = vpop.permute.xlu1 %3250  ;;  %v2460_v42 = vadd.f32 %v8411_v7, %v2380_v50  ;;  %v8420_v7 = vld [vmem:[#allocation46_spill] sm:$0xff] }
 0x4db   : > { %v2540_v47 = vadd.f32 %v7013_v41, %v2460_v42 }
 0x4dc   : > { %5295 = vset.pattern.permute.xlu1 %v8390_v6 }
 0x4dd   : > { %v7147_v8 = vpop.permute.xlu1 %3254  ;;  %3470 = vperm.xlu1 %5295, %v6714_v59  }
 0x4de   : > { %8399 = vst [vmem:[#allocation69_spill] sm:$0xff] %v7147_v8 }
 0x4e1   : > { %5298 = vset.pattern.permute.xlu1 %v8392_v55  ;;  %v2620_v55 = vadd.f32 %v8413_v11, %v2540_v47 }
 0x4e2   : > { %v7153_v29 = vpop.permute.xlu1 %3334  ;;  %3534 = vperm.xlu1 %5298, %v8284_v57   ;;  %v7171_v57 = vpop.permute.xlu0 %3654 }
 0x4e3   : > { %8401 = vst [vmem:[#allocation71_spill] sm:$0xff] %v7153_v29  ;;  %8402 = vst [vmem:[#allocation72_spill] sm:$0xff] %v7171_v57  ;;  %v8460_v57 = vld [vmem:[#allocation43_spill] sm:$0xff]  ;;  %v8468_v29 = vld [vmem:[#allocation49_spill] sm:$0xff] }
 0x4e6   : > { %5299 = vset.pattern.permute.xlu1 %v8393_v62  ;;  %v7177_v48 = vpop.permute.xlu0 %3810 }
 0x4e7   : > { %v7157_v28 = vpop.permute.xlu1 %3410  ;;  %3550 = vperm.xlu1 %5299, %v6714_v59  }
 0x4ea   : > { %v7186_v58 = vpop.permute.xlu0 %3050 }
 0x4eb   : > { %5302 = vset.pattern.permute.xlu1 %v8395_v1 }
 0x4ec   : > { %v7163_v0 = vpop.permute.xlu1 %3490  ;;  %3614 = vperm.xlu1 %5302, %v7168_v51  }
 0x4ee   : > { %v7195_v61 = vpop.permute.xlu0 %3074 }
 0x4ef   : > { %8409 = vst [vmem:[#allocation39_spill] sm:$0xff] %v7195_v61 }
 0x4f0   : > { %v7173_v22 = vpop.permute.xlu1 %3494  ;;  %5303 = vset.pattern.permute.xlu1 %v8397_v9  ;;  %v2700_v9 = vadd.f32 %v7022_v56, %v2620_v55  ;;  %v7223_v56 = vld [vmem:[#allocation3] sm:$0xff]  ;;  %v8422_v55 = vmov 45  }
 0x4f1   : > { %8403 = vst [vmem:[#allocation73_spill] sm:$0xff] %v7173_v22  ;;  %3630 = vperm.xlu1 %5303, %v6714_v59   ;;  %v8461_v22 = vmov 0  }
 0x4f2   : > { %v7202_v6 = vpop.permute.xlu0 %3150  ;;  %v2780_v46 = vadd.f32 %v7032_v60, %v2700_v9  ;;  %v8417_v60 = vld [vmem:[#allocation21_spill] sm:$0xff]  ;;  %v8423_v9 = vld [vmem:[#allocation50_spill] sm:$0xff] }
 0x4f3   : > { %v1905_v20 = vmul.f32 %v7223_v56, %v8417_v60 }
 0x4f5   : > { %v7181_v34 = vpop.permute.xlu1 %3574  ;;  %5306 = vset.pattern.permute.xlu1 %v8406_v13  ;;  %v1979_v50 = vadd.f32 %v8419_v32, %v1905_v20  ;;  %v8426_v20 = vld [vmem:[#allocation44_spill] sm:$0xff] }
 0x4f6   : > { %8405 = vst [vmem:[#allocation22_spill] sm:$0xff] %v7181_v34  ;;  %v7207_v1 = vpop.permute.xlu0 %3214 }
 0x4f7   : > { %8415 = vst [vmem:[#allocation59_spill] sm:$0xff] %v7207_v1  ;;  %v2059_v42 = vadd.f32 %v8420_v7, %v1979_v50  ;;  %v8427_v50 = vld [vmem:[#allocation17_spill] sm:$0xff] }
 0x4f8   : > { %v8443_v1 = vld [vmem:[#allocation37_spill] sm:$0xff] }
 0x4fa   : > { %v7189_v44 = vpop.permute.xlu1 %3650 }
 0x4ff   : > { %v7193_v2 = vpop.permute.xlu1 %3730 }
 0x503   : > { %v7199_v25 = vpop.permute.xlu1 %3734 }
 0x504   : > { %8412 = vst [vmem:[#allocation48_spill] sm:$0xff] %v7199_v25 }
 0x508   : > { %v7205_v62 = vpop.permute.xlu1 %3814 }
 0x509   : > { %8414 = vst [vmem:[#allocation57_spill] sm:$0xff] %v7205_v62 }
 0x50d   : > { %v7210_v10 = vpop.permute.xlu1 %2994 }
 0x511   : > { %v2836_v27 = vpop.permute.xlu0 %2835 }
 0x512   : > { %v2840_v49 = vadd.f32 %v2836_v27, %v2780_v46  ;;  %v7213_v12 = vpop.permute.xlu1 %3054  ;;  %v8424_v27 = vld [vmem:[#allocation51_spill] sm:$0xff] }
 0x513   : > { %8416 = vst [vmem:[#allocation60_spill] sm:$0xff] %v7213_v12  ;;  %v8449_v12 = vmov 32  }
 0x514   : > { %2845 = vrot.lane.b32.xlu0 %v2840_v49, %s8191_s7 }
 0x517   : > { %v7216_v41 = vpop.permute.xlu1 %3070 }
 0x518   : > { %3634 = vperm.xlu0 %5304, %v7168_v51  }
 0x51c   : > { %v7219_v36 = vpop.permute.xlu1 %3130  ;;  %5305 = vset.pattern.permute.xlu0 %v8406_v13  ;;  %v8421_v13 = vld [vmem:[#allocation41_spill] sm:$0xff] }
 0x51d   : > { %3690 = vperm.xlu0 %5305, %v6714_v59   ;;  %v2139_v11 = vadd.f32 %v8421_v13, %v2059_v42  ;;  %v8428_v42 = vld [vmem:[#allocation23_spill] sm:$0xff] }
 0x51f   : > { %v2219_v46 = vadd.f32 %v8423_v9, %v2139_v11  ;;  %v8430_v11 = vld [vmem:[#allocation26_spill] sm:$0xff] }
 0x520   : > { %v7227_v21 = vpop.permute.xlu1 %3134 }
 0x521   : > { %5308 = vset.pattern.permute.xlu0 %v8418_v31  ;;  %v2299_v49 = vadd.f32 %v8424_v27, %v2219_v46  ;;  %v8432_v27 = vld [vmem:[#allocation27_spill] sm:$0xff] }
 0x522   : > { %3714 = vperm.xlu0 %5308, %v7168_v51  }
 0x523   : > { %v2379_v32 = vadd.f32 %v8426_v20, %v2299_v49  ;;  %v8434_v49 = vld [vmem:[#allocation28_spill] sm:$0xff] }
 0x525   : > { %v7233_v47 = vpop.permute.xlu1 %3154  ;;  %v2459_v7 = vadd.f32 %v8427_v50, %v2379_v32 }
 0x526   : > { %5309 = vset.pattern.permute.xlu0 %v8422_v55 }
 0x527   : > { %3770 = vperm.xlu0 %5309, %v6714_v59   ;;  %v2539_v13 = vadd.f32 %v8428_v42, %v2459_v7  ;;  %v8435_v7 = vmov 20   ;;  %v8436_v42 = vmov 24  }
 0x529   : > { %v2619_v9 = vadd.f32 %v8430_v11, %v2539_v13 }
 0x52a   : > { %v7240_v60 = vpop.permute.xlu1 %3210 }
 0x52b   : > { %5312 = vset.pattern.permute.xlu0 %v8425_v14  ;;  %v2699_v37 = vadd.f32 %v8432_v27, %v2619_v9  ;;  %v8439_v9 = vld [vmem:[#allocation54_spill] sm:$0xff] }
 0x52c   : > { %3794 = vperm.xlu0 %5312, %v7168_v51  }
 0x52d   : > { %v2779_v20 = vadd.f32 %v8434_v49, %v2699_v37  ;;  %v2826_v37 = vpop.permute.xlu0 %2825 }
 0x52f   : > { %v7246_v33 = vpop.permute.xlu1 %3230 }
 0x530   : > { %5313 = vset.pattern.permute.xlu0 %v8429_v43 }
 0x531   : > { %3030 = vperm.xlu0 %5313, %v6714_v59   ;;  %v7269_v13 = vpop.permute.xlu0 %3290 }
 0x533   : > { %v7252_v46 = vpop.permute.xlu1 %3234 }
 0x534   : > { %8431 = vst [vmem:[#allocation21_spill] sm:$0xff] %v7252_v46 }
 0x535   : > { %5316 = vset.pattern.permute.xlu0 %v8433_v16 }
 0x536   : > { %3114 = vperm.xlu0 %5316, %v7168_v51  }
 0x537   : > { %v2834_v32 = vpop.permute.xlu1 %2833 }
 0x538   : > { %v2839_v50 = vadd.f32 %v2834_v32, %v2779_v20  ;;  %v8441_v32 = vld [vmem:[#allocation33_spill] sm:$0xff] }
 0x53a   : > { %2843 = vrot.lane.b32.xlu1 %v2839_v50, %s8191_s7  ;;  %5318 = vset.pattern.permute.xlu0 %v8435_v7  ;;  %s8481_s7 = smov 121  }
 0x53b   : > { %3270 = vperm.xlu0 %5318, %v6714_v59  }
 0x53e   : > { %3694 = vperm.xlu1 %5306, %v7168_v51  }
 0x53f   : > { %5321 = vset.pattern.permute.xlu0 %v8436_v42 }
 0x542   : > { %5307 = vset.pattern.permute.xlu1 %v8418_v31  ;;  %v7274_v31 = vpop.permute.xlu0 %3314 }
 0x543   : > { %3710 = vperm.xlu1 %5307, %v6714_v59  }
 0x546   : > { %v7279_v11 = vpop.permute.xlu0 %3370 }
 0x547   : > { %5310 = vset.pattern.permute.xlu1 %v8422_v55  ;;  %v8437_v55 = vmov 16  }
 0x548   : > { %3774 = vperm.xlu1 %5310, %v7168_v51  }
 0x54c   : > { %5311 = vset.pattern.permute.xlu1 %v8425_v14  ;;  %v7282_v14 = vpop.permute.xlu0 %3394 }
 0x54d   : > { %3790 = vperm.xlu1 %5311, %v6714_v59   ;;  %8438 = vst [vmem:[#allocation56_spill] sm:$0xff] %v7282_v14  ;;  %v2824_v14 = vpop.permute.xlu1 %2823 }
 0x550   : > { %v7288_v20 = vpop.permute.xlu0 %3450 }
 0x551   : > { %5314 = vset.pattern.permute.xlu1 %v8429_v43  ;;  %v5384_v43 = vld [vmem:[#allocation3 + $0x8] sm:$0xff] }
 0x552   : > { %3034 = vperm.xlu1 %5314, %v7168_v51   ;;  %v1882_v27 = vmul.f32 %v5384_v43, %v8439_v9  ;;  %v8446_v9 = vld [vmem:[#allocation47_spill] sm:$0xff] }
 0x554   : > { %v7296_v43 = vpop.permute.xlu0 %3474 }
 0x555   : > { %8445 = vst [vmem:[#allocation46_spill] sm:$0xff] %v7296_v43 }
 0x556   : > { %5315 = vset.pattern.permute.xlu1 %v8433_v16  ;;  %v8440_v16 = vld [vmem:[#allocation32_spill] sm:$0xff] }
 0x557   : > { %3110 = vperm.xlu1 %5315, %v6714_v59   ;;  %v1940_v49 = vadd.f32 %v8440_v16, %v1882_v27  ;;  %v7300_v27 = vpop.permute.xlu1 %3294  ;;  %v8447_v16 = vld [vmem:[#allocation38_spill] sm:$0xff] }
 0x559   : > { %v2020_v50 = vadd.f32 %v8441_v32, %v1940_v49 }
 0x55b   : > { %5317 = vset.pattern.permute.xlu1 %v8437_v55  ;;  %v8442_v55 = vld [vmem:[#allocation35_spill] sm:$0xff] }
 0x55c   : > { %3190 = vperm.xlu1 %5317, %v6714_v59   ;;  %v2100_v46 = vadd.f32 %v8442_v55, %v2020_v50  ;;  %v7306_v50 = vpop.permute.xlu0 %3530  ;;  %v7309_v55 = vpop.permute.xlu1 %3310 }
 0x55d   : > { %8450 = vst [vmem:[#allocation41_spill] sm:$0xff] %v7306_v50 }
 0x560   : > { %3194 = vperm.xlu1 %5317, %v7168_v51   ;;  %v7314_v62 = vpop.permute.xlu0 %3554 }
 0x561   : > { %8453 = vst [vmem:[#allocation50_spill] sm:$0xff] %v7314_v62 }
 0x564   : > { %5319 = vset.pattern.permute.xlu1 %v8435_v7  ;;  %v2180_v7 = vadd.f32 %v8443_v1, %v2100_v46  ;;  %v8451_v1 = vld [vmem:[#allocation24_spill] sm:$0xff] }
 0x565   : > { %3274 = vperm.xlu1 %5319, %v7168_v51  }
 0x566   : > { %v2260_v61 = vadd.f32 %v8446_v9, %v2180_v7  ;;  %v8452_v9 = vmov 36  }
 0x568   : > { %v2340_v49 = vadd.f32 %v8447_v16, %v2260_v61  ;;  %v7317_v16 = vpop.permute.xlu1 %3374 }
 0x569   : > { %5320 = vset.pattern.permute.xlu1 %v8436_v42  ;;  %v8448_v42 = vld [vmem:[#allocation58_spill] sm:$0xff]  ;;  %8454 = vst [vmem:[#allocation51_spill] sm:$0xff] %v7317_v16  ;;  %v8457_v16 = vmov 48  }
 0x56a   : > { %3350 = vperm.xlu1 %5320, %v6714_v59   ;;  %v2420_v32 = vadd.f32 %v8448_v42, %v2340_v49  ;;  %v8455_v49 = vmov 40  }
 0x56c   : > { %v2500_v46 = vadd.f32 %v8451_v1, %v2420_v32  ;;  %v7322_v32 = vpop.permute.xlu0 %3610  ;;  %v8456_v1 = vmov 44  }
 0x56e   : > { %5323 = vset.pattern.permute.xlu1 %v8444_v63  ;;  %v2580_v7 = vadd.f32 %v7019_v53, %v2500_v46  ;;  %v7325_v53 = vpop.permute.xlu1 %3390 }
 0x56f   : > { %3434 = vperm.xlu1 %5323, %v7168_v51  }
 0x570   : > { %v2660_v61 = vadd.f32 %v7040_v54, %v2580_v7 }
 0x572   : > { %v2740_v42 = vadd.f32 %v7050_v24, %v2660_v61  ;;  %v7331_v25 = vpop.permute.xlu1 %3454  ;;  %v8459_v24 = vld [vmem:[#allocation16_spill] sm:$0xff] }
 0x573   : > { %5324 = vset.pattern.permute.xlu1 %v8449_v12  ;;  %8458 = vst [vmem:[#allocation44_spill] sm:$0xff] %v7331_v25 }
 0x574   : > { %3510 = vperm.xlu1 %5324, %v6714_v59   ;;  %v2820_v46 = vadd.f32 %v7067_v38, %v2740_v42  ;;  %v7339_v38 = vld [vmem:[%s8257_s1] ss:$0 sm:$0xff]  ;;  %s8483_s1 = smov 81  }
 0x575   : > { %8462 = vst [vmem:[#allocation17_spill] sm:$0xff] %v7339_v38 }
 0x576   : > { %v2830_v62 = vadd.f32 %v2826_v37, %v2820_v46  ;;  %v7342_v37 = vpop.permute.xlu1 %3470  ;;  %v8464_v46 = vld [vmem:[#allocation36_spill] sm:$0xff] }
 0x578   : > { %5327 = vset.pattern.permute.xlu1 %v8452_v9 }
 0x579   : > { %3594 = vperm.xlu1 %5327, %v7168_v51  }
 0x57d   : > { %5328 = vset.pattern.permute.xlu1 %v8455_v49 }
 0x57e   : > { %3670 = vperm.xlu1 %5328, %v6714_v59  }
 0x582   : > { %5331 = vset.pattern.permute.xlu1 %v8456_v1 }
 0x583   : > { %3754 = vperm.xlu1 %5331, %v7168_v51  }
 0x586   : > { %v2846_v54 = vpop.permute.xlu0 %2845 }
 0x587   : > { %v2850_v7 = vadd.f32 %v2846_v54, %v2830_v62  ;;  %5332 = vset.pattern.permute.xlu1 %v8457_v16 }
 0x588   : > { %3830 = vperm.xlu1 %5332, %v6714_v59   ;;  %v8463_v59 = vld [vmem:[#allocation18_spill] sm:$0xff] }
 0x589   : > { %v2864_v61 = vadd.f32 %v8459_v24, %v2850_v7  ;;  %v1881_v42 = vmul.f32 %v7223_v56, %v8463_v59  ;;  %v8466_v7 = vld [vmem:[#allocation40_spill] sm:$0xff]  ;;  %v8467_v24 = vld [vmem:[#allocation45_spill] sm:$0xff] }
 0x58a   : > { %v8473_v56 = vld [vmem:[#allocation20_spill] sm:$0xff] }
 0x58b   : > { %vm2866_vm5 = vcmp.gt.f32.partialorder %v2864_v61, 0.0  ;;  %v2880_v34 = vmul.f32 %v8460_v57, %v2864_v61  ;;  %v1939_v54 = vadd.f32 %v8464_v46, %v1881_v42  ;;  %v7348_v57 = vpop.permute.xlu1 %3534  ;;  %v8474_v42 = vld [vmem:[#allocation25_spill] sm:$0xff] }
 0x58c   : > { %5335 = vset.pattern.permute.xlu1 %v8461_v22  ;;  %8465 = vst [vmem:[#allocation23_spill] sm:$0xff] %v7348_v57  ;;  %v8475_v57 = vld [vmem:[#allocation29_spill] sm:$0xff] }
 0x58d   : > { %v2882_v23 = vsel %vm2866_vm5, %v2864_v61, %v2880_v34  ;;  %v2019_v34 = vadd.f32 %v8466_v7, %v1939_v54 }
 0x58e   : > { %v2884_v62 = vmul.f32 %v7339_v38, %v2882_v23  ;;  %v8469_v23 = vld [vmem:[#allocation42_spill] sm:$0xff] }
 0x58f   : > { %v2099_v61 = vadd.f32 %v8467_v24, %v2019_v34  ;;  %v7353_v3 = vpop.permute.xlu1 %3550  ;;  %v8476_v34 = vld [vmem:[#allocation30_spill] sm:$0xff]  ;;  %v8477_v24 = vld [vmem:[#allocation31_spill] sm:$0xff] }
 0x590   : > { %2889 = vrot.lane.b32.xlu1 %v2884_v62, %s8258_s24  ;;  %v8471_v62 = vld [vmem:[#allocation15_spill] sm:$0xff] }
 0x591   : > { %v2179_v8 = vadd.f32 %v8468_v29, %v2099_v61 }
 0x593   : > { %v2259_v18 = vadd.f32 %v8469_v23, %v2179_v8  ;;  %v7358_v25 = vpop.permute.xlu1 %3614 }
 0x594   : > { %8472 = vst [vmem:[#allocation26_spill] sm:$0xff] %v7358_v25 }
 0x595   : > { %v2339_v43 = vadd.f32 %v8470_v35, %v2259_v18  ;;  %v8478_v35 = vld [vmem:[#allocation53_spill] sm:$0xff] }
 0x597   : > { %v2419_v45 = vadd.f32 %v8471_v62, %v2339_v43  ;;  %v7363_v7 = vpop.permute.xlu1 %3630  ;;  %v8479_v43 = vld [vmem:[#allocation55_spill] sm:$0xff] }
 0x599   : > { %v2499_v59 = vadd.f32 %v8473_v56, %v2419_v45 }
 0x59b   : > { %v2579_v46 = vadd.f32 %v8474_v42, %v2499_v59 }
 0x59d   : > { %v2659_v54 = vadd.f32 %v8475_v57, %v2579_v46 }
 0x59f   : > { %v2739_v29 = vadd.f32 %v8476_v34, %v2659_v54  ;;  %v7413_v34 = vpop.permute.xlu0 %3634 }
 0x5a1   : > { %v2819_v61 = vadd.f32 %v8477_v24, %v2739_v29 }
 0x5a3   : > { %v2829_v50 = vadd.f32 %v2824_v14, %v2819_v61  ;;  %v5386_v14 = vld [vmem:[%s8260_s8] sm:$0xff]  ;;  %v3691_v29 = vpop.permute.xlu0 %3690  ;;  %s8484_s8 = smov 73  }
 0x5ac   : > { %v2844_v8 = vpop.permute.xlu1 %2843 }
 0x5ad   : > { %v2849_v23 = vadd.f32 %v2844_v8, %v2829_v50 }
 0x5af   : > { %v2863_v18 = vadd.f32 %v8478_v35, %v2849_v23 }
 0x5b1   : > { %vm2865_vm6 = vcmp.gt.f32.partialorder %v2863_v18, 0.0  ;;  %v2879_v62 = vmul.f32 %v8479_v43, %v2863_v18 }
 0x5b3   : > { %v2881_v25 = vsel %vm2865_vm6, %v2863_v18, %v2879_v62 }
 0x5b4   : > { %v2883_v45 = vmul.f32 %v7339_v38, %v2881_v25 }
 0x5b6   : > { %2887 = vrot.lane.b32.xlu0 %v2883_v45, %s8258_s24 }
 0x5b9   : > { %v7371_v57 = vpop.permute.xlu1 %3694 }
 0x5ba   : > { %3354 = vperm.xlu0 %5321, %v7168_v51  }
 0x5be   : > { %5322 = vset.pattern.permute.xlu0 %v8444_v63  ;;  %v7375_v56 = vpop.permute.xlu1 %3710 }
 0x5bf   : > { %3430 = vperm.xlu0 %5322, %v5386_v14  }
 0x5c3   : > { %5325 = vset.pattern.permute.xlu0 %v8449_v12  ;;  %v7381_v50 = vpop.permute.xlu1 %3774 }
 0x5c4   : > { %3514 = vperm.xlu0 %5325, %v7168_v51  }
 0x5c8   : > { %5326 = vset.pattern.permute.xlu0 %v8452_v9  ;;  %v7385_v25 = vpop.permute.xlu1 %3790 }
 0x5c9   : > { %3590 = vperm.xlu0 %5326, %v5386_v14  }
 0x5cd   : > { %5329 = vset.pattern.permute.xlu0 %v8455_v49  ;;  %v7388_v63 = vpop.permute.xlu1 %3034 }
 0x5ce   : > { %3674 = vperm.xlu0 %5329, %v7168_v51  }
 0x5d2   : > { %5330 = vset.pattern.permute.xlu0 %v8456_v1  ;;  %v7392_v59 = vpop.permute.xlu1 %3110 }
 0x5d3   : > { %3750 = vperm.xlu0 %5330, %v5386_v14  }
 0x5d7   : > { %5333 = vset.pattern.permute.xlu0 %v8457_v16  ;;  %v7395_v12 = vpop.permute.xlu1 %3190 }
 0x5d8   : > { %3834 = vperm.xlu0 %5333, %v7168_v51  }
 0x5db   : > { %v7398_v9 = vpop.permute.xlu1 %3194 }
 0x5dc   : > { %5334 = vset.pattern.permute.xlu0 %v8461_v22  ;;  %v7419_v22 = vpop.permute.xlu0 %3714 }
 0x5dd   : > { %2901 = vperm.xlu0 %5334, %v5386_v14  }
 0x5e0   : > { %v7401_v49 = vpop.permute.xlu1 %3274  ;;  %v7422_v8 = vpop.permute.xlu0 %3770 }
 0x5e4   : > { %v7424_v23 = vpop.permute.xlu0 %3794 }
 0x5e5   : > { %v7403_v42 = vpop.permute.xlu1 %3350 }
 0x5e8   : > { %v7426_v35 = vpop.permute.xlu0 %3030 }
 0x5ea   : > { %v7405_v46 = vpop.permute.xlu1 %3434 }
 0x5ec   : > { %v7428_v18 = vpop.permute.xlu0 %3114 }
 0x5ef   : > { %v7407_v1 = vpop.permute.xlu1 %3510 }
 0x5f0   : > { %v7430_v43 = vpop.permute.xlu0 %3270 }
 0x5f4   : > { %v7409_v54 = vpop.permute.xlu1 %3594 }
 0x5f9   : > { %v7411_v16 = vpop.permute.xlu1 %3670 }
 0x5fe   : > { %v7415_v51 = vpop.permute.xlu1 %3754 }
 0x5ff   : > { %8480 = vst [vmem:[#allocation27_spill] sm:$0xff] %v7415_v51 }
 0x603   : > { %v7417_v24 = vpop.permute.xlu1 %3830 }
 0x607   : > { %v2890_v61 = vpop.permute.xlu1 %2889 }
 0x608   : > { %2894 = vst.msk [vmem:[#allocation2 + $0x8] sm:$0xff] %vm1864_vm4, %v2890_v61 }
 0x628   : > { %v2888_v62 = vpop.permute.xlu0 %2887 }
 0x629   : > { %2893 = vst.msk [vmem:[#allocation2] sm:$0xff] %vm1864_vm4, %v2888_v62 }
 0x630   : > { %v7433_v45 = vld [vmem:[#allocation2] sm:$0xff] }
 0x631   : > { %v2957_v14 = vmul.f32 %v7101_v30, %v7433_v45  ;;  %v3017_v61 = vmul.f32 %v7115_v52, %v7433_v45  ;;  %v2977_v38 = vmul.f32 %v7108_v40, %v7433_v45  ;;  %v3097_v62 = vmul.f32 %v7130_v39, %v7433_v45 }
 0x632   : > { %v3657_v51 = vmul.f32 %v7189_v44, %v7433_v45  ;;  %v3177_v30 = vmul.f32 %v7136_v5, %v7433_v45  ;;  %v3737_v52 = vmul.f32 %v7193_v2, %v7433_v45  ;;  %v3257_v40 = vmul.f32 %v7142_v19, %v7433_v45 }
 0x633   : > { %2961 = vrot.lane.b32.xlu1 %v2957_v14, %s8305_s3  ;;  %3021 = vrot.lane.b32.xlu0 %v3017_v61, %s8481_s7  ;;  %v3817_v39 = vmul.f32 %v7177_v48, %v7433_v45  ;;  %v3337_v5 = vmul.f32 %v7144_v17, %v7433_v45  ;;  %v3077_v44 = vmul.f32 %v7216_v41, %v7433_v45  ;;  %v8487_v14 = vld [vmem:[#allocation65_spill] sm:$0xff]  ;;  %v8488_v61 = vld [vmem:[#allocation46_spill] sm:$0xff] }
 0x634   : > { %v3417_v19 = vmul.f32 %v7157_v28, %v7433_v45  ;;  %v3237_v48 = vmul.f32 %v7246_v33, %v7433_v45  ;;  %v3497_v17 = vmul.f32 %v7163_v0, %v7433_v45  ;;  %v3397_v2 = vmul.f32 %v7325_v53, %v7433_v45 }
 0x635   : > { %v3577_v28 = vmul.f32 %v7159_v4, %v7433_v45  ;;  %v3557_v33 = vmul.f32 %v7353_v3, %v7433_v45  ;;  %v2997_v0 = vmul.f32 %v7118_v26, %v7433_v45  ;;  %v3617_v41 = vmul.f32 %v7322_v32, %v7433_v45 }
 0x636   : > { %v3057_v4 = vmul.f32 %v7186_v58, %v7433_v45  ;;  %v3637_v3 = vmul.f32 %v7363_v7, %v7433_v45  ;;  %v3137_v26 = vmul.f32 %v7219_v36, %v7433_v45  ;;  %v3697_v53 = vmul.f32 %v3691_v29, %v7433_v45  ;;  %v8486_v29 = vld [vmem:[#allocation44_spill] sm:$0xff] }
 0x637   : > { %2981 = vrot.lane.b32.xlu1 %v2977_v38, %s8305_s3  ;;  %3661 = vrot.lane.b32.xlu0 %v3657_v51, %s8482_s22  ;;  %v3157_v32 = vmul.f32 %v7202_v6, %v7433_v45  ;;  %v3717_v58 = vmul.f32 %v7375_v56, %v7433_v45  ;;  %v7507_v38 = vld [vmem:[#allocation2 + $0x8] sm:$0xff]  ;;  %v3217_v36 = vmul.f32 %v7240_v60, %v7433_v45  ;;  %v8485_v51 = vld [vmem:[#allocation41_spill] sm:$0xff] }
 0x638   : > { %v2958_v7 = vmul.f32 %v7098_v15, %v7507_v38  ;;  %v3297_v6 = vmul.f32 %v7269_v13, %v7433_v45  ;;  %v2998_v56 = vmul.f32 %v7210_v10, %v7507_v38  ;;  %v3317_v60 = vmul.f32 %v7309_v55, %v7433_v45 }
 0x639   : > { %v3138_v15 = vmul.f32 %v7227_v21, %v7507_v38  ;;  %v3377_v13 = vmul.f32 %v7279_v11, %v7433_v45  ;;  %v3158_v10 = vmul.f32 %v7233_v47, %v7507_v38  ;;  %v3457_v55 = vmul.f32 %v7288_v20, %v7433_v45 }
 0x63a   : > { %v3298_v21 = vmul.f32 %v7300_v27, %v7507_v38  ;;  %v3477_v11 = vmul.f32 %v7342_v37, %v7433_v45  ;;  %v3318_v47 = vmul.f32 %v7274_v31, %v7507_v38  ;;  %v3537_v20 = vmul.f32 %v8485_v51, %v7433_v45 }
 0x63b   : > { %3101 = vrot.lane.b32.xlu1 %v3097_v62, %s8311_s2  ;;  %3741 = vrot.lane.b32.xlu0 %v3737_v52, %s8348_s5  ;;  %v3458_v27 = vmul.f32 %v8486_v29, %v7507_v38  ;;  %v2978_v37 = vmul.f32 %v8487_v14, %v7507_v38  ;;  %v3478_v31 = vmul.f32 %v8488_v61, %v7507_v38  ;;  %v8489_v62 = vld [vmem:[#allocation66_spill] sm:$0xff] }
 0x63c   : > { %v3777_v52 = vmul.f32 %v7422_v8, %v7433_v45 }
 0x63f   : > { %3181 = vrot.lane.b32.xlu1 %v3177_v30, %s8319_s28  ;;  %3821 = vrot.lane.b32.xlu0 %v3817_v39, %s8350_s6  ;;  %v3018_v30 = vmul.f32 %v8489_v62, %v7507_v38  ;;  %v8490_v39 = vld [vmem:[#allocation67_spill] sm:$0xff] }
 0x643   : > { %3261 = vrot.lane.b32.xlu1 %v3257_v40, %s8213_s27  ;;  %3081 = vrot.lane.b32.xlu0 %v3077_v44, %s8311_s2  ;;  %v7563_v40 = vpop.permute.xlu0 %3354  ;;  %v3797_v44 = vmul.f32 %v7385_v25, %v7433_v45  ;;  %v8493_v25 = vld [vmem:[#allocation71_spill] sm:$0xff] }
 0x647   : > { %3341 = vrot.lane.b32.xlu1 %v3337_v5, %s8330_s16  ;;  %3241 = vrot.lane.b32.xlu0 %v3237_v48, %s8213_s27  ;;  %v3098_v5 = vmul.f32 %v8490_v39, %v7507_v38  ;;  %v7575_v8 = vpop.permute.xlu0 %3430 }
 0x64b   : > { %3421 = vrot.lane.b32.xlu1 %v3417_v19, %s8217_s20  ;;  %3401 = vrot.lane.b32.xlu0 %v3397_v2, %s8217_s20  ;;  %v8491_v19 = vld [vmem:[#allocation68_spill] sm:$0xff] }
 0x64c   : > { %v3178_v48 = vmul.f32 %v8491_v19, %v7507_v38 }
 0x64f   : > { %3501 = vrot.lane.b32.xlu1 %v3497_v17, %s8338_s4  ;;  %3561 = vrot.lane.b32.xlu0 %v3557_v33, %s8214_s18  ;;  %v8492_v17 = vld [vmem:[#allocation69_spill] sm:$0xff]  ;;  %v3338_v33 = vmul.f32 %v8493_v25, %v7507_v38 }
 0x650   : > { %v3258_v2 = vmul.f32 %v8492_v17, %v7507_v38 }
 0x653   : > { %3581 = vrot.lane.b32.xlu1 %v3577_v28, %s8483_s1  ;;  %3621 = vrot.lane.b32.xlu0 %v3617_v41, %s8482_s22  ;;  %v7580_v28 = vpop.permute.xlu0 %3514 }
 0x657   : > { %3001 = vrot.lane.b32.xlu1 %v2997_v0, %s8305_s3  ;;  %3641 = vrot.lane.b32.xlu0 %v3637_v3, %s8482_s22  ;;  %v8494_v0 = vld [vmem:[#allocation70_spill] sm:$0xff]  ;;  %v8495_v3 = vld [vmem:[#allocation73_spill] sm:$0xff] }
 0x658   : > { %v3418_v41 = vmul.f32 %v8494_v0, %v7507_v38 }
 0x65b   : > { %3061 = vrot.lane.b32.xlu1 %v3057_v4, %s8311_s2  ;;  %3701 = vrot.lane.b32.xlu0 %v3697_v53, %s8484_s8  ;;  %v7588_v4 = vpop.permute.xlu0 %3590 }
 0x65f   : > { %3141 = vrot.lane.b32.xlu1 %v3137_v26, %s8316_s19  ;;  %3721 = vrot.lane.b32.xlu0 %v3717_v58, %s8348_s5  ;;  %v3498_v26 = vmul.f32 %v8495_v3, %v7507_v38  ;;  %v7593_v53 = vpop.permute.xlu0 %3674 }
 0x663   : > { %3161 = vrot.lane.b32.xlu1 %v3157_v32, %s8319_s28  ;;  %2963 = vrot.lane.b32.xlu0 %v2958_v7, %s8305_s3  ;;  %v8496_v32 = vld [vmem:[#allocation22_spill] sm:$0xff] }
 0x664   : > { %v3578_v58 = vmul.f32 %v8496_v32, %v7507_v38 }
 0x667   : > { %3221 = vrot.lane.b32.xlu1 %v3217_v36, %s8213_s27  ;;  %3003 = vrot.lane.b32.xlu0 %v2998_v56, %s8305_s3  ;;  %v8497_v36 = vld [vmem:[#allocation72_spill] sm:$0xff] }
 0x668   : > { %v3658_v7 = vmul.f32 %v8497_v36, %v7507_v38  ;;  %v8506_v36 = vld [vmem:[#allocation56_spill] sm:$0xff] }
 0x66b   : > { %3301 = vrot.lane.b32.xlu1 %v3297_v6, %s8330_s16  ;;  %3143 = vrot.lane.b32.xlu0 %v3138_v15, %s8316_s19  ;;  %v7601_v6 = vpop.permute.xlu0 %3750 }
 0x66f   : > { %3321 = vrot.lane.b32.xlu1 %v3317_v60, %s8330_s16  ;;  %3163 = vrot.lane.b32.xlu0 %v3158_v10, %s8319_s28  ;;  %v8498_v60 = vld [vmem:[#allocation48_spill] sm:$0xff]  ;;  %v7610_v10 = vpop.permute.xlu0 %3834 }
 0x670   : > { %v3738_v15 = vmul.f32 %v8498_v60, %v7507_v38 }
 0x673   : > { %3381 = vrot.lane.b32.xlu1 %v3377_v13, %s8217_s20  ;;  %3303 = vrot.lane.b32.xlu0 %v3298_v21, %s8330_s16 }
 0x677   : > { %3461 = vrot.lane.b32.xlu1 %v3457_v55, %s8338_s4  ;;  %3323 = vrot.lane.b32.xlu0 %v3318_v47, %s8330_s16  ;;  %v8499_v55 = vld [vmem:[#allocation57_spill] sm:$0xff]  ;;  %v8500_v47 = vld [vmem:[#allocation60_spill] sm:$0xff] }
 0x678   : > { %v3818_v21 = vmul.f32 %v8499_v55, %v7507_v38  ;;  %v3058_v51 = vmul.f32 %v8500_v47, %v7507_v38 }
 0x67b   : > { %3481 = vrot.lane.b32.xlu1 %v3477_v11, %s8338_s4  ;;  %3463 = vrot.lane.b32.xlu0 %v3458_v27, %s8338_s4  ;;  %v8501_v27 = vld [vmem:[#allocation39_spill] sm:$0xff] }
 0x67c   : > { %v3078_v14 = vmul.f32 %v8501_v27, %v7507_v38 }
 0x67f   : > { %3541 = vrot.lane.b32.xlu1 %v3537_v20, %s8214_s18  ;;  %3483 = vrot.lane.b32.xlu0 %v3478_v31, %s8338_s4  ;;  %v7618_v20 = vpop.permute.xlu0 %2901  ;;  %v8502_v31 = vld [vmem:[#allocation61_spill] sm:$0xff] }
 0x680   : > { %v2945_v62 = vmul.f32 %v8502_v31, %v7433_v45 }
 0x683   : > { %2983 = vrot.lane.b32.xlu1 %v2978_v37, %s8305_s3  ;;  %3781 = vrot.lane.b32.xlu0 %v3777_v52, %s8350_s6  ;;  %v8503_v52 = vld [vmem:[#allocation59_spill] sm:$0xff] }
 0x684   : > { %v3218_v39 = vmul.f32 %v8503_v52, %v7507_v38 }
 0x687   : > { %3023 = vrot.lane.b32.xlu1 %v3018_v30, %s8481_s7  ;;  %3801 = vrot.lane.b32.xlu0 %v3797_v44, %s8350_s6 }
 0x68b   : > { %3103 = vrot.lane.b32.xlu1 %v3098_v5, %s8311_s2 }
 0x68f   : > { %3183 = vrot.lane.b32.xlu1 %v3178_v48, %s8319_s28  ;;  %v8504_v48 = vld [vmem:[#allocation21_spill] sm:$0xff] }
 0x690   : > { %v3238_v17 = vmul.f32 %v8504_v48, %v7507_v38  ;;  %v3698_v48 = vmul.f32 %v7371_v57, %v7507_v38  ;;  %v3357_v57 = vmul.f32 %v7403_v42, %v7433_v45 }
 0x693   : > { %3263 = vrot.lane.b32.xlu1 %v3258_v2, %s8213_s27 }
 0x697   : > { %3343 = vrot.lane.b32.xlu1 %v3338_v33, %s8330_s16 }
 0x69b   : > { %3423 = vrot.lane.b32.xlu1 %v3418_v41, %s8217_s20  ;;  %v8505_v41 = vld [vmem:[#allocation51_spill] sm:$0xff] }
 0x69c   : > { %v3378_v3 = vmul.f32 %v8505_v41, %v7507_v38 }
 0x69f   : > { %3503 = vrot.lane.b32.xlu1 %v3498_v26, %s8338_s4 }
 0x6a3   : > { %3583 = vrot.lane.b32.xlu1 %v3578_v58, %s8483_s1  ;;  %s8509_s1 = smov 127  }
 0x6a5   : > { %v7603_v56 = vpop.permute.xlu1 %2961  ;;  %v3022_v37 = vpop.permute.xlu0 %3021 }
 0x6a6   : > { %v3027_v30 = vadd.f32 %v3022_v37, %v2945_v62  ;;  %v8508_v37 = vld [vmem:[#allocation50_spill] sm:$0xff]  ;;  %v3037_v62 = vmul.f32 %v7426_v35, %v7433_v45  ;;  %v3197_v35 = vmul.f32 %v7395_v12, %v7433_v45  ;;  %v3778_v12 = vmul.f32 %v7381_v50, %v7507_v38 }
 0x6a7   : > { %3663 = vrot.lane.b32.xlu1 %v3658_v7, %s8482_s22  ;;  %v3398_v7 = vmul.f32 %v8506_v36, %v7507_v38  ;;  %v3517_v50 = vmul.f32 %v7407_v1, %v7433_v45  ;;  %v3757_v1 = vmul.f32 %v7601_v6, %v7433_v45  ;;  %v3837_v36 = vmul.f32 %v7417_v24, %v7433_v45  ;;  %v3896_v6 = vld [vmem:[%s8036_s10 + $0x8] sm:$0xff] }
 0x6a9   : > { %v7608_v13 = vpop.permute.xlu1 %2981  ;;  %v3662_v33 = vpop.permute.xlu0 %3661 }
 0x6ab   : > { %3743 = vrot.lane.b32.xlu1 %v3738_v15, %s8348_s5 }
 0x6ad   : > { %v3102_v11 = vpop.permute.xlu1 %3101  ;;  %v3742_v60 = vpop.permute.xlu0 %3741 }
 0x6ae   : > { %v3107_v44 = vadd.f32 %v3102_v11, %v3027_v30  ;;  %v8507_v11 = vld [vmem:[#allocation23_spill] sm:$0xff]  ;;  %v8510_v30 = vld [vmem:[#allocation26_spill] sm:$0xff] }
 0x6af   : > { %3823 = vrot.lane.b32.xlu1 %v3818_v21, %s8350_s6  ;;  %v3538_v47 = vmul.f32 %v8507_v11, %v7507_v38  ;;  %v3618_v52 = vmul.f32 %v8510_v30, %v7507_v38 }
 0x6b1   : > { %v3182_v29 = vpop.permute.xlu1 %3181  ;;  %v3822_v27 = vpop.permute.xlu0 %3821 }
 0x6b2   : > { %v3187_v19 = vadd.f32 %v3182_v29, %v3107_v44  ;;  %v3638_v44 = vmul.f32 %v7413_v34, %v7507_v38  ;;  %v3718_v34 = vmul.f32 %v7419_v22, %v7507_v38  ;;  %v3437_v22 = vmul.f32 %v7575_v8, %v7433_v45 }
 0x6b3   : > { %3063 = vrot.lane.b32.xlu1 %v3058_v51, %s8311_s2 }
 0x6b5   : > { %v3262_v61 = vpop.permute.xlu1 %3261 }
 0x6b6   : > { %v3267_v25 = vadd.f32 %v3262_v61, %v3187_v19  ;;  %v3558_v61 = vmul.f32 %v8508_v37, %v7507_v38 }
 0x6b7   : > { %3083 = vrot.lane.b32.xlu1 %v3078_v14, %s8311_s2 }
 0x6b9   : > { %v3342_v5 = vpop.permute.xlu1 %3341 }
 0x6ba   : > { %v3347_v0 = vadd.f32 %v3342_v5, %v3267_v25  ;;  %v3117_v5 = vmul.f32 %v7392_v59, %v7433_v45  ;;  %v3277_v59 = vmul.f32 %v7430_v43, %v7433_v45  ;;  %v3798_v43 = vmul.f32 %v7424_v23, %v7507_v38 }
 0x6bb   : > { %3223 = vrot.lane.b32.xlu1 %v3218_v39, %s8213_s27  ;;  %v3597_v23 = vmul.f32 %v7588_v4, %v7433_v45 }
 0x6bd   : > { %v3422_v2 = vpop.permute.xlu1 %3421 }
 0x6be   : > { %v3427_v32 = vadd.f32 %v3422_v2, %v3347_v0 }
 0x6bf   : > { %3243 = vrot.lane.b32.xlu1 %v3238_v17, %s8213_s27 }
 0x6c1   : > { %v3502_v26 = vpop.permute.xlu1 %3501 }
 0x6c2   : > { %v3507_v58 = vadd.f32 %v3502_v26, %v3427_v32 }
 0x6c3   : > { %3383 = vrot.lane.b32.xlu1 %v3378_v3, %s8217_s20  ;;  %v3677_v3 = vmul.f32 %v7411_v16, %v7433_v45  ;;  %v3879_v16 = vld [vmem:[%s8035_s9] sm:$0xff] }
 0x6c5   : > { %v3582_v15 = vpop.permute.xlu1 %3581 }
 0x6c6   : > { %v3587_v55 = vadd.f32 %v3582_v15, %v3507_v58 }
 0x6c7   : > { %3403 = vrot.lane.b32.xlu1 %v3398_v7, %s8217_s20 }
 0x6c8   : > { %v3667_v21 = vadd.f32 %v3662_v33, %v3587_v55  ;;  %v7693_v33 = vpop.permute.xlu0 %3081 }
 0x6c9   : > { %v7640_v51 = vpop.permute.xlu1 %3001 }
 0x6ca   : > { %v3747_v29 = vadd.f32 %v3742_v60, %v3667_v21 }
 0x6cb   : > { %3543 = vrot.lane.b32.xlu1 %v3538_v47, %s8214_s18 }
 0x6cc   : > { %v3827_v14 = vadd.f32 %v3822_v27, %v3747_v29  ;;  %v7704_v41 = vpop.permute.xlu0 %3241  ;;  %v8512_v29 = vld [vmem:[#allocation63_spill] sm:$0xff] }
 0x6cd   : > { %v7645_v31 = vpop.permute.xlu1 %3061  ;;  %v2946_v27 = vmul.f32 %v8512_v29, %v7507_v38  ;;  %v3118_v29 = vmul.f32 %v7428_v18, %v7507_v38 }
 0x6ce   : > { %3861 = vrot.lane.b32.xlu0 %v3827_v14, %s8509_s1 }
 0x6cf   : > { %3563 = vrot.lane.b32.xlu1 %v3558_v61, %s8214_s18 }
 0x6d0   : > { %v7713_v26 = vpop.permute.xlu0 %3401 }
 0x6d1   : > { %v7653_v39 = vpop.permute.xlu1 %3141 }
 0x6d2   : > { %3041 = vrot.lane.b32.xlu0 %v3037_v62, %s8311_s2 }
 0x6d3   : > { %3623 = vrot.lane.b32.xlu1 %v3618_v52, %s8482_s22 }
 0x6d4   : > { %v7723_v4 = vpop.permute.xlu0 %3561 }
 0x6d5   : > { %v7661_v19 = vpop.permute.xlu1 %3161 }
 0x6d6   : > { %3121 = vrot.lane.b32.xlu0 %v3117_v5, %s8316_s19 }
 0x6d7   : > { %3643 = vrot.lane.b32.xlu1 %v3638_v44, %s8482_s22 }
 0x6d8   : > { %v7731_v60 = vpop.permute.xlu0 %3621 }
 0x6d9   : > { %v7669_v17 = vpop.permute.xlu1 %3221 }
 0x6da   : > { %3201 = vrot.lane.b32.xlu0 %v3197_v35, %s8213_s27 }
 0x6db   : > { %3703 = vrot.lane.b32.xlu1 %v3698_v48, %s8484_s8 }
 0x6dc   : > { %v7736_v21 = vpop.permute.xlu0 %3641 }
 0x6dd   : > { %v7677_v2 = vpop.permute.xlu1 %3301 }
 0x6de   : > { %3281 = vrot.lane.b32.xlu0 %v3277_v59, %s8328_s29 }
 0x6df   : > { %3723 = vrot.lane.b32.xlu1 %v3718_v34, %s8348_s5  ;;  %s8511_s5 = smov 62  }
 0x6e0   : > { %v7738_v11 = vpop.permute.xlu0 %3701 }
 0x6e1   : > { %v7685_v25 = vpop.permute.xlu1 %3321 }
 0x6e2   : > { %3361 = vrot.lane.b32.xlu0 %v3357_v57, %s8217_s20 }
 0x6e3   : > { %3783 = vrot.lane.b32.xlu1 %v3778_v12, %s8350_s6 }
 0x6e4   : > { %v7742_v61 = vpop.permute.xlu0 %3721 }
 0x6e5   : > { %v7695_v0 = vpop.permute.xlu1 %3381 }
 0x6e6   : > { %3441 = vrot.lane.b32.xlu0 %v3437_v22, %s8338_s4 }
 0x6e7   : > { %3803 = vrot.lane.b32.xlu1 %v3798_v43, %s8350_s6 }
 0x6e8   : > { %v7744_v44 = vpop.permute.xlu0 %2963 }
 0x6e9   : > { %v7701_v42 = vpop.permute.xlu1 %3461 }
 0x6ea   : > { %3521 = vrot.lane.b32.xlu0 %v3517_v50, %s8214_s18 }
 0x6ec   : > { %v3004_v12 = vpop.permute.xlu0 %3003 }
 0x6ed   : > { %v7708_v8 = vpop.permute.xlu1 %3481 }
 0x6ee   : > { %3601 = vrot.lane.b32.xlu0 %v3597_v23, %s8482_s22 }
 0x6f1   : > { %v7715_v32 = vpop.permute.xlu1 %3541 }
 0x6f2   : > { %3681 = vrot.lane.b32.xlu0 %v3677_v3, %s8484_s8  ;;  %v3144_v3 = vpop.permute.xlu0 %3143 }
 0x6f5   : > { %v7720_v58 = vpop.permute.xlu1 %2983 }
 0x6f6   : > { %3761 = vrot.lane.b32.xlu0 %v3757_v1, %s8350_s6 }
 0x6f9   : > { %v3024_v7 = vpop.permute.xlu1 %3023 }
 0x6fa   : > { %3841 = vrot.lane.b32.xlu0 %v3837_v36, %s8511_s5  ;;  %v3028_v37 = vadd.f32 %v3024_v7, %v2946_v27 }
 0x6fd   : > { %v3104_v15 = vpop.permute.xlu1 %3103 }
 0x6fe   : > { %3883 = vperm.xlu0 %5334, %v3879_v16   ;;  %v3108_v62 = vadd.f32 %v3104_v15, %v3028_v37  ;;  %v8513_v16 = vld [vmem:[#allocation64_spill] sm:$0xff] }
 0x6ff   : > { %v2934_v15 = vmul.f32 %v8513_v16, %v7507_v38 }
 0x701   : > { %v3184_v55 = vpop.permute.xlu1 %3183 }
 0x702   : > { %3904 = vperm.xlu0 %5334, %v3896_v6   ;;  %v3188_v52 = vadd.f32 %v3184_v55, %v3108_v62  ;;  %v3038_v6 = vmul.f32 %v7388_v63, %v7507_v38  ;;  %v3164_v55 = vpop.permute.xlu0 %3163 }
 0x705   : > { %v3264_v24 = vpop.permute.xlu1 %3263 }
 0x706   : > { %v3268_v5 = vadd.f32 %v3264_v24, %v3188_v52  ;;  %v3008_v24 = vadd.f32 %v3004_v12, %v2934_v15  ;;  %v3304_v37 = vpop.permute.xlu0 %3303  ;;  %v3278_v52 = vmul.f32 %v7401_v49, %v7507_v38  ;;  %v8515_v49 = vld [vmem:[#allocation62_spill] sm:$0xff] }
 0x709   : > { %v3344_v47 = vpop.permute.xlu1 %3343 }
 0x70a   : > { %v3348_v48 = vadd.f32 %v3344_v47, %v3268_v5 }
 0x70d   : > { %v3424_v14 = vpop.permute.xlu1 %3423 }
 0x70e   : > { %v3428_v59 = vadd.f32 %v3424_v14, %v3348_v48  ;;  %v3358_v48 = vmul.f32 %v7563_v40, %v7507_v38 }
 0x711   : > { %v3504_v30 = vpop.permute.xlu1 %3503 }
 0x712   : > { %v3508_v57 = vadd.f32 %v3504_v30, %v3428_v59  ;;  %v3198_v30 = vmul.f32 %v7398_v9, %v7507_v38 }
 0x715   : > { %v3584_v35 = vpop.permute.xlu1 %3583 }
 0x716   : > { %v3588_v22 = vadd.f32 %v3584_v35, %v3508_v57  ;;  %v3324_v35 = vpop.permute.xlu0 %3323 }
 0x719   : > { %v3664_v34 = vpop.permute.xlu1 %3663 }
 0x71a   : > { %v3668_v50 = vadd.f32 %v3664_v34, %v3588_v22  ;;  %v8514_v34 = vld [vmem:[#allocation14_spill] sm:$0xff]  ;;  %v3464_v57 = vpop.permute.xlu0 %3463  ;;  %v3438_v22 = vmul.f32 %v7405_v46, %v7507_v38 }
 0x71b   : > { %v2922_v9 = vmul.f32 %v8514_v34, %v7507_v38 }
 0x71d   : > { %v3744_v43 = vpop.permute.xlu1 %3743  ;;  %v2988_v16 = vadd.f32 %v7720_v58, %v2922_v9 }
 0x71e   : > { %v3748_v23 = vadd.f32 %v3744_v43, %v3668_v50  ;;  %v2921_v43 = vmul.f32 %v8515_v49, %v7433_v45  ;;  %v8516_v50 = vld [vmem:[#allocation19_spill] sm:$0xff] }
 0x720   : > { %v2987_v40 = vadd.f32 %v7608_v13, %v2921_v43 }
 0x721   : > { %v3824_v1 = vpop.permute.xlu1 %3823 }
 0x722   : > { %v3828_v36 = vadd.f32 %v3824_v1, %v3748_v23  ;;  %v2933_v23 = vmul.f32 %v8516_v50, %v7433_v45  ;;  %v3067_v46 = vadd.f32 %v7645_v31, %v2987_v40 }
 0x724   : > { %3863 = vrot.lane.b32.xlu1 %v3828_v36, %s8509_s1  ;;  %v3007_v36 = vadd.f32 %v7640_v51, %v2933_v23  ;;  %v3598_v51 = vmul.f32 %v7409_v54, %v7507_v38 }
 0x725   : > { %v3064_v7 = vpop.permute.xlu1 %3063 }
 0x728   : > { %3043 = vrot.lane.b32.xlu1 %v3038_v6, %s8311_s2  ;;  %v3518_v6 = vmul.f32 %v7580_v28, %v7507_v38  ;;  %s8521_s2 = smov 105  }
 0x729   : > { %v3084_v47 = vpop.permute.xlu1 %3083 }
 0x72a   : > { %v3088_v27 = vadd.f32 %v3084_v47, %v3008_v24  ;;  %v3484_v24 = vpop.permute.xlu0 %3483  ;;  %v3147_v47 = vadd.f32 %v7653_v39, %v3067_v46 }
 0x72c   : > { %3123 = vrot.lane.b32.xlu1 %v3118_v29, %s8316_s19  ;;  %v3168_v14 = vadd.f32 %v3164_v55, %v3088_v27  ;;  %v3068_v55 = vadd.f32 %v3064_v7, %v2988_v16  ;;  %v3087_v29 = vadd.f32 %v7693_v33, %v3007_v36  ;;  %v3678_v33 = vmul.f32 %v7593_v53, %v7507_v38  ;;  %s8518_s19 = smov 126   ;;  %v8519_v16 = vld [vmem:[#allocation34_spill] sm:$0xff] }
 0x72d   : > { %v3224_v62 = vpop.permute.xlu1 %3223 }
 0x72e   : > { %v3167_v27 = vadd.f32 %v7661_v19, %v3087_v29  ;;  %v3148_v28 = vadd.f32 %v3144_v3, %v3068_v55  ;;  %v3782_v34 = vpop.permute.xlu0 %3781 }
 0x730   : > { %3203 = vrot.lane.b32.xlu1 %v3198_v30, %s8213_s27  ;;  %v3228_v7 = vadd.f32 %v3224_v62, %v3148_v28 }
 0x731   : > { %v3244_v63 = vpop.permute.xlu1 %3243 }
 0x732   : > { %v3248_v5 = vadd.f32 %v3244_v63, %v3168_v14  ;;  %v3227_v14 = vadd.f32 %v7669_v17, %v3147_v47  ;;  %v3247_v63 = vadd.f32 %v7704_v41, %v3167_v27  ;;  %v3308_v17 = vadd.f32 %v3304_v37, %v3228_v7  ;;  %v3802_v43 = vpop.permute.xlu0 %3801 }
 0x734   : > { %3283 = vrot.lane.b32.xlu1 %v3278_v52, %s8328_s29  ;;  %v3328_v59 = vadd.f32 %v3324_v35, %v3248_v5  ;;  %v3307_v31 = vadd.f32 %v7677_v2, %v3227_v14  ;;  %v3327_v52 = vadd.f32 %v7685_v25, %v3247_v63  ;;  %v8517_v2 = vld [vmem:[#allocation27_spill] sm:$0xff]  ;;  %v3838_v25 = vmul.f32 %v7610_v10, %v7507_v38  ;;  %s4939_s29 = sshll.u32 %s5628_s17, 10 }
 0x735   : > { %v3384_v18 = vpop.permute.xlu1 %3383  ;;  %v3758_v62 = vmul.f32 %v8517_v2, %v7507_v38 }
 0x736   : > { %v3387_v54 = vadd.f32 %v7695_v0, %v3307_v31  ;;  %v3388_v35 = vadd.f32 %v3384_v18, %v3308_v17  ;;  %v3407_v53 = vadd.f32 %v7713_v26, %v3327_v52  ;;  %v3880_v26 = vld [vmem:[%s8035_s9 + $0x8] sm:$0xff] }
 0x738   : > { %3363 = vrot.lane.b32.xlu1 %v3358_v48, %s8217_s20  ;;  %v3467_v19 = vadd.f32 %v7701_v42, %v3387_v54  ;;  %v3487_v42 = vadd.f32 %v7708_v8, %v3407_v53  ;;  %v3468_v37 = vadd.f32 %v3464_v57, %v3388_v35 }
 0x739   : > { %v3404_v12 = vpop.permute.xlu1 %3403 }
 0x73a   : > { %v3408_v1 = vadd.f32 %v3404_v12, %v3328_v59  ;;  %v3547_v5 = vadd.f32 %v7715_v32, %v3467_v19  ;;  %v3567_v18 = vadd.f32 %v7723_v4, %v3487_v42  ;;  %v3895_v4 = vld [vmem:[%s8036_s10] sm:$0xff] }
 0x73c   : > { %3443 = vrot.lane.b32.xlu1 %v3438_v22, %s8338_s4  ;;  %v3488_v13 = vadd.f32 %v3484_v24, %v3408_v1  ;;  %v3627_v41 = vadd.f32 %v7731_v60, %v3547_v5  ;;  %v3647_v57 = vadd.f32 %v7736_v21, %v3567_v18 }
 0x73d   : > { %v3544_v15 = vpop.permute.xlu1 %3543 }
 0x73e   : > { %v3548_v59 = vadd.f32 %v3544_v15, %v3468_v37  ;;  %v3707_v9 = vadd.f32 %v7738_v11, %v3627_v41  ;;  %v3727_v11 = vadd.f32 %v7742_v61, %v3647_v57  ;;  %v2910_v15 = vmul.f32 %v8519_v16, %v7507_v38 }
 0x740   : > { %3523 = vrot.lane.b32.xlu1 %v3518_v6, %s8214_s18  ;;  %v3787_v60 = vadd.f32 %v3782_v34, %v3707_v9  ;;  %v3862_v50 = vpop.permute.xlu0 %3861  ;;  %v3807_v23 = vadd.f32 %v3802_v43, %v3727_v11  ;;  %v2968_v46 = vadd.f32 %v7744_v44, %v2910_v15 }
 0x741   : > { %v3564_v58 = vpop.permute.xlu1 %3563 }
 0x742   : > { %v3568_v30 = vadd.f32 %v3564_v58, %v3488_v13  ;;  %v3867_v1 = vadd.f32 %v3862_v50, %v3807_v23  ;;  %v8520_v50 = vld [vmem:[#allocation17_spill] sm:$0xff] }
 0x744   : > { %3603 = vrot.lane.b32.xlu1 %v3598_v51, %s8482_s22  ;;  %v3042_v55 = vpop.permute.xlu0 %3041  ;;  %s7978_s22 = scalar_lea.hbm %s8040_s14, %s4939_s29 }
 0x745   : > { %v3624_v39 = vpop.permute.xlu1 %3623 }
 0x746   : > { %v3628_v12 = vadd.f32 %v3624_v39, %v3548_v59 }
 0x748   : > { %3683 = vrot.lane.b32.xlu1 %v3678_v33, %s8484_s8  ;;  %v3122_v29 = vpop.permute.xlu0 %3121  ;;  %s458_s8 = sand.u32 1, %s5439_s30  }
 0x749   : > { %v3644_v3 = vpop.permute.xlu1 %3643  ;;  %s4691_s4 = sshll.u32 %s458_s8, 6  ;;  %s7986_s17 = scalar_lea.sflag [#allocation6], %s458_s8 }
 0x74a   : > { %v3648_v48 = vadd.f32 %v3644_v3, %v3568_v30 }
 0x74c   : > { %3763 = vrot.lane.b32.xlu1 %v3758_v62, %s8350_s6  ;;  %v3202_v27 = vpop.permute.xlu0 %3201  ;;  %v2909_v62 = vmul.f32 %v7618_v20, %v7433_v45  ;;  %s7954_s6 = scalar_lea.vmem [#allocation5], %s4691_s4 }
 0x74d   : > { %v3704_v0 = vpop.permute.xlu1 %3703 }
 0x74e   : > { %v3708_v22 = vadd.f32 %v3704_v0, %v3628_v12  ;;  %v2967_v5 = vadd.f32 %v7603_v56, %v2909_v62 }
 0x750   : > { %3843 = vrot.lane.b32.xlu1 %v3838_v25, %s8511_s5  ;;  %v3282_v31 = vpop.permute.xlu0 %3281  ;;  %s5529_s5 = smov [#allocation5]  }
 0x751   : > { %v3724_v32 = vpop.permute.xlu1 %3723 }
 0x752   : > { %v3728_v10 = vadd.f32 %v3724_v32, %v3648_v48  ;;  %v3047_v48 = vadd.f32 %v3042_v55, %v2967_v5 }
 0x754   : > { %3888 = vperm.xlu1 %5335, %v3880_v26   ;;  %v3362_v33 = vpop.permute.xlu0 %3361  ;;  %v3127_v0 = vadd.f32 %v3122_v29, %v3047_v48 }
 0x755   : > { %v3784_v8 = vpop.permute.xlu1 %3783 }
 0x756   : > { %v3788_v49 = vadd.f32 %v3784_v8, %v3708_v22  ;;  %v3207_v25 = vadd.f32 %v3202_v27, %v3127_v0 }
 0x758   : > { %3853 = vrot.lane.b32.xlu0 %v3788_v49, %s8509_s1  ;;  %3851 = vrot.lane.b32.xlu1 %v3787_v60, %s8509_s1  ;;  %v3442_v52 = vpop.permute.xlu0 %3441  ;;  %v3287_v41 = vadd.f32 %v3282_v31, %v3207_v25  ;;  %v3924_v31 = vld [vmem:[%s8038_s12 + $0x8] sm:$0xff] }
 0x759   : > { %v3804_v40 = vpop.permute.xlu1 %3803 }
 0x75a   : > { %v3808_v21 = vadd.f32 %v3804_v40, %v3728_v10  ;;  %v3367_v59 = vadd.f32 %v3362_v33, %v3287_v41 }
 0x75c   : > { %3899 = vperm.xlu1 %5335, %v3895_v4   ;;  %v3522_v2 = vpop.permute.xlu0 %3521  ;;  %v3447_v34 = vadd.f32 %v3442_v52, %v3367_v59 }
 0x75e   : > { %v3527_v18 = vadd.f32 %v3522_v2, %v3447_v34 }
 0x760   : > { %3871 = vrot.lane.b32.xlu1 %v3867_v1, %s8518_s19  ;;  %v3602_v35 = vpop.permute.xlu0 %3601 }
 0x761   : > { %v3607_v9 = vadd.f32 %v3602_v35, %v3527_v18 }
 0x764   : > { %v3682_v42 = vpop.permute.xlu0 %3681 }
 0x765   : > { %v3687_v10 = vadd.f32 %v3682_v42, %v3607_v9 }
 0x768   : > { %v3762_v32 = vpop.permute.xlu0 %3761 }
 0x769   : > { %v3767_v45 = vadd.f32 %v3762_v32, %v3687_v10 }
 0x76c   : > { %v3842_v22 = vpop.permute.xlu0 %3841 }
 0x76d   : > { %v3847_v56 = vadd.f32 %v3842_v22, %v3767_v45 }
 0x779   : > { %v3884_v49 = vpop.permute.xlu0 %3883 }
 0x77d   : > { %v3905_v1 = vpop.permute.xlu0 %3904 }
 0x796   : > { %v3864_v36 = vpop.permute.xlu1 %3863 }
 0x797   : > { %v3868_v6 = vadd.f32 %v3864_v36, %v3808_v21 }
 0x799   : > { %3873 = vrot.lane.b32.xlu0 %v3868_v6, %s8518_s19  ;;  %s4625_s19 = sshll.u32 %s7954_s6, 4  ;;  %s7980_s19 = int_to_ptr.vmem [resolvable:$true] %s4625_s19 }
 0x79a   : > { %v3044_v24 = vpop.permute.xlu1 %3043  ;;  %s5387_s1 = scalar_lea.vmem %s7980_s19, 1024 }
 0x79b   : > { %v3048_v61 = vadd.f32 %v3044_v24, %v2968_v46  ;;  %p5388_p11 = scmp.ne.s32.totalorder %s7980_s19, %s5387_s1 }
 0x79d   : > { %p5389_p12 = pnand %p5388_p11, %p5645_p5 }
 0x79e   : > { %v3124_v47 = vpop.permute.xlu1 %3123 }
 0x79f   : > { %v3128_v13 = vadd.f32 %v3124_v47, %v3048_v61  ;;  %p5390_p13 = pneg %p5389_p12 }
 0x7a2   : > { %v3204_v51 = vpop.permute.xlu1 %3203 }
 0x7a3   : > { %v3208_v58 = vadd.f32 %v3204_v51, %v3128_v13 }
 0x7a6   : > { %v3284_v14 = vpop.permute.xlu1 %3283 }
 0x7a7   : > { %v3288_v28 = vadd.f32 %v3284_v14, %v3208_v58  ;;  %v3923_v14 = vld [vmem:[%s8038_s12] sm:$0xff] }
 0x7aa   : > { %v3364_v30 = vpop.permute.xlu1 %3363 }
 0x7ab   : > { %v3368_v7 = vadd.f32 %v3364_v30, %v3288_v28  ;;  %v4085_v28 = vld [vmem:[%s8039_s13] sm:$0xff]  ;;  %v8522_v30 = vmov 0.0  }
 0x7ac   : > { %4990 = vmatprep.mubr.msk.bf16.mxu0 %vm5528_vm9, %v8522_v30  ;;  %5002 = vmatprep.mubr.msk.bf16.mxu1 %vm5528_vm9, %v8522_v30 }
 0x7ae   : > { %v3444_v38 = vpop.permute.xlu1 %3443 }
 0x7af   : > { %v3448_v39 = vadd.f32 %v3444_v38, %v3368_v7  ;;  %v4086_v7 = vld [vmem:[%s8039_s13 + $0x8] sm:$0xff] }
 0x7b2   : > { %v3524_v44 = vpop.permute.xlu1 %3523 }
 0x7b3   : > { %v3528_v63 = vadd.f32 %v3524_v44, %v3448_v39 }
 0x7b6   : > { %v3604_v54 = vpop.permute.xlu1 %3603 }
 0x7b7   : > { %v3608_v19 = vadd.f32 %v3604_v54, %v3528_v63 }
 0x7ba   : > { %v3684_v17 = vpop.permute.xlu1 %3683 }
 0x7bb   : > { %v3688_v3 = vadd.f32 %v3684_v17, %v3608_v19 }
 0x7be   : > { %v3764_v53 = vpop.permute.xlu1 %3763 }
 0x7bf   : > { %v3768_v40 = vadd.f32 %v3764_v53, %v3688_v3 }
 0x7c2   : > { %v3844_v37 = vpop.permute.xlu1 %3843 }
 0x7c3   : > { %v3848_v36 = vadd.f32 %v3844_v37, %v3768_v40 }
 0x7ca   : > { %v3854_v21 = vpop.permute.xlu0 %3853 }
 0x7cb   : > { %v3858_v16 = vadd.f32 %v3854_v21, %v3848_v36 }
 0x7cf   : > { %v3889_v26 = vpop.permute.xlu1 %3888 }
 0x7d3   : > { %v3852_v12 = vpop.permute.xlu1 %3851 }
 0x7d4   : > { %v3857_v8 = vadd.f32 %v3852_v12, %v3847_v56 }
 0x7d7   : > { %v3900_v20 = vpop.permute.xlu1 %3899 }
 0x7db   : > { %v3872_v60 = vpop.permute.xlu1 %3871 }
 0x7dc   : > { %v3877_v57 = vadd.f32 %v3872_v60, %v3857_v8 }
 0x7de   : > { %v3891_v43 = vadd.f32 %v3884_v49, %v3877_v57 }
 0x7e0   : > { %vm3893_vm7 = vcmp.gt.f32.partialorder %v3891_v43, 0.0  ;;  %v3907_v4 = vmul.f32 %v3900_v20, %v3891_v43 }
 0x7e2   : > { %v3909_v11 = vsel %vm3893_vm7, %v3891_v43, %v3907_v4  ;;  %v5369_v4 = vld [vmem:[%s8037_s11] sm:$0xff]  }
 0x7e3   : > { %v3911_v23 = vmul.f32 %v8520_v50, %v3909_v11 }
 0x7e5   : > { %3915 = vrot.lane.b32.xlu1 %v3911_v23, %s8258_s24 }
 0x80b   : > { %v3874_v15 = vpop.permute.xlu0 %3873 }
 0x80c   : > { %v3878_v6 = vadd.f32 %v3874_v15, %v3858_v16 }
 0x80e   : > { %v3892_v46 = vadd.f32 %v3889_v26, %v3878_v6 }
 0x810   : > { %vm3894_vm8 = vcmp.gt.f32.partialorder %v3892_v46, 0.0  ;;  %v3908_v55 = vmul.f32 %v3905_v1, %v3892_v46 }
 0x812   : > { %v3910_v24 = vsel %vm3894_vm8, %v3892_v46, %v3908_v55 }
 0x813   : > { %v3912_v61 = vmul.f32 %v8520_v50, %v3910_v24  ;;  %v5371_v24 = vld [vmem:[%s8037_s11 + $0x8] sm:$0xff]  }
 0x815   : > { %3917 = vrot.lane.b32.xlu0 %v3912_v61, %s8258_s24 }
 0x857   : > { %v3916_v47 = vpop.permute.xlu1 %3915 }
 0x858   : > { %3921 = vst.msk [vmem:[#allocation3] sm:$0xff] %vm1864_vm4, %v3916_v47 }
 0x85f   : > { %v3973_v29 = vld [vmem:[#allocation3] sm:$0xff] }
 0x860   : > { %v4913_v13 = vpack.c.bf16 %v3973_v29, %v3973_v29 }
 0x862   : > { %3981 = vrot.lane.b32.xlu1 %v4913_v13, %s8217_s20 }
 0x866   : > { %3965 = vrot.lane.b32.xlu1 %v4913_v13, %s8216_s25 }
 0x86a   : > { %3949 = vrot.lane.b32.xlu1 %v4913_v13, %s8521_s2 }
 0x86e   : > { %4160 = vrot.lane.b32.xlu1 %v4913_v13, %s8220_s26 }
 0x872   : > { %3933 = vrot.lane.b32.xlu1 %v4913_v13, %s8213_s27 }
 0x876   : > { %4144 = vrot.lane.b32.xlu1 %v4913_v13, %s8217_s20 }
 0x87a   : > { %4128 = vrot.lane.b32.xlu1 %v4913_v13, %s8215_s21 }
 0x87e   : > { %4329 = vrot.lane.b32.xlu1 %v4913_v13, %s8223_s15 }
 0x882   : > { %4112 = vrot.lane.b32.xlu1 %v4913_v13, %s8521_s2 }
 0x886   : > { %4313 = vrot.lane.b32.xlu1 %v4913_v13, %s8222_s0 }
 0x887   : > { %v3918_v51 = vpop.permute.xlu0 %3917 }
 0x888   : > { %3922 = vst.msk [vmem:[#allocation3 + $0x8] sm:$0xff] %vm1864_vm4, %v3918_v51 }
 0x88a   : > { %4297 = vrot.lane.b32.xlu1 %v4913_v13, %s8217_s20 }
 0x88e   : > { %4498 = vrot.lane.b32.xlu1 %v4913_v13, %s8214_s18 }
 0x88f   : > { %v3974_v58 = vld [vmem:[#allocation3 + $0x8] sm:$0xff] }
 0x890   : > { %v4914_v27 = vpack.c.bf16 %v3974_v58, %v3974_v58 }
 0x892   : > { %4281 = vrot.lane.b32.xlu1 %v4913_v13, %s8216_s25  ;;  %3983 = vrot.lane.b32.xlu0 %v4914_v27, %s8217_s20 }
 0x896   : > { %4482 = vrot.lane.b32.xlu1 %v4913_v13, %s8223_s15  ;;  %3967 = vrot.lane.b32.xlu0 %v4914_v27, %s8216_s25 }
 0x89a   : > { %4466 = vrot.lane.b32.xlu1 %v4913_v13, %s8220_s26  ;;  %3951 = vrot.lane.b32.xlu0 %v4914_v27, %s8521_s2 }
 0x89e   : > { %4450 = vrot.lane.b32.xlu1 %v4913_v13, %s8217_s20  ;;  %4162 = vrot.lane.b32.xlu0 %v4914_v27, %s8220_s26 }
 0x8a2   : > { %4001 = vperm.xlu1 %5335, %v3923_v14   ;;  %3935 = vrot.lane.b32.xlu0 %v4914_v27, %s8213_s27  ;;  %s5391_s27 = sshll.u32 %s5529_s5, 4  ;;  %s5392_s27 = int_to_ptr.vmem [resolvable:$false] %s5391_s27 }
 0x8a3   : > { %p5394_p0 = scmp.lt.s32.totalorder %s7980_s19, %s5392_s27 }
 0x8a6   : > { %4089 = vperm.xlu1 %5335, %v4085_v28   ;;  %4146 = vrot.lane.b32.xlu0 %v4914_v27, %s8217_s20 }
 0x8aa   : > { %4258 = vperm.xlu1 %5335, %v4085_v28   ;;  %4130 = vrot.lane.b32.xlu0 %v4914_v27, %s8215_s21  ;;  %s5393_s21 = scalar_lea.vmem %s5392_s27, 2048 }
 0x8ab   : > { %p5395_p1 = scmp.lt.s32.totalorder %s5393_s21, %s5387_s1 }
 0x8ad   : > { %p5396_p2 = por %p5395_p1, %p5394_p0 }
 0x8ae   : > { %4427 = vperm.xlu1 %5335, %v4085_v28   ;;  %4331 = vrot.lane.b32.xlu0 %v4914_v27, %s8223_s15 }
 0x8af   : > { %p5397_p3 = pnand %p5396_p2, %p5390_p13 }
 0x8b2   : > { %4596 = vperm.xlu1 %5335, %v4085_v28   ;;  %4114 = vrot.lane.b32.xlu0 %v4914_v27, %s8521_s2 }
 0x8b6   : > { %4315 = vrot.lane.b32.xlu0 %v4914_v27, %s8222_s0 }
 0x8ba   : > { %4299 = vrot.lane.b32.xlu0 %v4914_v27, %s8217_s20 }
 0x8be   : > { %4500 = vrot.lane.b32.xlu0 %v4914_v27, %s8214_s18 }
 0x8c2   : > { %4283 = vrot.lane.b32.xlu0 %v4914_v27, %s8216_s25 }
 0x8c6   : > { %4484 = vrot.lane.b32.xlu0 %v4914_v27, %s8223_s15 }
 0x8ca   : > { %4468 = vrot.lane.b32.xlu0 %v4914_v27, %s8220_s26 }
 0x8ce   : > { %4452 = vrot.lane.b32.xlu0 %v4914_v27, %s8217_s20 }
 0x8d2   : > { %4006 = vperm.xlu0 %5334, %v3924_v31  }
 0x8d4   : > { %v3982_v38 = vpop.permute.xlu1 %3981 }
 0x8d5   : > { %3987 = vst.msk [vmem:[#allocation4 + $0x18] sm:$0xf] %vm1102_vm0, %v3982_v38 }
 0x8d6   : > { %4094 = vperm.xlu0 %5334, %v4086_v7  }
 0x8d8   : > { %v3966_v39 = vpop.permute.xlu1 %3965 }
 0x8d9   : > { %3971 = vst.msk [vmem:[#allocation4 + $0x10] sm:$0xf] %vm1102_vm0, %v3966_v39 }
 0x8da   : > { %4263 = vperm.xlu0 %5334, %v4086_v7  }
 0x8dc   : > { %v3950_v33 = vpop.permute.xlu1 %3949  ;;  %v3997_v44 = vld [vmem:[#allocation4 + $0x18] sm:$0xf] }
 0x8dd   : > { %3955 = vst.msk [vmem:[#allocation4 + $0x8] sm:$0xf] %vm1102_vm0, %v3950_v33 }
 0x8de   : > { %4432 = vperm.xlu0 %5334, %v4086_v7  }
 0x8e0   : > { %v4161_v63 = vpop.permute.xlu1 %4160  ;;  %v3995_v52 = vld [vmem:[#allocation4 + $0x10] sm:$0xf] }
 0x8e1   : > { %4166 = vst.msk [vmem:[#allocation4 + $0x18] sm:$0xf] %vm1102_vm0, %v4161_v63  ;;  %v5380_v63 = vld [vmem:[%s8037_s11 + $0x18] sm:$0xff]  }
 0x8e2   : > { %4601 = vperm.xlu0 %5334, %v4086_v7   ;;  %v5376_v7 = vld [vmem:[%s8037_s11 + $0x10] sm:$0xff]  }
 0x8e4   : > { %v3934_v54 = vpop.permute.xlu1 %3933  ;;  %v3993_v17 = vld [vmem:[#allocation4 + $0x8] sm:$0xf] }
 0x8e5   : > { %3939 = vst.msk [vmem:[#allocation4] sm:$0xf] %vm1102_vm0, %v3934_v54 }
 0x8e8   : > { %v4145_v19 = vpop.permute.xlu1 %4144  ;;  %v4177_v2 = vld [vmem:[#allocation4 + $0x18] sm:$0xf] }
 0x8e9   : > { %4150 = vst.msk [vmem:[#allocation4 + $0x10] sm:$0xf] %vm1102_vm0, %v4145_v19 }
 0x8ec   : > { %v4129_v3 = vpop.permute.xlu1 %4128  ;;  %v3991_v5 = vld [vmem:[#allocation4] sm:$0xf] }
 0x8ed   : > { %4134 = vst.msk [vmem:[#allocation4 + $0x8] sm:$0xf] %vm1102_vm0, %v4129_v3 }
 0x8f0   : > { %v4330_v62 = vpop.permute.xlu1 %4329  ;;  %v4175_v48 = vld [vmem:[#allocation4 + $0x10] sm:$0xf] }
 0x8f1   : > { %4335 = vst.msk [vmem:[#allocation4 + $0x18] sm:$0xf] %vm1102_vm0, %v4330_v62 }
 0x8f4   : > { %v4113_v35 = vpop.permute.xlu1 %4112  ;;  %v4173_v0 = vld [vmem:[#allocation4 + $0x8] sm:$0xf] }
 0x8f5   : > { %4118 = vst.msk [vmem:[#allocation4] sm:$0xf] %vm1102_vm0, %v4113_v35 }
 0x8f8   : > { %v4314_v53 = vpop.permute.xlu1 %4313 }
 0x8f9   : > { %4319 = vst.msk [vmem:[#allocation4 + $0x10] sm:$0xf] %vm1102_vm0, %v4314_v53 }
 0x8fc   : > { %v4298_v25 = vpop.permute.xlu1 %4297  ;;  %v7890_v41 = vld [vmem:[#allocation4] sm:$0xf] }
 0x8fd   : > { %4303 = vst.msk [vmem:[#allocation4 + $0x8] sm:$0xf] %vm1102_vm0, %v4298_v25 }
 0x900   : > { %v4499_v42 = vpop.permute.xlu1 %4498 }
 0x904   : > { %v4282_v37 = vpop.permute.xlu1 %4281  ;;  %v3984_v59 = vpop.permute.xlu0 %3983 }
 0x905   : > { %4287 = vst.msk [vmem:[#allocation4] sm:$0xf] %vm1102_vm0, %v4282_v37  ;;  %3988 = vst.msk [vmem:[#allocation4 + $0x1c] sm:$0xf] %vm1102_vm0, %v3984_v59 }
 0x908   : > { %v3968_v34 = vpop.permute.xlu0 %3967  ;;  %v4483_v55 = vpop.permute.xlu1 %4482 }
 0x909   : > { %3972 = vst.msk [vmem:[#allocation4 + $0x14] sm:$0xf] %vm1102_vm0, %v3968_v34 }
 0x90c   : > { %v3952_v32 = vpop.permute.xlu0 %3951  ;;  %v3998_v26 = vld [vmem:[#allocation4 + $0x1c] sm:$0xf]  ;;  %v4467_v29 = vpop.permute.xlu1 %4466 }
 0x90d   : > { %3956 = vst.msk [vmem:[#allocation4 + $0xc] sm:$0xf] %vm1102_vm0, %v3952_v32  ;;  %v4792_v18 = vcombine.low %v3997_v44, %v3998_v26 }
 0x90f   : > { %4983 = vmatpush3.bf16.msra.mxu0 %v4792_v18 }
 0x910   : > { %v4163_v9 = vpop.permute.xlu0 %4162  ;;  %4984 = vmatprep.subr.bf16.mxu0 %v8522_v30  ;;  %v3996_v12 = vld [vmem:[#allocation4 + $0x14] sm:$0xf]  ;;  %v4451_v14 = vpop.permute.xlu1 %4450 }
 0x911   : > { %4167 = vst.msk [vmem:[#allocation4 + $0x1c] sm:$0xf] %vm1102_vm0, %v4163_v9  ;;  %v4791_v10 = vcombine.low %v3995_v52, %v3996_v12 }
 0x913   : > { %4985 = vmatpush3.bf16.msra.mxu0 %v4791_v10 }
 0x914   : > { %v3936_v22 = vpop.permute.xlu0 %3935  ;;  %4986 = vmatprep.subr.bf16.mxu0 %v8522_v30  ;;  %v3994_v45 = vld [vmem:[#allocation4 + $0xc] sm:$0xf] }
 0x915   : > { %3940 = vst.msk [vmem:[#allocation4 + $0x4] sm:$0xf] %vm1102_vm0, %v3936_v22  ;;  %v4790_v20 = vcombine.low %v3993_v17, %v3994_v45 }
 0x917   : > { %4987 = vmatpush3.bf16.msra.mxu0 %v4790_v20 }
 0x918   : > { %v4147_v56 = vpop.permute.xlu0 %4146  ;;  %v4178_v8 = vld [vmem:[#allocation4 + $0x1c] sm:$0xf]  ;;  %4988 = vmatprep.subr.bf16.mxu0 %v8522_v30 }
 0x919   : > { %4151 = vst.msk [vmem:[#allocation4 + $0x14] sm:$0xf] %vm1102_vm0, %v4147_v56  ;;  %v4808_v60 = vcombine.low %v4177_v2, %v4178_v8 }
 0x91b   : > { %4995 = vmatpush3.bf16.msra.mxu1 %v4808_v60 }
 0x91c   : > { %v4131_v57 = vpop.permute.xlu0 %4130  ;;  %v3992_v49 = vld [vmem:[#allocation4 + $0x4] sm:$0xf]  ;;  %4996 = vmatprep.subr.bf16.mxu1 %v8522_v30 }
 0x91d   : > { %4135 = vst.msk [vmem:[#allocation4 + $0xc] sm:$0xf] %vm1102_vm0, %v4131_v57  ;;  %v4789_v43 = vcombine.low %v3991_v5, %v3992_v49  ;;  %v4002_v54 = vpop.permute.xlu1 %4001 }
 0x91f   : > { %4989 = vmatpush3.bf16.msra.mxu0 %v4789_v43 }
 0x920   : > { %v4332_v11 = vpop.permute.xlu0 %4331  ;;  %v4176_v50 = vld [vmem:[#allocation4 + $0x14] sm:$0xf]  ;;  %5006 = vmatprep.subr.bf16.mxu0 %v8522_v30 }
 0x921   : > { %4336 = vst.msk [vmem:[#allocation4 + $0x1c] sm:$0xf] %vm1102_vm0, %v4332_v11  ;;  %v4807_v23 = vcombine.low %v4175_v48, %v4176_v50  ;;  %v4090_v3 = vpop.permute.xlu1 %4089 }
 0x922   : > { %4991 = vmatmul.mubr.msk.bf16.vlgmr.msra.gmra.mxu0 %vm4038_vm10, %v5369_v4 }
 0x923   : > { %4997 = vmatpush3.bf16.msra.mxu1 %v4807_v23  ;;  %5014 = vmatprep.mubr.msk.bf16.mxu0 %vm5528_vm9, %v8522_v30 }
 0x924   : > { %v4115_v1 = vpop.permute.xlu0 %4114  ;;  %4998 = vmatprep.subr.bf16.mxu1 %v8522_v30  ;;  %v4174_v40 = vld [vmem:[#allocation4 + $0xc] sm:$0xf] }
 0x925   : > { %4119 = vst.msk [vmem:[#allocation4 + $0x4] sm:$0xf] %vm1102_vm0, %v4115_v1  ;;  %v4806_v21 = vcombine.low %v4173_v0, %v4174_v40  ;;  %v4259_v37 = vpop.permute.xlu1 %4258 }
 0x927   : > { %4999 = vmatpush3.bf16.msra.mxu1 %v4806_v21 }
 0x928   : > { %v4316_v36 = vpop.permute.xlu0 %4315  ;;  %v5370_v16 = vld [vmem:[#allocation4 + $0x18] sm:$0xff]   ;;  %5000 = vmatprep.subr.bf16.mxu1 %v8522_v30 }
 0x929   : > { %4320 = vst.msk [vmem:[#allocation4 + $0x14] sm:$0xf] %vm1102_vm0, %v4316_v36  ;;  %4504 = vst.msk [vmem:[#allocation4 + $0x18] sm:$0xf] %vm1102_vm0, %v4499_v42  ;;  %5007 = vmatpush3.bf16.msra.mxu0 %v5370_v16  ;;  %v4428_v56 = vpop.permute.xlu1 %4427 }
 0x92a   : > { %5008 = vmatprep.subr.bf16.mxu0 %v8522_v30 }
 0x92c   : > { %v4300_v15 = vpop.permute.xlu0 %4299  ;;  %v4172_v6 = vld [vmem:[#allocation4 + $0x4] sm:$0xf] }
 0x92d   : > { %4304 = vst.msk [vmem:[#allocation4 + $0xc] sm:$0xf] %vm1102_vm0, %v4300_v15  ;;  %v4805_v46 = vcombine.low %v7890_v41, %v4172_v6  ;;  %v4597_v21 = vpop.permute.xlu1 %4596 }
 0x92f   : > { %5001 = vmatpush3.bf16.msra.mxu1 %v4805_v46 }
 0x930   : > { %v4501_v61 = vpop.permute.xlu0 %4500  ;;  %v5372_v47 = vld [vmem:[#allocation4 + $0x10] sm:$0xff]   ;;  %5018 = vmatprep.subr.bf16.mxu1 %v8522_v30 }
 0x931   : > { %4505 = vst.msk [vmem:[#allocation4 + $0x1c] sm:$0xf] %vm1102_vm0, %v4501_v61  ;;  %4488 = vst.msk [vmem:[#allocation4 + $0x10] sm:$0xf] %vm1102_vm0, %v4483_v55  ;;  %5009 = vmatpush3.bf16.msra.mxu0 %v5372_v47 }
 0x932   : > { %5003 = vmatmul.mubr.msk.bf16.vlgmr.msra.gmra.mxu1 %vm4038_vm10, %v5371_v24  ;;  %5010 = vmatprep.subr.bf16.mxu0 %v8522_v30 }
 0x933   : > { %5026 = vmatprep.mubr.msk.bf16.mxu1 %vm5528_vm9, %v8522_v30 }
 0x934   : > { %v4284_v13 = vpop.permute.xlu0 %4283  ;;  %v5373_v51 = vld [vmem:[#allocation4 + $0x8] sm:$0xff]  }
 0x935   : > { %4288 = vst.msk [vmem:[#allocation4 + $0x4] sm:$0xf] %vm1102_vm0, %v4284_v13  ;;  %4472 = vst.msk [vmem:[#allocation4 + $0x8] sm:$0xf] %vm1102_vm0, %v4467_v29  ;;  %5011 = vmatpush3.bf16.msra.mxu0 %v5373_v51 }
 0x936   : > { %5012 = vmatprep.subr.bf16.mxu0 %v8522_v30 }
 0x938   : > { %v4485_v58 = vpop.permute.xlu0 %4484  ;;  %v5374_v27 = vld [vmem:[#allocation4 + $0x18] sm:$0xff]  }
 0x939   : > { %4489 = vst.msk [vmem:[#allocation4 + $0x14] sm:$0xf] %vm1102_vm0, %v4485_v58  ;;  %5019 = vmatpush3.bf16.msra.mxu1 %v5374_v27 }
 0x93a   : > { %5020 = vmatprep.subr.bf16.mxu1 %v8522_v30 }
 0x93c   : > { %v4469_v28 = vpop.permute.xlu0 %4468  ;;  %v5375_v31 = vld [vmem:[#allocation4] sm:$0xff]  }
 0x93d   : > { %4473 = vst.msk [vmem:[#allocation4 + $0xc] sm:$0xf] %vm1102_vm0, %v4469_v28  ;;  %4456 = vst.msk [vmem:[#allocation4] sm:$0xf] %vm1102_vm0, %v4451_v14  ;;  %5013 = vmatpush3.bf16.msra.mxu0 %v5375_v31 }
 0x940   : > { %v4453_v38 = vpop.permute.xlu0 %4452  ;;  %v5377_v39 = vld [vmem:[#allocation4 + $0x10] sm:$0xff]   ;;  %5015 = vmatmul.mubr.msk.bf16.vlgmr.msra.gmra.mxu0 %vm4038_vm10, %v5376_v7 }
 0x941   : > { %4457 = vst.msk [vmem:[#allocation4 + $0x4] sm:$0xf] %vm1102_vm0, %v4453_v38  ;;  %5021 = vmatpush3.bf16.msra.mxu1 %v5377_v39 }
 0x942   : > { %5022 = vmatprep.subr.bf16.mxu1 %v8522_v30 }
 0x944   : > { %v5378_v33 = vld [vmem:[#allocation4 + $0x8] sm:$0xff]  }
 0x945   : > { %5023 = vmatpush3.bf16.msra.mxu1 %v5378_v33 }
 0x946   : > { %5024 = vmatprep.subr.bf16.mxu1 %v8522_v30 }
 0x948   : > { %v5379_v44 = vld [vmem:[#allocation4] sm:$0xff]  }
 0x949   : > { %5025 = vmatpush3.bf16.msra.mxu1 %v5379_v44 }
 0x94c   : > { %5027 = vmatmul.mubr.msk.bf16.vlgmr.msra.gmra.mxu1 %vm4038_vm10, %v5380_v63 }
 0x94d   : > { %v7949_v52 = vpop.permute.xlu0 %4006 }
 0x951   : > { %v4095_v48 = vpop.permute.xlu0 %4094 }
 0x955   : > { %v4264_v9 = vpop.permute.xlu0 %4263 }
 0x959   : > { %v4433_v4 = vpop.permute.xlu0 %4432 }
 0x95d   : > { %v4602_v55 = vpop.permute.xlu0 %4601 }
 0x9e2   : > { %v4076_v19 = vpop.f32.mrf.mxu0 }
 0x9e3   : > { %v4077_v17 = vadd.f32 %v4076_v19, %v4002_v54 }
 0x9e4   : > { %v4992_v2 = vpop.f32.mrf.mxu0 }
 0x9e5   : > { %vm4083_vm11 = vcmp.gt.f32.partialorder %v4077_v17, 0.0  ;;  %v4097_v30 = vmul.f32 %v4090_v3, %v4077_v17 }
 0x9e6   : > { %v4079_v62 = vpop.f32.mrf.mxu0 }
 0x9e7   : > { %v4099_v5 = vsel %vm4083_vm11, %v4077_v17, %v4097_v30  ;;  %v4080_v35 = vadd.f32 %v4079_v62, %v7949_v52 }
 0x9e8   : > { %4102 = vst.msk [vmem:[%s7954_s6] sm:$0xff] %vm4101_vm12, %v4099_v5  ;;  %v4993_v53 = vpop.f32.mrf.mxu0 }
 0x9e9   : > { %vm4084_vm13 = vcmp.gt.f32.partialorder %v4080_v35, 0.0  ;;  %v4098_v0 = vmul.f32 %v4095_v48, %v4080_v35 }
 0x9eb   : > { %v4100_v25 = vsel %vm4084_vm13, %v4080_v35, %v4098_v0 }
 0x9ec   : > { %4103 = vst.msk [vmem:[%s7954_s6 + $0x8] sm:$0xff] %vm4101_vm12, %v4100_v25 }
 0x9f2   : > { %v4245_v42 = vpop.f32.mrf.mxu1 }
 0x9f3   : > { %v4246_v41 = vadd.f32 %v4245_v42, %v4002_v54 }
 0x9f4   : > { %v5004_v59 = vpop.f32.mrf.mxu1 }
 0x9f5   : > { %vm4252_vm14 = vcmp.gt.f32.partialorder %v4246_v41, 0.0  ;;  %v4266_v34 = vmul.f32 %v4259_v37, %v4246_v41 }
 0x9f6   : > { %v4248_v32 = vpop.f32.mrf.mxu1 }
 0x9f7   : > { %v4268_v26 = vsel %vm4252_vm14, %v4246_v41, %v4266_v34  ;;  %v4249_v18 = vadd.f32 %v4248_v32, %v7949_v52 }
 0x9f8   : > { %4810 = vst.msk [vmem:[%s7954_s6 + $0x10] sm:$0xff] %vm4101_vm12, %v4268_v26  ;;  %v5005_v12 = vpop.f32.mrf.mxu1 }
 0x9f9   : > { %vm4253_vm15 = vcmp.gt.f32.partialorder %v4249_v18, 0.0  ;;  %v4267_v10 = vmul.f32 %v4264_v9, %v4249_v18 }
 0x9fb   : > { %v4269_v22 = vsel %vm4253_vm15, %v4249_v18, %v4267_v10 }
 0x9fc   : > { %4811 = vst.msk [vmem:[%s7954_s6 + $0x18] sm:$0xff] %vm4101_vm12, %v4269_v22 }
 0xa00   : > { %v4414_v45 = vpop.f32.mrf.mxu0 }
 0xa01   : > { %v4415_v20 = vadd.f32 %v4414_v45, %v4002_v54 }
 0xa02   : > { %v5016_v8 = vpop.f32.mrf.mxu0 }
 0xa03   : > { %vm4421_vm0 = vcmp.gt.f32.partialorder %v4415_v20, 0.0  ;;  %v4435_v60 = vmul.f32 %v4428_v56, %v4415_v20 }
 0xa04   : > { %v4417_v57 = vpop.f32.mrf.mxu0 }
 0xa05   : > { %v4437_v49 = vsel %vm4421_vm0, %v4415_v20, %v4435_v60  ;;  %v4418_v43 = vadd.f32 %v4417_v57, %v7949_v52 }
 0xa06   : > { %4828 = vst.msk [vmem:[%s7954_s6 + $0x20] sm:$0xff] %vm4101_vm12, %v4437_v49  ;;  %v5017_v11 = vpop.f32.mrf.mxu0 }
 0xa07   : > { %vm4422_vm1 = vcmp.gt.f32.partialorder %v4418_v43, 0.0  ;;  %v4436_v50 = vmul.f32 %v4433_v4, %v4418_v43 }
 0xa09   : > { %v4438_v23 = vsel %vm4422_vm1, %v4418_v43, %v4436_v50 }
 0xa0a   : > { %4829 = vst.msk [vmem:[%s7954_s6 + $0x28] sm:$0xff] %vm4101_vm12, %v4438_v23 }
 0xa0c   : > { %v4583_v1 = vpop.f32.mrf.mxu1 }
 0xa0d   : > { %v4584_v40 = vadd.f32 %v4583_v1, %v4002_v54 }
 0xa0e   : > { %v5028_v36 = vpop.f32.mrf.mxu1 }
 0xa0f   : > { %vm4590_vm2 = vcmp.gt.f32.partialorder %v4584_v40, 0.0  ;;  %v4604_v16 = vmul.f32 %v4597_v21, %v4584_v40 }
 0xa10   : > { %v4586_v15 = vpop.f32.mrf.mxu1 }
 0xa11   : > { %v4606_v6 = vsel %vm4590_vm2, %v4584_v40, %v4604_v16  ;;  %v4587_v46 = vadd.f32 %v4586_v15, %v7949_v52 }
 0xa12   : > { %4846 = vst.msk [vmem:[%s7954_s6 + $0x30] sm:$0xff] %vm4101_vm12, %v4606_v6  ;;  %v5029_v24 = vpop.f32.mrf.mxu1 }
 0xa13   : > { %vm4591_vm3 = vcmp.gt.f32.partialorder %v4587_v46, 0.0  ;;  %v4605_v61 = vmul.f32 %v4602_v55, %v4587_v46 }
 0xa15   : > { %v4607_v47 = vsel %vm4591_vm3, %v4587_v46, %v4605_v61 }
 0xa16   : > { %4847 = vst.msk [vmem:[%s7954_s6 + $0x38] sm:$0xff] %vm4101_vm12, %v4607_v47 }
 0xa17   : > { %5400 = shalt.err (!%p5397_p3)
}
 0xa18   : > { %s5401_s16 = scalar_lea.hbm %s7978_s22, 1024  ;;  %s5405_s18 = scalar_lea.hbm %s8040_s14, 2048 }
 0xa19   : > { %p5402_p4 = scmp.ne.s32.totalorder %s7978_s22, %s5401_s16  ;;  %p5406_p9 = scmp.lt.s32.totalorder %s7978_s22, %s8040_s14 }
 0xa1a   : > { %p5407_p10 = scmp.lt.s32.totalorder %s5405_s18, %s5401_s16 }
 0xa1b   : > { %p5403_p7 = pnand %p5402_p4, %p5645_p5 }
 0xa1c   : > { %p5408_p11 = por %p5407_p10, %p5406_p9 }
 0xa1d   : > { %p5404_p8 = pneg %p5403_p7 }
 0xa1f   : > { %p5409_p12 = pnand %p5408_p11, %p5404_p8 }
 0xa21   : > { %5412 = shalt.err (!%p5409_p12)
}
 0xa22   : > { %s5530_s0 = smov 128   ;;  %s5531_s15 = smov 8  }
 0xa23   : > { %5031 = dma.vmem_to_hbm [thread:$0]  (%p5645_p5), %s7980_s19, 1024, %s7978_s22, %s7986_s17, %s5530_s0, %s5530_s0, %s5531_s15  }
 0xa24 PF: > { %s8523_s3 = sld [smem:[#allocation10_spill]] }
 0xa25   : > { %s8524_s7 = sld [smem:[#allocation8_spill]] }
 0xa2a   : > { %p5037_p13 = scmp.ge.s32.totalorder %s8523_s3, 2 }
 0xa2b   : > { %s4640_s4 = sand.u32 1, %s8524_s7  }
 0xa2c   : > { %p5034_p0 = pnand %p5037_p13, %p5649_p6  ;;  %s4641_s6 = scalar_lea.sflag [#allocation6], %s4640_s4 }
 0xa2e   : > { %p5035_p1 = pneg %p5034_p0 }
 0xa30   : > { %5430 = dma.done.wait (%p5035_p1), %s4641_s6, 1024  }
 0xa31   : > { %5432 = vsyncadd (%p5035_p1), %s4641_s6, 4294966272  ;;  %s8526_s16 = sld [smem:[#allocation11_spill]]  ;;  %s8529_s29 = smov %s5439_s30 }
 0xa32   : > { %s8527_s2 = sld [smem:[#allocation9_spill]] }
 0xa33   : > { %s8528_s15 = sld [smem:[#allocation12_spill]] }
 0xa37   : > { %p24_p2 = scmp.ge.s32.totalorder %s8526_s16, 4  }
 0xa38   : > { %s8530_s30 = smov %s8527_s2 }
 0xa39   :  { %26 = sbr.rel (!%p24_p2) target bundleno = 13 (0xd), region = 117 }
 0xa3e   :  { %4646 = vsyncpa [#allocation6], 1 }
 0xa3f   :  { %4648 = vsyncpa [#allocation6 + $0x1], 1 }

</bundles_post_ra>
